<compile_context>
chip_gen: v5e
topology: v5e:2x2
jax: 0.10.0
libtpu: 0.0.40
codegen_flags: <defaults>
</compile_context>

<pallas_src>
import jax
import jax.numpy as jnp
import numpy as np
from jax.experimental import pallas as pl
from jax.experimental.pallas import tpu as pltpu


def _etox_kernel(e_ref, m2_ref, w_ref, b_ref, o_ref):
    # e_ref: (Bblk, tn, n, de)   m2_ref: (Bblk, 1, n, 1)
    # w_ref: (4*de, dx_pad)      b_ref: (1, dx_pad)       o_ref: (Bblk, tn, dx_pad)
    E = e_ref[...].astype(jnp.float32)        # upcast (bf16 input allowed)
    mask = m2_ref[...]                        # (Bblk, 1, n, 1), values in {0, 1}
    valid = mask > 0.0

    # Per-batch neighbor count; one reciprocal reused by mean and variance.
    divide = jnp.sum(mask, axis=2)            # (Bblk, 1, 1)
    inv = pl.reciprocal(divide, approx=False)

    Em = E * mask                             # reused by both variance terms
    s_e = jnp.sum(E, axis=2)                  # (Bblk, tn, de)
    s_em = jnp.sum(Em, axis=2)                # (Bblk, tn, de)
    s_e2m = jnp.sum(E * Em, axis=2)           # (Bblk, tn, de)

    m = s_e * inv                                            # mean (unmasked numerator)
    mi = jnp.min(jnp.where(valid, E, jnp.inf), axis=2)       # masked min
    ma = jnp.max(jnp.where(valid, E, -jnp.inf), axis=2)      # masked max
    # sum((E - m)^2 * mask) / divide, expanded so E*mask is reused.
    std = (s_e2m - 2.0 * m * s_em) * inv + m * m

    z = jnp.concatenate([m, mi, ma, std], axis=-1)           # (Bblk, tn, 4*de)
    bblk, tn, k = z.shape
    out = jnp.dot(z.reshape(bblk * tn, k), w_ref[...],
                  preferred_element_type=jnp.float32) + b_ref[...]
    o_ref[...] = out.reshape(bblk, tn, -1).astype(o_ref.dtype)


_E_BLOCK_BUDGET = 6 * 1024 * 1024   # bytes per single E block (x2 when double-buffered)


def _choose_tiles(bs, n, de, itemsize):
    """Pick (batch_block, row_tile) so Bblk*tn*n*de*itemsize <= _E_BLOCK_BUDGET."""
    row_bytes = max(1, n * de * itemsize)          # one output row's neighbor slab
    max_rows = max(1, _E_BLOCK_BUDGET // row_bytes)
    if bs * n <= max_rows:                         # everything fits in one block
        return bs, n
    if n <= max_rows:                              # several whole batches per step
        return max(1, min(bs, max_rows // n)), n
    # Row-tile within a batch; keep the row tile a multiple of 8 (layout rule).
    tn = min(n, max(8, (max_rows // 8) * 8))
    return 1, tn


def _round_up(x, m):
    return ((x + m - 1) // m) * m


@jax.jit
def etox_pallas(E, e_mask2, W, b):
    """E: (bs, n, n, de), e_mask2: (bs, 1, n, 1), W: (4*de, dx), b: (dx,) -> (bs, n, dx)."""
    bs, n, _, de = E.shape
    dx = W.shape[1]

    # Lane-dense output: pad dx up to a multiple of 128; sliced back at the end.
    dx_pad = _round_up(dx, 128)
    W_p = W.astype(jnp.float32)
    b_p = b.astype(jnp.float32)
    if dx_pad != dx:
        W_p = jnp.zeros((4 * de, dx_pad), jnp.float32).at[:, :dx].set(W_p)
        b_p = jnp.zeros((dx_pad,), jnp.float32).at[:dx].set(b_p)
    b_p = b_p.reshape(1, dx_pad)

    mask = e_mask2.astype(jnp.float32)             # (bs, 1, n, 1)

    itemsize = jnp.dtype(E.dtype).itemsize
    bblk, tn = _choose_tiles(bs, n, de, itemsize)
    grid = (pl.cdiv(bs, bblk), pl.cdiv(n, tn))

    # Explicit VMEM budget: double-buffered blocks + full-size f32 elementwise temps.
    e_blk = bblk * tn * n * de * itemsize
    o_blk = bblk * tn * dx_pad * 4
    m_blk = bblk * n * 4
    w_bytes = 4 * de * dx_pad * 4 + dx_pad * 4
    est = (2 * e_blk                               # double-buffered E input blocks
           + 3 * (bblk * tn * n * de * 4)          # elementwise temporaries (Em, E*Em, selects)
           + 2 * (o_blk + m_blk) + w_bytes
           + (8 << 20))                            # headroom for compiler-internal scratch
    vmem_limit = int(min(max(est, 32 << 20), 56 << 20))   # stays under v7x's 64 MiB

    grid_spec = pltpu.PrefetchScalarGridSpec(
        num_scalar_prefetch=0,
        grid=grid,
        in_specs=[
            pl.BlockSpec((bblk, tn, n, de), lambda bi, ri: (bi, ri, 0, 0)),
            pl.BlockSpec((bblk, 1, n, 1), lambda bi, ri: (bi, 0, 0, 0)),
            pl.BlockSpec((4 * de, dx_pad), lambda bi, ri: (0, 0)),
            pl.BlockSpec((1, dx_pad), lambda bi, ri: (0, 0)),
        ],
        out_specs=pl.BlockSpec((bblk, tn, dx_pad), lambda bi, ri: (bi, ri, 0)),
    )

    out = pl.pallas_call(
        _etox_kernel,
        out_shape=jax.ShapeDtypeStruct((bs, n, dx_pad), jnp.float32),
        grid_spec=grid_spec,
        compiler_params=pltpu.CompilerParams(
            dimension_semantics=("parallel", "parallel"),
            vmem_limit_bytes=vmem_limit,
        ),
    )(E, mask, W_p, b_p)
    return out[..., :dx]


def etox_reference(E, e_mask2, W, b):
    """Pure-JAX transcription of the PyTorch EtoX.forward (the spec)."""
    bs, n, _, de = E.shape
    E = E.astype(jnp.float32)
    mask = jnp.broadcast_to(e_mask2.astype(jnp.float32), (bs, n, n, de))
    imask = 1.0 - mask
    divide = jnp.sum(mask, axis=2)                 # (bs, n, de)
    m = jnp.sum(E, axis=2) / divide
    mi = jnp.min(E + 100000.0 * imask, axis=2)
    ma = jnp.max(E - 100000.0 * imask, axis=2)
    std = jnp.sum((E - m[:, :, None, :]) ** 2 * mask, axis=2) / divide
    z = jnp.concatenate([m, mi, ma, std], axis=-1)
    return z @ W + b


if __name__ == "__main__":
    bs, n, de, dx = 2, 16, 8, 32

    key = jax.random.PRNGKey(0)
    k_e, k_w, k_b = jax.random.split(key, 3)

    E = jax.random.normal(k_e, (bs, n, n, de), dtype=jnp.float32)

    # Ragged number of valid neighbor columns per batch (all counts > 0 so the
    # masked statistics stay finite).
    valid_counts = np.array([12, 10])
    col = np.arange(n)[None, :] < valid_counts[:, None]            # (bs, n)
    e_mask2 = jnp.asarray(col, jnp.float32).reshape(bs, 1, n, 1)

    # nn.Linear(4*de, dx)-style init; weight stored transposed as (4*de, dx).
    lim = 1.0 / np.sqrt(4 * de)
    W = jax.random.uniform(k_w, (4 * de, dx), jnp.float32, minval=-lim, maxval=lim)
    b = jax.random.uniform(k_b, (dx,), jnp.float32, minval=-lim, maxval=lim)

    out = jax.block_until_ready(etox_pallas(E, e_mask2, W, b))
    ref = etox_reference(E, e_mask2, W, b)

    assert out.shape == (bs, n, dx)
    np.testing.assert_allclose(np.asarray(out), np.asarray(ref), rtol=1e-4, atol=1e-5)

    print("KERNEL_OK")
</pallas_src>

<mosaic_0001>
module attributes {stable_mosaic.version = 11 : i64} {
  func.func @_etox_kernel(%arg0: i32, %arg1: i32, %arg2: memref<2x16x16x8xf32, #tpu.memory_space<vmem>>, %arg3: memref<2x1x16x1xf32, #tpu.memory_space<vmem>>, %arg4: memref<32x128xf32, #tpu.memory_space<vmem>>, %arg5: memref<1x128xf32, #tpu.memory_space<vmem>>, %arg6: memref<2x16x128xf32, #tpu.memory_space<vmem>>) attributes {dimension_semantics = [#tpu.dimension_semantics<parallel>, #tpu.dimension_semantics<parallel>], iteration_bounds = array<i64: 1, 1>, scalar_prefetch = 0 : i64, scratch_operands = 0 : i64, tpu.core_type = #tpu.core_type<tc>, window_params = [{transform_indices = @transform_0, window_bounds = array<i64: 2, 16, 16, 8>}, {transform_indices = @transform_1, window_bounds = array<i64: 2, 1, 16, 1>}, {pipeline_mode = #tpu.pipeline_mode<synchronous>, transform_indices = @transform_2, window_bounds = array<i64: 32, 128>}, {pipeline_mode = #tpu.pipeline_mode<synchronous>, transform_indices = @transform_3, window_bounds = array<i64: 1, 128>}, {transform_indices = @transform_4, window_bounds = array<i64: 2, 16, 128>}]} {
    %c0 = arith.constant 0 : index
    %c0_0 = arith.constant 0 : index
    %c0_1 = arith.constant 0 : index
    %c0_2 = arith.constant 0 : index
    %0 = vector.load %arg2[%c0, %c0_0, %c0_1, %c0_2] : memref<2x16x16x8xf32, #tpu.memory_space<vmem>>, vector<2x16x16x8xf32>
    %c0_3 = arith.constant 0 : index
    %c0_4 = arith.constant 0 : index
    %c0_5 = arith.constant 0 : index
    %c0_6 = arith.constant 0 : index
    %1 = vector.load %arg3[%c0_3, %c0_4, %c0_5, %c0_6] : memref<2x1x16x1xf32, #tpu.memory_space<vmem>>, vector<2x1x16x1xf32>
    %cst = arith.constant 0.000000e+00 : f32
    %2 = vector.broadcast %cst : f32 to vector<2x1x16x1xf32>
    %3 = arith.cmpf ogt, %1, %2 : vector<2x1x16x1xf32>
    %cst_7 = arith.constant dense<0.000000e+00> : vector<2x1x1xf32>
    %4 = vector.multi_reduction <add>, %1, %cst_7 [2] : vector<2x1x16x1xf32> to vector<2x1x1xf32>
    %5 = tpu.reciprocal %4 : vector<2x1x1xf32> -> vector<2x1x1xf32>
    %6 = vector.broadcast %1 : vector<2x1x16x1xf32> to vector<2x16x16x8xf32>
    %7 = arith.mulf %0, %6 : vector<2x16x16x8xf32>
    %cst_8 = arith.constant dense<0.000000e+00> : vector<2x16x8xf32>
    %8 = vector.multi_reduction <add>, %0, %cst_8 [2] : vector<2x16x16x8xf32> to vector<2x16x8xf32>
    %cst_9 = arith.constant dense<0.000000e+00> : vector<2x16x8xf32>
    %9 = vector.multi_reduction <add>, %7, %cst_9 [2] : vector<2x16x16x8xf32> to vector<2x16x8xf32>
    %10 = arith.mulf %0, %7 : vector<2x16x16x8xf32>
    %cst_10 = arith.constant dense<0.000000e+00> : vector<2x16x8xf32>
    %11 = vector.multi_reduction <add>, %10, %cst_10 [2] : vector<2x16x16x8xf32> to vector<2x16x8xf32>
    %12 = vector.broadcast %5 : vector<2x1x1xf32> to vector<2x16x8xf32>
    %13 = arith.mulf %8, %12 : vector<2x16x8xf32>
    %cst_11 = arith.constant 0x7F800000 : f32
    %14 = vector.shape_cast %3 : vector<2x1x16x1xi1> to vector<2x1x16x1xi1>
    %15 = vector.broadcast %14 : vector<2x1x16x1xi1> to vector<2x16x16x8xi1>
    %16 = vector.broadcast %cst_11 : f32 to vector<2x16x16x8xf32>
    %17 = arith.select %15, %0, %16 : vector<2x16x16x8xi1>, vector<2x16x16x8xf32>
    %cst_12 = arith.constant dense<0x7F800000> : vector<2x16x8xf32>
    %18 = vector.multi_reduction <minimumf>, %17, %cst_12 [2] : vector<2x16x16x8xf32> to vector<2x16x8xf32>
    %cst_13 = arith.constant 0xFF800000 : f32
    %19 = vector.shape_cast %3 : vector<2x1x16x1xi1> to vector<2x1x16x1xi1>
    %20 = vector.broadcast %19 : vector<2x1x16x1xi1> to vector<2x16x16x8xi1>
    %21 = vector.broadcast %cst_13 : f32 to vector<2x16x16x8xf32>
    %22 = arith.select %20, %0, %21 : vector<2x16x16x8xi1>, vector<2x16x16x8xf32>
    %cst_14 = arith.constant dense<0xFF800000> : vector<2x16x8xf32>
    %23 = vector.multi_reduction <maximumf>, %22, %cst_14 [2] : vector<2x16x16x8xf32> to vector<2x16x8xf32>
    %cst_15 = arith.constant 2.000000e+00 : f32
    %24 = vector.broadcast %cst_15 : f32 to vector<2x16x8xf32>
    %25 = arith.mulf %24, %13 : vector<2x16x8xf32>
    %26 = arith.mulf %25, %9 : vector<2x16x8xf32>
    %27 = arith.subf %11, %26 : vector<2x16x8xf32>
    %28 = vector.broadcast %5 : vector<2x1x1xf32> to vector<2x16x8xf32>
    %29 = arith.mulf %27, %28 : vector<2x16x8xf32>
    %30 = arith.mulf %13, %13 : vector<2x16x8xf32>
    %31 = arith.addf %29, %30 : vector<2x16x8xf32>
    %32 = tpu.concatenate %13, %18, %23, %31 in 2 : vector<2x16x8xf32>, vector<2x16x8xf32>, vector<2x16x8xf32>, vector<2x16x8xf32> -> vector<2x16x32xf32>
    %33 = vector.shape_cast %32 : vector<2x16x32xf32> to vector<32x32xf32>
    %c0_16 = arith.constant 0 : index
    %c0_17 = arith.constant 0 : index
    %34 = vector.load %arg4[%c0_16, %c0_17] : memref<32x128xf32, #tpu.memory_space<vmem>>, vector<32x128xf32>
    %cst_18 = arith.constant dense<0.000000e+00> : vector<32x128xf32>
    %35 = tpu.matmul %33, %34, %cst_18 {dimension_numbers = #tpu.dot_dimension_numbers<[1], [0], [0], [1], [0, 0, 1, 1], [], []>} : vector<32x32xf32>, vector<32x128xf32>, vector<32x128xf32> -> vector<32x128xf32>
    %c0_19 = arith.constant 0 : index
    %c0_20 = arith.constant 0 : index
    %36 = vector.load %arg5[%c0_19, %c0_20] : memref<1x128xf32, #tpu.memory_space<vmem>>, vector<1x128xf32>
    %37 = vector.broadcast %36 : vector<1x128xf32> to vector<32x128xf32>
    %38 = arith.addf %35, %37 : vector<32x128xf32>
    %39 = vector.shape_cast %38 : vector<32x128xf32> to vector<2x16x128xf32>
    %c0_21 = arith.constant 0 : index
    %c0_22 = arith.constant 0 : index
    %c0_23 = arith.constant 0 : index
    %40 = vector.load %arg6[%c0_21, %c0_22, %c0_23] : memref<2x16x128xf32, #tpu.memory_space<vmem>>, vector<2x16x128xf32>
    tpu.vector_store %arg6[%c0_21, %c0_22, %c0_23], %39 {strides = array<i32>} : memref<2x16x128xf32, #tpu.memory_space<vmem>>, vector<2x16x128xf32>,
    return
  }
  func.func @transform_0(%arg0: i32, %arg1: i32) -> (i32, i32, i32, i32) {
    %c0_i32 = arith.constant 0 : i32
    %c0_i32_0 = arith.constant 0 : i32
    %c0_i32_1 = arith.constant 0 : i32
    return %arg0, %arg1, %c0_i32, %c0_i32_0 : i32, i32, i32, i32
  }
  func.func @transform_1(%arg0: i32, %arg1: i32) -> (i32, i32, i32, i32) {
    %c0_i32 = arith.constant 0 : i32
    %c0_i32_0 = arith.constant 0 : i32
    %c0_i32_1 = arith.constant 0 : i32
    %c0_i32_2 = arith.constant 0 : i32
    return %arg0, %c0_i32, %c0_i32_0, %c0_i32_1 : i32, i32, i32, i32
  }
  func.func @transform_2(%arg0: i32, %arg1: i32) -> (i32, i32) {
    %c0_i32 = arith.constant 0 : i32
    %c0_i32_0 = arith.constant 0 : i32
    %c0_i32_1 = arith.constant 0 : i32
    return %c0_i32, %c0_i32_0 : i32, i32
  }
  func.func @transform_3(%arg0: i32, %arg1: i32) -> (i32, i32) {
    %c0_i32 = arith.constant 0 : i32
    %c0_i32_0 = arith.constant 0 : i32
    %c0_i32_1 = arith.constant 0 : i32
    return %c0_i32, %c0_i32_0 : i32, i32
  }
  func.func @transform_4(%arg0: i32, %arg1: i32) -> (i32, i32, i32) {
    %c0_i32 = arith.constant 0 : i32
    %c0_i32_0 = arith.constant 0 : i32
    return %arg0, %arg1, %c0_i32 : i32, i32, i32
  }
}

</mosaic_0001>

<bundles_post_ra>
// kernel: etox_pallas.1
= control target key start
LH: loop header
LB: loop body
LE: loop exit
PB: predicated region body
PF: predicated region fallthrough
CT: control target
= control target key end

     0   :  { %vm90_vm0 = vcmask 7168   ;;  %v2601_v3 = vmov 0   ;;  %s5114_s0 = inlined_call_operand.vmem [shape: f32[2,16,16,8], index: 0, kind: input, shape index: {}]   ;;  %s5115_s1 = inlined_call_operand.vmem [shape: f32[2,1,16,1], index: 1, kind: input, shape index: {}]   ;;  %s5116_s2 = inlined_call_operand.vmem [shape: f32[32,128], index: 2, kind: input, shape index: {}]   ;;  %s5117_s3 = inlined_call_operand.vmem [shape: f32[1,128], index: 3, kind: input, shape index: {}]   ;;  %s5118_s4 = inlined_call_operand.hbm [shape: f32[2,16,128], index: 4, kind: output, shape index: {}]  }
   0x1   :  { %v84_v0 = vld [vmem:[%s5115_s1 + $0x10] sm:$0xff]  ;;  %v82_v1 = vld [vmem:[%s5115_s1] sm:$0xff]  ;;  %v85_v2 = vld [vmem:[%s5115_s1 + $0x18] sm:$0xff]  ;;  %2504 = vset.pattern.permute.xlu1 %v2601_v3  ;;  %2503 = vset.pattern.permute.xlu0 %v2601_v3 }
   0x2   :  { %v100_v4 = vsel %vm90_vm0, %v84_v0, 0.0  ;;  %v91_v5 = vsel %vm90_vm0, %v82_v1, 0.0  ;;  %vm88_vm1 = vcmp.gt.f32.partialorder %v84_v0, 0.0  ;;  %v101_v6 = vsel %vm90_vm0, %v85_v2, 0.0  ;;  %v83_v7 = vld [vmem:[%s5115_s1 + $0x8] sm:$0xff]  ;;  %2505 = vset.pattern.permute.xlu2 %v2601_v3  ;;  %149 = vperm.xlu0 %2503, %v84_v0  }
   0x3   :  { %v1194_v8 = vsel %vm88_vm1, 1, %v2601_v3  ;;  %v102_v9 = vadd.f32 %v101_v6, %v100_v4  ;;  %v92_v10 = vsel %vm90_vm0, %v83_v7, 0.0  ;;  %139 = vperm.xlu1 %2504, %v82_v1  }
   0x4   :  { %1203 = vperm.xlu2 %2505, %v1194_v8   ;;  %v93_v11 = vadd.f32 %v92_v10, %v91_v5 }
   0x5   :  { %9 = vsyncpa [#allocation3], 0  ;;  %v103_v12 = vrot.slane %v102_v9, 4  ;;  %vm89_vm2 = vcmp.gt.f32.partialorder %v85_v2, 0.0  ;;  %vm86_vm3 = vcmp.gt.f32.partialorder %v82_v1, 0.0  ;;  %vm87_vm4 = vcmp.gt.f32.partialorder %v83_v7, 0.0 }
   0x6   :  { %v94_v13 = vrot.slane %v93_v11, 4  ;;  %v1195_v17 = vsel %vm89_vm2, 1, %v2601_v3  ;;  %v1192_v25 = vsel %vm86_vm3, 1, %v2601_v3  ;;  %v1193_v26 = vsel %vm87_vm4, 1, %v2601_v3  ;;  %v2647_v47 = vld [vmem:[%s5114_s0 + $0x180] sm:$0xff]  ;;  %v2652_v48 = vld [vmem:[%s5114_s0 + $0x190] sm:$0xff] }
   0x7   :  { %v104_v14 = vadd.f32 %v103_v12, %v102_v9  ;;  %v2657_v49 = vld [vmem:[%s5114_s0 + $0x1a0] sm:$0xff]  ;;  %v2662_v50 = vld [vmem:[%s5114_s0 + $0x1b0] sm:$0xff]  ;;  %vm221_vm14 = vcmask 64512   ;;  %v2758_v12 = vld [vmem:[%s5114_s0 + $0x188] sm:$0xff]  ;;  %vm2140_vm0 = vcmask 1041409   ;;  %vm2142_vm1 = vcmask 1042434  }
   0x8   :  { %v95_v15 = vadd.f32 %v94_v13, %v93_v11  ;;  %v2667_v51 = vld [vmem:[%s5114_s0 + $0x1c0] sm:$0xff]  ;;  %v2674_v53 = vld [vmem:[%s5114_s0 + $0x1d0] sm:$0xff]  ;;  %v2763_v13 = vld [vmem:[%s5114_s0 + $0x198] sm:$0xff]  ;;  %vm2144_vm2 = vcmask 1043459   ;;  %vm2146_vm3 = vcmask 1044484   ;;  %vm2148_vm4 = vcmask 1045509  }
   0x9   :  { %v105_v16 = vrot.slane %v104_v14, 2  ;;  %v2679_v54 = vld [vmem:[%s5114_s0 + $0x1e0] sm:$0xff]  ;;  %v2684_v55 = vld [vmem:[%s5114_s0 + $0x1f0] sm:$0xff]  ;;  %s2602_s6 = smov 8   ;;  %s2603_s7 = smov 16  }
   0xa   :  { %v96_v18 = vrot.slane %v95_v15, 2  ;;  %154 = vperm.xlu0 %2503, %v85_v2   ;;  %5159 = vst [vmem:[#allocation5_spill] sm:$0xff] %v2679_v54  ;;  %v2690_v56 = vld [vmem:[%s5114_s0 + $0x100] sm:$0xff]  ;;  %v2695_v57 = vld [vmem:[%s5114_s0 + $0x110] sm:$0xff]  ;;  %s2604_s11 = smov 24   ;;  %s2469_s10 = sshll.u32 %s5118_s4, 4  ;;  %s2470_s10 = int_to_ptr.hbm [resolvable:$true] %s2469_s10 }
   0xb   :  { %v106_v19 = vadd.f32 %v105_v16, %v104_v14  ;;  %144 = vperm.xlu1 %2504, %v83_v7   ;;  %5160 = vst [vmem:[#allocation6_spill] sm:$0xff] %v2684_v55  ;;  %v2712_v62 = vld [vmem:[%s5114_s0 + $0x120] sm:$0xff]  ;;  %v2717_v63 = vld [vmem:[%s5114_s0 + $0x130] sm:$0xff]  ;;  %s2605_s12 = smov [#allocation2]  }
   0xc   :  { %v97_v20 = vadd.f32 %v96_v18, %v95_v15  ;;  %1206 = vperm.xlu2 %2505, %v1195_v17   ;;  %v2734_v4 = vld [vmem:[%s5114_s0 + $0x140] sm:$0xff]  ;;  %v2739_v5 = vld [vmem:[%s5114_s0 + $0x150] sm:$0xff]  ;;  %v2772_v18 = vld [vmem:[%s5114_s0 + $0x1a8] sm:$0xff]  ;;  %s2467_s13 = sshll.u32 %s2605_s12, 4  ;;  %s2468_s13 = int_to_ptr.vmem [resolvable:$true] %s2467_s13 }
   0xd   :  { %v107_v21 = vrot.slane %v106_v19, 1  ;;  %v2748_v10 = vld [vmem:[%s5114_s0 + $0x160] sm:$0xff]  ;;  %v2753_v11 = vld [vmem:[%s5114_s0 + $0x170] sm:$0xff] }
   0xe   :  { %v98_v22 = vrot.slane %v97_v20, 1 }
   0xf   :  { %v108_v23 = vadd.f32 %v107_v21, %v106_v19  ;;  %v2777_v19 = vld [vmem:[%s5114_s0 + $0x1b8] sm:$0xff] }
  0x10   :  { %v99_v24 = vadd.f32 %v98_v22, %v97_v20 }
  0x11   :  { %2507 = vrcp.f32 %v108_v23  ;;  %vm128_vm5 = vweird.f32 %v108_v23  ;;  %v134_v30 = vand.u32 2147483648, %v108_v23  ;;  %v132_v33 = vand.u32 2147483647, %v108_v23 }
  0x12   :  { %2509 = vrcp.f32 %v99_v24  ;;  %1197 = vperm.xlu0 %2503, %v1192_v25   ;;  %v120_v34 = vand.u32 2147483648, %v99_v24  ;;  %vm114_vm7 = vweird.f32 %v99_v24  ;;  %v118_v36 = vand.u32 2147483647, %v99_v24  ;;  %v2799_v25 = vld [vmem:[%s5114_s0 + $0x1d8] sm:$0xff] }
  0x13   :  { %1200 = vperm.xlu1 %2504, %v1193_v26   ;;  %v135_v38 = vor.u32 1.1754944e-38, %v134_v30  ;;  %vm133_vm10 = vcmp.eq.f32.partialorder %v132_v33, 8.507059e+37 }
  0x14   :  { %v121_v41 = vor.u32 1.1754944e-38, %v120_v34  ;;  %vm119_vm12 = vcmp.eq.f32.partialorder %v118_v36, 8.507059e+37 }
  0x17   :  { %v2508_v27 = vpop.eup %2507 }
  0x18   :  { %v2510_v28 = vpop.eup %2509  ;;  %v124_v29 = vmul.f32 %v2508_v27, %v108_v23  ;;  %vm129_vm6 = vweird.f32 %v2508_v27 }
  0x19   :  { %v110_v31 = vmul.f32 %v2510_v28, %v99_v24  ;;  %vm115_vm8 = vweird.f32 %v2510_v28  ;;  %vm130_vm9 = vmor %vm128_vm5, %vm129_vm6  ;;  %v2794_v24 = vld [vmem:[%s5114_s0 + $0x1c8] sm:$0xff]  ;;  %vm2150_vm5 = vcmask 1046534   ;;  %vm2152_vm6 = vcmask 1047559  }
  0x1a   :  { %v125_v32 = vsub.f32 1.0, %v124_v29  ;;  %vm116_vm11 = vmor %vm114_vm7, %vm115_vm8 }
  0x1b   :  { %v111_v35 = vsub.f32 1.0, %v110_v31  ;;  %v2820_v31 = vld [vmem:[%s5114_s0 + $0x1e8] sm:$0xff] }
  0x1c   :  { %v126_v37 = vmul.f32 %v2508_v27, %v125_v32  ;;  %5161 = vst [vmem:[#allocation7_spill] sm:$0xff] %v2820_v31  ;;  %v2825_v32 = vld [vmem:[%s5114_s0 + $0x1f8] sm:$0xff] }
  0x1d   :  { %v112_v39 = vmul.f32 %v2510_v28, %v111_v35  ;;  %5162 = vst [vmem:[#allocation8_spill] sm:$0xff] %v2825_v32 }
  0x1e   :  { %v127_v40 = vadd.f32 %v2508_v27, %v126_v37 }
  0x1f   :  { %v113_v42 = vadd.f32 %v2510_v28, %v112_v39 }
  0x20   :  { %v131_v43 = vsel %vm130_vm9, %v2508_v27, %v127_v40  ;;  %vm2399_vm9 = vcmask 130048  }
  0x21   :  { %v136_v44 = vsel %vm133_vm10, %v135_v38, %v131_v43  ;;  %v117_v45 = vsel %vm116_vm11, %v2510_v28, %v113_v42  ;;  %vm2404_vm10 = vcmask 195584   ;;  %vm2417_vm11 = vcmask 261120  }
  0x22   :  { %1157 = vperm.xlu2 %2505, %v136_v44   ;;  %v122_v46 = vsel %vm119_vm12, %v121_v41, %v117_v45 }
  0x23   :  { %1152 = vperm.xlu0 %2503, %v122_v46  }
  0x5e   :  { %v2669_v52 = vpop.permute.xlu2 %1203 }
  0x5f   :  { %vm1210_vm13 = vcmp.eq.s32.totalorder %v2669_v52, 1 }
  0x60   :  { %v1260_v58 = vsel %vm1210_vm13, %v2647_v47, inf  ;;  %v1262_v59 = vsel %vm1210_vm13, %v2652_v48, inf  ;;  %v1264_v60 = vsel %vm1210_vm13, %v2657_v49, inf  ;;  %v1266_v61 = vsel %vm1210_vm13, %v2662_v50, inf }
  0x61   :  { %v1268_v0 = vsel %vm1210_vm13, %v2667_v51, inf  ;;  %v1270_v1 = vsel %vm1210_vm13, %v2674_v53, inf  ;;  %v1272_v2 = vsel %vm1210_vm13, %v2679_v54, inf  ;;  %v1274_v3 = vsel %vm1210_vm13, %v2684_v55, inf }
  0x62   :  { %v1492_v6 = vsel %vm221_vm14, %v1260_v58, inf  ;;  %v1501_v7 = vsel %vm221_vm14, %v1262_v59, inf  ;;  %v1510_v8 = vsel %vm221_vm14, %v1264_v60, inf  ;;  %v1519_v9 = vsel %vm221_vm14, %v1266_v61, inf }
  0x63   :  { %v1528_v14 = vsel %vm221_vm14, %v1268_v0, inf  ;;  %v1537_v15 = vsel %vm221_vm14, %v1270_v1, inf  ;;  %v1546_v16 = vsel %vm221_vm14, %v1272_v2, inf  ;;  %v1555_v17 = vsel %vm221_vm14, %v1274_v3, inf }
  0x64   :  { %v1244_v20 = vsel %vm1210_vm13, %v2690_v56, inf  ;;  %v1246_v21 = vsel %vm1210_vm13, %v2695_v57, inf  ;;  %v1248_v22 = vsel %vm1210_vm13, %v2712_v62, inf  ;;  %v1250_v23 = vsel %vm1210_vm13, %v2717_v63, inf }
  0x65   :  { %v1252_v26 = vsel %vm1210_vm13, %v2734_v4, inf  ;;  %v1254_v27 = vsel %vm1210_vm13, %v2739_v5, inf  ;;  %v1256_v28 = vsel %vm1210_vm13, %v2748_v10, inf  ;;  %v2813_v29 = vsel %vm1210_vm13, %v2753_v11, inf }
  0x66   :  { %v2815_v30 = vpop.permute.xlu2 %1206  ;;  %v2828_v33 = vsel %vm221_vm14, %v1244_v20, inf  ;;  %v2831_v34 = vsel %vm221_vm14, %v1246_v21, inf  ;;  %v2834_v35 = vsel %vm221_vm14, %v1248_v22, inf  ;;  %v2837_v36 = vsel %vm221_vm14, %v1250_v23, inf }
  0x67   :  { %vm1211_vm15 = vcmp.eq.s32.totalorder %v2815_v30, 1  ;;  %v2841_v37 = vsel %vm221_vm14, %v1252_v26, inf  ;;  %v2844_v38 = vsel %vm221_vm14, %v1254_v27, inf  ;;  %v2847_v39 = vsel %vm221_vm14, %v1256_v28, inf }
  0x68   :  { %v1261_v40 = vsel %vm1211_vm15, %v2758_v12, inf  ;;  %v1263_v41 = vsel %vm1211_vm15, %v2763_v13, inf  ;;  %v1265_v42 = vsel %vm1211_vm15, %v2772_v18, inf  ;;  %v1267_v43 = vsel %vm1211_vm15, %v2777_v19, inf }
  0x69   :  { %v1269_v44 = vsel %vm1211_vm15, %v2794_v24, inf  ;;  %v1271_v45 = vsel %vm1211_vm15, %v2799_v25, inf  ;;  %v1273_v46 = vsel %vm1211_vm15, %v2820_v31, inf  ;;  %v1275_v58 = vsel %vm1211_vm15, %v2825_v32, inf }
  0x6a   :  { %v1493_v59 = vsel %vm221_vm14, %v1261_v40, inf  ;;  %v1502_v60 = vsel %vm221_vm14, %v1263_v41, inf  ;;  %v1511_v61 = vsel %vm221_vm14, %v1265_v42, inf  ;;  %v1520_v0 = vsel %vm221_vm14, %v1267_v43, inf }
  0x6b   :  { %v1494_v1 = vmin.f32 %v1492_v6, %v1493_v59  ;;  %v1503_v2 = vmin.f32 %v1501_v7, %v1502_v60  ;;  %v1512_v3 = vmin.f32 %v1510_v8, %v1511_v61  ;;  %v1521_v20 = vmin.f32 %v1519_v9, %v1520_v0 }
  0x6c   :  { %v1529_v21 = vsel %vm221_vm14, %v1269_v44, inf  ;;  %v1538_v22 = vsel %vm221_vm14, %v1271_v45, inf  ;;  %v1547_v23 = vsel %vm221_vm14, %v1273_v46, inf  ;;  %v1556_v26 = vsel %vm221_vm14, %v1275_v58, inf }
  0x6d   :  { %v1495_v27 = vrot.slane %v1494_v1, 4  ;;  %v1504_v28 = vrot.slane %v1503_v2, 4  ;;  %v1513_v40 = vrot.slane %v1512_v3, 4  ;;  %v1522_v41 = vrot.slane %v1521_v20, 4 }
  0x6e   :  { %v1530_v32 = vmin.f32 %v1528_v14, %v1529_v21  ;;  %v1539_v42 = vmin.f32 %v1537_v15, %v1538_v22  ;;  %v1548_v55 = vmin.f32 %v1546_v16, %v1547_v23  ;;  %v1557_v43 = vmin.f32 %v1555_v17, %v1556_v26 }
  0x6f   :  { %v1496_v6 = vmin.f32 %v1494_v1, %v1495_v27  ;;  %v1505_v7 = vmin.f32 %v1503_v2, %v1504_v28  ;;  %v1514_v8 = vmin.f32 %v1512_v3, %v1513_v40  ;;  %v1523_v9 = vmin.f32 %v1521_v20, %v1522_v41 }
  0x70   :  { %v1531_v44 = vrot.slane %v1530_v32, 4  ;;  %v1540_v59 = vrot.slane %v1539_v42, 4  ;;  %v1549_v45 = vrot.slane %v1548_v55, 4  ;;  %v1558_v60 = vrot.slane %v1557_v43, 4 }
  0x71   :  { %v1497_v46 = vrot.slane %v1496_v6, 2  ;;  %v1506_v58 = vrot.slane %v1505_v7, 2  ;;  %v1515_v61 = vrot.slane %v1514_v8, 2  ;;  %v1524_v0 = vrot.slane %v1523_v9, 2 }
  0x72   :  { %v1532_v31 = vmin.f32 %v1530_v32, %v1531_v44  ;;  %v1541_v14 = vmin.f32 %v1539_v42, %v1540_v59  ;;  %v1550_v15 = vmin.f32 %v1548_v55, %v1549_v45  ;;  %v1559_v16 = vmin.f32 %v1557_v43, %v1558_v60  ;;  %v2884_v43 = vld [vmem:[%s5114_s0 + $0x108] sm:$0xff]  ;;  %v2899_v59 = vld [vmem:[%s5114_s0 + $0x138] sm:$0xff] }
  0x73   :  { %v1498_v17 = vmin.f32 %v1496_v6, %v1497_v46  ;;  %v1507_v1 = vmin.f32 %v1505_v7, %v1506_v58  ;;  %v1516_v2 = vmin.f32 %v1514_v8, %v1515_v61  ;;  %v1525_v3 = vmin.f32 %v1523_v9, %v1524_v0  ;;  %v2889_v6 = vld [vmem:[%s5114_s0 + $0x118] sm:$0xff]  ;;  %v2894_v7 = vld [vmem:[%s5114_s0 + $0x128] sm:$0xff] }
  0x74   :  { %v1533_v20 = vrot.slane %v1532_v31, 2  ;;  %v1542_v21 = vrot.slane %v1541_v14, 2  ;;  %v1551_v22 = vrot.slane %v1550_v15, 2  ;;  %v1560_v23 = vrot.slane %v1559_v16, 2  ;;  %v2904_v61 = vld [vmem:[%s5114_s0 + $0x148] sm:$0xff]  ;;  %v2909_v0 = vld [vmem:[%s5114_s0 + $0x158] sm:$0xff] }
  0x75   :  { %v1499_v26 = vrot.slane %v1498_v17, 1  ;;  %v1508_v27 = vrot.slane %v1507_v1, 1  ;;  %v1517_v28 = vrot.slane %v1516_v2, 1  ;;  %v1526_v40 = vrot.slane %v1525_v3, 1 }
  0x76   :  { %v1534_v32 = vmin.f32 %v1532_v31, %v1533_v20  ;;  %v1543_v41 = vmin.f32 %v1541_v14, %v1542_v21  ;;  %v1552_v55 = vmin.f32 %v1550_v15, %v1551_v22  ;;  %v1561_v42 = vmin.f32 %v1559_v16, %v1560_v23  ;;  %v2915_v15 = vld [vmem:[%s5114_s0 + $0x168] sm:$0xff]  ;;  %v2920_v16 = vld [vmem:[%s5114_s0 + $0x178] sm:$0xff] }
  0x77   :  { %v1500_v8 = vmin.f32 %v1498_v17, %v1499_v26  ;;  %v1509_v31 = vmin.f32 %v1507_v1, %v1508_v27  ;;  %v1518_v9 = vmin.f32 %v1516_v2, %v1517_v28  ;;  %v1527_v44 = vmin.f32 %v1525_v3, %v1526_v40 }
  0x78   :  { %v1535_v45 = vrot.slane %v1534_v32, 1  ;;  %v1544_v60 = vrot.slane %v1543_v41, 1  ;;  %v1553_v46 = vrot.slane %v1552_v55, 1  ;;  %v1562_v58 = vrot.slane %v1561_v42, 1 }
  0x79   :  { %v2232_v14 = vsel %vm2140_vm0, %v1509_v31, %v1500_v8  ;;  %v1245_v17 = vsel %vm1211_vm15, %v2884_v43, inf  ;;  %v1247_v1 = vsel %vm1211_vm15, %v2889_v6, inf  ;;  %v1249_v2 = vsel %vm1211_vm15, %v2894_v7, inf }
  0x7a   :  { %v1536_v3 = vmin.f32 %v1534_v32, %v1535_v45  ;;  %v1545_v20 = vmin.f32 %v1543_v41, %v1544_v60  ;;  %v1554_v21 = vmin.f32 %v1552_v55, %v1553_v46  ;;  %v1563_v22 = vmin.f32 %v1561_v42, %v1562_v58 }
  0x7b   :  { %v2233_v23 = vsel %vm2142_vm1, %v1518_v9, %v2232_v14  ;;  %v1251_v26 = vsel %vm1211_vm15, %v2899_v59, inf  ;;  %v1253_v27 = vsel %vm1211_vm15, %v2904_v61, inf  ;;  %v1255_v28 = vsel %vm1211_vm15, %v2909_v0, inf }
  0x7c   :  { %v2234_v40 = vsel %vm2144_vm2, %v1527_v44, %v2233_v23  ;;  %v1257_v32 = vsel %vm1211_vm15, %v2915_v15, inf  ;;  %v1259_v41 = vsel %vm1211_vm15, %v2920_v16, inf  ;;  %v1421_v55 = vsel %vm221_vm14, %v1245_v17, inf }
  0x7d   :  { %v2235_v42 = vsel %vm2146_vm3, %v1536_v3, %v2234_v40  ;;  %v1422_v8 = vmin.f32 %v2828_v33, %v1421_v55  ;;  %v1430_v31 = vsel %vm221_vm14, %v1247_v1, inf  ;;  %v1439_v9 = vsel %vm221_vm14, %v1249_v2, inf }
  0x7e   :  { %v2236_v44 = vsel %vm2148_vm4, %v1545_v20, %v2235_v42  ;;  %v1431_v45 = vmin.f32 %v2831_v34, %v1430_v31  ;;  %v1440_v60 = vmin.f32 %v2834_v35, %v1439_v9  ;;  %v1448_v46 = vsel %vm221_vm14, %v1251_v26, inf }
  0x7f   :  { %v2237_v58 = vsel %vm2150_vm5, %v1554_v21, %v2236_v44  ;;  %v1423_v14 = vrot.slane %v1422_v8, 4  ;;  %v1449_v17 = vmin.f32 %v2837_v36, %v1448_v46  ;;  %v1457_v3 = vsel %vm221_vm14, %v1253_v27, inf }
  0x80   :  { %v2238_v33 = vsel %vm2152_vm6, %v1563_v22, %v2237_v58  ;;  %v1432_v1 = vrot.slane %v1431_v45, 4  ;;  %v1441_v23 = vrot.slane %v1440_v60, 4  ;;  %v1458_v2 = vmin.f32 %v2841_v37, %v1457_v3 }
  0x81   :  { %2245 = vrot.lane.b32.xlu2 %v2238_v33, %s2602_s6  ;;  %v1424_v34 = vmin.f32 %v1422_v8, %v1423_v14  ;;  %v1450_v35 = vrot.slane %v1449_v17, 4  ;;  %v1466_v20 = vsel %vm221_vm14, %v1255_v28, inf  ;;  %v1475_v21 = vsel %vm221_vm14, %v1257_v32, inf }
  0x82   :  { %v1433_v26 = vmin.f32 %v1431_v45, %v1432_v1  ;;  %v1442_v40 = vmin.f32 %v1440_v60, %v1441_v23  ;;  %v1459_v36 = vrot.slane %v1458_v2, 4  ;;  %v1467_v27 = vmin.f32 %v2844_v38, %v1466_v20 }
  0x83   :  { %v1425_v55 = vrot.slane %v1424_v34, 2  ;;  %v1451_v22 = vmin.f32 %v1449_v17, %v1450_v35  ;;  %v1476_v42 = vmin.f32 %v2847_v39, %v1475_v21  ;;  %v1483_v37 = vsel %vm221_vm14, %v2813_v29, inf }
  0x84   :  { %v1434_v31 = vrot.slane %v1433_v26, 2  ;;  %v1443_v9 = vrot.slane %v1442_v40, 2  ;;  %v1460_v8 = vmin.f32 %v1458_v2, %v1459_v36  ;;  %v1468_v44 = vrot.slane %v1467_v27, 4 }
  0x85   :  { %v1426_v46 = vmin.f32 %v1424_v34, %v1425_v55  ;;  %v1452_v28 = vrot.slane %v1451_v22, 2  ;;  %v1477_v58 = vrot.slane %v1476_v42, 4  ;;  %v1484_v32 = vsel %vm221_vm14, %v1259_v41, inf }
  0x86   :  { %v1435_v45 = vmin.f32 %v1433_v26, %v1434_v31  ;;  %v1444_v60 = vmin.f32 %v1442_v40, %v1443_v9  ;;  %v1461_v14 = vrot.slane %v1460_v8, 2  ;;  %v1469_v38 = vmin.f32 %v1467_v27, %v1468_v44 }
  0x87   :  { %v1427_v3 = vrot.slane %v1426_v46, 1  ;;  %v1453_v17 = vmin.f32 %v1451_v22, %v1452_v28  ;;  %v1478_v33 = vmin.f32 %v1476_v42, %v1477_v58  ;;  %v1485_v39 = vmin.f32 %v1483_v37, %v1484_v32 }
  0x88   :  { %v1436_v1 = vrot.slane %v1435_v45, 1  ;;  %v1445_v23 = vrot.slane %v1444_v60, 1  ;;  %v1462_v29 = vmin.f32 %v1460_v8, %v1461_v14  ;;  %v1470_v35 = vrot.slane %v1469_v38, 2 }
  0x89   :  { %v1428_v20 = vmin.f32 %v1426_v46, %v1427_v3  ;;  %v1454_v2 = vrot.slane %v1453_v17, 1  ;;  %v1479_v21 = vrot.slane %v1478_v33, 2  ;;  %v1486_v34 = vrot.slane %v1485_v39, 4 }
  0x8a   :  { %v1437_v36 = vmin.f32 %v1435_v45, %v1436_v1  ;;  %v1446_v55 = vmin.f32 %v1444_v60, %v1445_v23  ;;  %v1463_v54 = vrot.slane %v1462_v29, 1  ;;  %v1471_v41 = vmin.f32 %v1469_v38, %v1470_v35 }
  0x8b   :  { %v1455_v26 = vmin.f32 %v1453_v17, %v1454_v2  ;;  %v1480_v40 = vmin.f32 %v1478_v33, %v1479_v21  ;;  %v1487_v31 = vmin.f32 %v1485_v39, %v1486_v34  ;;  %v1596_v27 = vsel %vm1210_vm13, %v2690_v56, -inf }
  0x8c   :  { %v1464_v22 = vmin.f32 %v1462_v29, %v1463_v54  ;;  %v1472_v42 = vrot.slane %v1471_v41, 1  ;;  %v2225_v37 = vsel %vm2140_vm0, %v1437_v36, %v1428_v20  ;;  %v1597_v9 = vsel %vm1211_vm15, %v2884_v43, -inf }
  0x8d   :  { %v1481_v8 = vrot.slane %v1480_v40, 1  ;;  %v1488_v44 = vrot.slane %v1487_v31, 2  ;;  %v2226_v46 = vsel %vm2142_vm1, %v1446_v55, %v2225_v37  ;;  %v1598_v28 = vsel %vm1210_vm13, %v2695_v57, -inf }
  0x8e   :  { %v1473_v58 = vmin.f32 %v1471_v41, %v1472_v42  ;;  %v2227_v32 = vsel %vm2144_vm2, %v1455_v26, %v2226_v46  ;;  %v1599_v54 = vsel %vm1211_vm15, %v2889_v6, -inf  ;;  %v1600_v56 = vsel %vm1210_vm13, %v2712_v62, -inf }
  0x8f   :  { %v1482_v43 = vmin.f32 %v1480_v40, %v1481_v8  ;;  %v1489_v45 = vmin.f32 %v1487_v31, %v1488_v44  ;;  %v2228_v60 = vsel %vm2146_vm3, %v1464_v22, %v2227_v32  ;;  %v1601_v14 = vsel %vm1211_vm15, %v2894_v7, -inf  ;;  %v3037_v31 = vpop.permute.xlu0 %149 }
  0x90   :  { %v2229_v57 = vsel %vm2148_vm4, %v1473_v58, %v2228_v60  ;;  %v1602_v38 = vsel %vm1210_vm13, %v2717_v63, -inf  ;;  %v1603_v6 = vsel %vm1211_vm15, %v2899_v59, -inf  ;;  %v1604_v62 = vsel %vm1210_vm13, %v2734_v4, -inf  ;;  %5163 = vst [vmem:[#allocation9_spill] sm:$0xff] %v3037_v31 }
  0x91   :  { %v1490_v3 = vrot.slane %v1489_v45, 1  ;;  %v2230_v17 = vsel %vm2150_vm5, %v1482_v43, %v2229_v57  ;;  %v1605_v7 = vsel %vm1211_vm15, %v2904_v61, -inf  ;;  %v1606_v33 = vsel %vm1210_vm13, %v2739_v5, -inf }
  0x92   :  { %v1607_v63 = vsel %vm1211_vm15, %v2909_v0, -inf  ;;  %v1608_v59 = vsel %vm1210_vm13, %v2748_v10, -inf  ;;  %v1609_v4 = vsel %vm1211_vm15, %v2915_v15, -inf  ;;  %v1610_v61 = vsel %vm1210_vm13, %v2753_v11, -inf }
  0x93   :  { %v1491_v39 = vmin.f32 %v1489_v45, %v1490_v3  ;;  %v1611_v5 = vsel %vm1211_vm15, %v2920_v16, -inf  ;;  %v1772_v1 = vsel %vm221_vm14, %v1596_v27, -inf  ;;  %v1773_v0 = vsel %vm221_vm14, %v1597_v9, -inf }
  0x94   :  { %v1774_v23 = vmax.f32 %v1772_v1, %v1773_v0  ;;  %v1781_v10 = vsel %vm221_vm14, %v1598_v28, -inf  ;;  %v1782_v29 = vsel %vm221_vm14, %v1599_v54, -inf  ;;  %v1790_v15 = vsel %vm221_vm14, %v1600_v56, -inf  ;;  %v3041_v28 = vpop.permute.xlu1 %139 }
  0x95   :  { %v2231_v35 = vsel %vm2152_vm6, %v1491_v39, %v2230_v17  ;;  %v1783_v20 = vmax.f32 %v1781_v10, %v1782_v29  ;;  %v1791_v11 = vsel %vm221_vm14, %v1601_v14, -inf  ;;  %v1799_v2 = vsel %vm221_vm14, %v1602_v38, -inf  ;;  %5164 = vst [vmem:[#allocation10_spill] sm:$0xff] %v3041_v28 }
  0x96   :  { %2243 = vrot.lane.b32.xlu1 %v2231_v35, %s2602_s6  ;;  %v1775_v16 = vrot.slane %v1774_v23, 4  ;;  %v1792_v21 = vmax.f32 %v1790_v15, %v1791_v11  ;;  %v1800_v34 = vsel %vm221_vm14, %v1603_v6, -inf  ;;  %v1808_v36 = vsel %vm221_vm14, %v1604_v62, -inf }
  0x97   :  { %v1784_v55 = vrot.slane %v1783_v20, 4  ;;  %v1801_v41 = vmax.f32 %v1799_v2, %v1800_v34  ;;  %v1809_v26 = vsel %vm221_vm14, %v1605_v7, -inf  ;;  %v1817_v40 = vsel %vm221_vm14, %v1606_v33, -inf }
  0x98   :  { %v1776_v27 = vmax.f32 %v1774_v23, %v1775_v16  ;;  %v1793_v22 = vrot.slane %v1792_v21, 4  ;;  %v1810_v42 = vmax.f32 %v1808_v36, %v1809_v26  ;;  %v1818_v37 = vsel %vm221_vm14, %v1607_v63, -inf }
  0x99   :  { %v1785_v9 = vmax.f32 %v1783_v20, %v1784_v55  ;;  %v1802_v8 = vrot.slane %v1801_v41, 4  ;;  %v1819_v44 = vmax.f32 %v1817_v40, %v1818_v37  ;;  %v1826_v46 = vsel %vm221_vm14, %v1608_v59, -inf }
  0x9a   :  { %v1777_v58 = vrot.slane %v1776_v27, 2  ;;  %v1794_v32 = vmax.f32 %v1792_v21, %v1793_v22  ;;  %v1811_v54 = vrot.slane %v1810_v42, 4  ;;  %v1827_v56 = vsel %vm221_vm14, %v1609_v4, -inf  ;;  %v3046_v21 = vpop.permute.xlu0 %154 }
  0x9b   :  { %v1786_v43 = vrot.slane %v1785_v9, 2  ;;  %v1803_v45 = vmax.f32 %v1801_v41, %v1802_v8  ;;  %v1820_v60 = vrot.slane %v1819_v44, 4  ;;  %v1828_v14 = vmax.f32 %v1826_v46, %v1827_v56  ;;  %5165 = vst [vmem:[#allocation11_spill] sm:$0xff] %v3046_v21 }
  0x9c   :  { %v1778_v57 = vmax.f32 %v1776_v27, %v1777_v58  ;;  %v1795_v38 = vrot.slane %v1794_v32, 2  ;;  %v1812_v6 = vmax.f32 %v1810_v42, %v1811_v54  ;;  %v1835_v62 = vsel %vm221_vm14, %v1610_v61, -inf  ;;  %v3049_v27 = vpop.permute.xlu1 %144 }
  0x9d   :  { %v1787_v3 = vmax.f32 %v1785_v9, %v1786_v43  ;;  %v1804_v17 = vrot.slane %v1803_v45, 2  ;;  %v1821_v7 = vmax.f32 %v1819_v44, %v1820_v60  ;;  %v1829_v33 = vrot.slane %v1828_v14, 4  ;;  %5166 = vst [vmem:[#allocation12_spill] sm:$0xff] %v3049_v27 }
  0x9e   :  { %v1779_v63 = vrot.slane %v1778_v57, 1  ;;  %v1796_v59 = vmax.f32 %v1794_v32, %v1795_v38  ;;  %v1813_v39 = vrot.slane %v1812_v6, 2  ;;  %v1836_v1 = vsel %vm221_vm14, %v1611_v5, -inf }
  0x9f   :  { %v1788_v0 = vrot.slane %v1787_v3, 1  ;;  %v1805_v4 = vmax.f32 %v1803_v45, %v1804_v17  ;;  %v1822_v23 = vrot.slane %v1821_v7, 2  ;;  %v1830_v10 = vmax.f32 %v1828_v14, %v1829_v33  ;;  %v5169_v17 = vld [vmem:[#allocation6_spill] sm:$0xff] }
  0xa0   :  { %v1780_v29 = vmax.f32 %v1778_v57, %v1779_v63  ;;  %v1797_v15 = vrot.slane %v1796_v59, 1  ;;  %v1814_v35 = vmax.f32 %v1812_v6, %v1813_v39  ;;  %v1837_v20 = vmax.f32 %v1835_v62, %v1836_v1 }
  0xa1   :  { %v1789_v11 = vmax.f32 %v1787_v3, %v1788_v0  ;;  %v1806_v2 = vrot.slane %v1805_v4, 1  ;;  %v1823_v61 = vmax.f32 %v1821_v7, %v1822_v23  ;;  %v1831_v16 = vrot.slane %v1830_v10, 2  ;;  %v5168_v3 = vld [vmem:[#allocation7_spill] sm:$0xff]  ;;  %v5170_v7 = vld [vmem:[#allocation8_spill] sm:$0xff] }
  0xa2   :  { %v1798_v34 = vmax.f32 %v1796_v59, %v1797_v15  ;;  %v1815_v36 = vrot.slane %v1814_v35, 1  ;;  %v1838_v55 = vrot.slane %v1837_v20, 4  ;;  %v1612_v46 = vsel %vm1210_vm13, %v2647_v47, -inf  ;;  %v3106_v59 = vpop.permute.xlu0 %1197 }
  0xa3   :  { %v1807_v41 = vmax.f32 %v1805_v4, %v1806_v2  ;;  %v1824_v26 = vrot.slane %v1823_v61, 1  ;;  %v1832_v5 = vmax.f32 %v1830_v10, %v1831_v16  ;;  %v2297_v40 = vsel %vm2140_vm0, %v1789_v11, %v1780_v29 }
  0xa4   :  { %v1816_v22 = vmax.f32 %v1814_v35, %v1815_v36  ;;  %v1839_v42 = vmax.f32 %v1837_v20, %v1838_v55  ;;  %v2298_v37 = vsel %vm2142_vm1, %v1798_v34, %v2297_v40  ;;  %v1613_v54 = vsel %vm1211_vm15, %v2758_v12, -inf  ;;  %v3114_v29 = vpop.permute.xlu1 %1200 }
  0xa5   :  { %v1825_v9 = vmax.f32 %v1823_v61, %v1824_v26  ;;  %v1833_v8 = vrot.slane %v1832_v5, 1  ;;  %v2299_v44 = vsel %vm2144_vm2, %v1807_v41, %v2298_v37  ;;  %v1614_v56 = vsel %vm1210_vm13, %v2652_v48, -inf  ;;  %5172 = vst [vmem:[#allocation7_spill] sm:$0xff] %v3114_v29 }
  0xa6   :  { %v1840_v58 = vrot.slane %v1839_v42, 2  ;;  %v2300_v32 = vsel %vm2146_vm3, %v1816_v22, %v2299_v44  ;;  %v1615_v60 = vsel %vm1211_vm15, %v2763_v13, -inf  ;;  %v1616_v47 = vsel %vm1210_vm13, %v2657_v49, -inf }
  0xa7   :  { %v1834_v43 = vmax.f32 %v1832_v5, %v1833_v8  ;;  %v2301_v45 = vsel %vm2148_vm4, %v1825_v9, %v2300_v32  ;;  %v1617_v12 = vsel %vm1211_vm15, %v2772_v18, -inf  ;;  %v1618_v48 = vsel %vm1210_vm13, %v2662_v50, -inf }
  0xa8   :  { %v1841_v14 = vmax.f32 %v1839_v42, %v1840_v58  ;;  %v1619_v57 = vsel %vm1211_vm15, %v2777_v19, -inf  ;;  %v1620_v13 = vsel %vm1210_vm13, %v2667_v51, -inf  ;;  %v1621_v49 = vsel %vm1211_vm15, %v2794_v24, -inf  ;;  %v5167_v19 = vld [vmem:[#allocation5_spill] sm:$0xff] }
  0xa9   :  { %v2302_v38 = vsel %vm2150_vm5, %v1834_v43, %v2301_v45  ;;  %v1622_v18 = vsel %vm1210_vm13, %v2674_v53, -inf  ;;  %v1623_v50 = vsel %vm1211_vm15, %v2799_v25, -inf  ;;  %v1624_v62 = vsel %vm1210_vm13, %v5167_v19, -inf  ;;  %5171 = vst [vmem:[#allocation5_spill] sm:$0xff] %v3106_v59 }
  0xaa   :  { %v1842_v6 = vrot.slane %v1841_v14, 1  ;;  %v1625_v51 = vsel %vm1211_vm15, %v5168_v3, -inf  ;;  %v1626_v24 = vsel %vm1210_vm13, %v5169_v17, -inf  ;;  %v1627_v53 = vsel %vm1211_vm15, %v5170_v7, -inf }
  0xab   :  { %v1844_v33 = vsel %vm221_vm14, %v1612_v46, -inf  ;;  %v1845_v25 = vsel %vm221_vm14, %v1613_v54, -inf  ;;  %v1853_v1 = vsel %vm221_vm14, %v1614_v56, -inf  ;;  %v1854_v0 = vsel %vm221_vm14, %v1615_v60, -inf }
  0xac   :  { %v1843_v63 = vmax.f32 %v1841_v14, %v1842_v6  ;;  %v1846_v39 = vmax.f32 %v1844_v33, %v1845_v25  ;;  %v1855_v4 = vmax.f32 %v1853_v1, %v1854_v0  ;;  %v1862_v52 = vsel %vm221_vm14, %v1616_v47, -inf }
  0xad   :  { %v1863_v23 = vsel %vm221_vm14, %v1617_v12, -inf  ;;  %v1871_v30 = vsel %vm221_vm14, %v1618_v48, -inf  ;;  %v1872_v20 = vsel %vm221_vm14, %v1619_v57, -inf  ;;  %vm1208_vm7 = vcmp.eq.s32.totalorder %v3106_v59, 1 }
  0xae   :  { %v2303_v10 = vsel %vm2152_vm6, %v1843_v63, %v2302_v38  ;;  %v1847_v15 = vrot.slane %v1846_v39, 4  ;;  %v1864_v35 = vmax.f32 %v1862_v52, %v1863_v23  ;;  %v1856_v11 = vrot.slane %v1855_v4, 4 }
  0xaf   :  { %2315 = vrot.lane.b32.xlu0 %v2303_v10, %s2603_s7  ;;  %v1873_v2 = vmax.f32 %v1871_v30, %v1872_v20  ;;  %v1880_v61 = vsel %vm221_vm14, %v1620_v13, -inf  ;;  %v1881_v16 = vsel %vm221_vm14, %v1621_v49, -inf  ;;  %v1889_v41 = vsel %vm221_vm14, %v1622_v18, -inf  ;;  %v35_v30 = vld [vmem:[%s5114_s0 + $0x88] sm:$0xff]  ;;  %v36_v20 = vld [vmem:[%s5114_s0 + $0x90] sm:$0xff] }
  0xb0   :  { %v1848_v34 = vmax.f32 %v1846_v39, %v1847_v15  ;;  %v1865_v36 = vrot.slane %v1864_v35, 4  ;;  %v1882_v55 = vmax.f32 %v1880_v61, %v1881_v16  ;;  %vm1209_vm8 = vcmp.eq.s32.totalorder %v3114_v29, 1 }
  0xb1   :  { %v1857_v26 = vmax.f32 %v1855_v4, %v1856_v11  ;;  %v1874_v5 = vrot.slane %v1873_v2, 4  ;;  %v1890_v40 = vsel %vm221_vm14, %v1623_v50, -inf  ;;  %v1898_v22 = vsel %vm221_vm14, %v1624_v62, -inf }
  0xb2   :  { %v1849_v42 = vrot.slane %v1848_v34, 2  ;;  %v1866_v37 = vmax.f32 %v1864_v35, %v1865_v36  ;;  %v1883_v9 = vrot.slane %v1882_v55, 4  ;;  %v1891_v8 = vmax.f32 %v1889_v41, %v1890_v40  ;;  %v38_v36 = vld [vmem:[%s5114_s0 + $0xa0] sm:$0xff]  ;;  %v40_v40 = vld [vmem:[%s5114_s0 + $0xb0] sm:$0xff] }
  0xb3   :  { %v1858_v44 = vrot.slane %v1857_v26, 2  ;;  %v1875_v46 = vmax.f32 %v1873_v2, %v1874_v5  ;;  %v1899_v58 = vsel %vm221_vm14, %v1625_v51, -inf  ;;  %v1907_v32 = vsel %vm221_vm14, %v1626_v24, -inf  ;;  %v39_v5 = vld [vmem:[%s5114_s0 + $0xa8] sm:$0xff] }
  0xb4   :  { %v1850_v54 = vmax.f32 %v1848_v34, %v1849_v42  ;;  %v1867_v56 = vrot.slane %v1866_v37, 2  ;;  %v1884_v43 = vmax.f32 %v1882_v55, %v1883_v9  ;;  %v1892_v45 = vrot.slane %v1891_v8, 4  ;;  %v37_v34 = vld [vmem:[%s5114_s0 + $0x98] sm:$0xff] }
  0xb5   :  { %v1859_v60 = vmax.f32 %v1857_v26, %v1858_v44  ;;  %v1876_v47 = vrot.slane %v1875_v46, 2  ;;  %v1900_v14 = vmax.f32 %v1898_v22, %v1899_v58  ;;  %v1908_v12 = vsel %vm221_vm14, %v1627_v53, -inf  ;;  %v34_v53 = vld [vmem:[%s5114_s0 + $0x80] sm:$0xff] }
  0xb6   :  { %v1851_v48 = vrot.slane %v1850_v54, 1  ;;  %v1868_v57 = vmax.f32 %v1866_v37, %v1867_v56  ;;  %v1885_v38 = vrot.slane %v1884_v43, 2  ;;  %v1893_v13 = vmax.f32 %v1891_v8, %v1892_v45  ;;  %v41_v8 = vld [vmem:[%s5114_s0 + $0xb8] sm:$0xff]  ;;  %v42_v44 = vld [vmem:[%s5114_s0 + $0xc0] sm:$0xff]  ;;  %v44_v56 = vld [vmem:[%s5114_s0 + $0xd0] sm:$0xff] }
  0xb7   :  { %v1860_v49 = vrot.slane %v1859_v60, 1  ;;  %v1877_v18 = vmax.f32 %v1875_v46, %v1876_v47  ;;  %v1901_v6 = vrot.slane %v1900_v14, 4  ;;  %v1909_v50 = vmax.f32 %v1907_v32, %v1908_v12  ;;  %v43_v46 = vld [vmem:[%s5114_s0 + $0xc8] sm:$0xff]  ;;  %v46_v45 = vld [vmem:[%s5114_s0 + $0xe0] sm:$0xff] }
  0xb8   :  { %v1852_v19 = vmax.f32 %v1850_v54, %v1851_v48  ;;  %v1869_v62 = vrot.slane %v1868_v57, 1  ;;  %v1886_v3 = vmax.f32 %v1884_v43, %v1885_v38  ;;  %v1894_v51 = vrot.slane %v1893_v13, 2  ;;  %v45_v43 = vld [vmem:[%s5114_s0 + $0xd8] sm:$0xff]  ;;  %v48_v38 = vld [vmem:[%s5114_s0 + $0xf0] sm:$0xff] }
  0xb9   :  { %v1861_v17 = vmax.f32 %v1859_v60, %v1860_v49  ;;  %v1878_v24 = vrot.slane %v1877_v18, 1  ;;  %v1902_v7 = vmax.f32 %v1900_v14, %v1901_v6  ;;  %v1910_v33 = vrot.slane %v1909_v50, 4 }
  0xba   :  { %v1870_v25 = vmax.f32 %v1868_v57, %v1869_v62  ;;  %v1887_v63 = vrot.slane %v1886_v3, 1  ;;  %v1895_v39 = vmax.f32 %v1893_v13, %v1894_v51  ;;  %v1228_v1 = vsel %vm1208_vm7, %v34_v53, inf  ;;  %v47_v57 = vld [vmem:[%s5114_s0 + $0xe8] sm:$0xff]  ;;  %v49_v13 = vld [vmem:[%s5114_s0 + $0xf8] sm:$0xff] }
  0xbb   :  { %v1879_v0 = vmax.f32 %v1877_v18, %v1878_v24  ;;  %v1903_v4 = vrot.slane %v1902_v7, 2  ;;  %v1911_v52 = vmax.f32 %v1909_v50, %v1910_v33  ;;  %v2304_v23 = vsel %vm2140_vm0, %v1861_v17, %v1852_v19 }
  0xbc   :  { %v1888_v10 = vmax.f32 %v1886_v3, %v1887_v63  ;;  %v1896_v15 = vrot.slane %v1895_v39, 1  ;;  %v2305_v35 = vsel %vm2142_vm1, %v1870_v25, %v2304_v23  ;;  %v1229_v11 = vsel %vm1209_vm8, %v35_v30, inf }
  0xbd   :  { %v1904_v2 = vmax.f32 %v1902_v7, %v1903_v4  ;;  %v1912_v61 = vrot.slane %v1911_v52, 2  ;;  %v2306_v16 = vsel %vm2144_vm2, %v1879_v0, %v2305_v35  ;;  %v1230_v55 = vsel %vm1208_vm7, %v36_v20, inf }
  0xbe   :  { %v1897_v41 = vmax.f32 %v1895_v39, %v1896_v15  ;;  %v2307_v26 = vsel %vm2146_vm3, %v1888_v10, %v2306_v16  ;;  %v1231_v22 = vsel %vm1209_vm8, %v37_v34, inf  ;;  %v1232_v42 = vsel %vm1208_vm7, %v38_v36, inf }
  0xbf   :  { %v1905_v37 = vrot.slane %v1904_v2, 1  ;;  %v1913_v9 = vmax.f32 %v1911_v52, %v1912_v61  ;;  %v1233_v58 = vsel %vm1209_vm8, %v39_v5, inf  ;;  %v1234_v32 = vsel %vm1208_vm7, %v40_v40, inf }
  0xc0   :  { %v2308_v54 = vsel %vm2148_vm4, %v1897_v41, %v2307_v26  ;;  %v1235_v60 = vsel %vm1209_vm8, %v41_v8, inf  ;;  %v1236_v47 = vsel %vm1208_vm7, %v42_v44, inf  ;;  %v1237_v14 = vsel %vm1209_vm8, %v43_v46, inf }
  0xc1   :  { %v1906_v12 = vmax.f32 %v1904_v2, %v1905_v37  ;;  %v1914_v48 = vrot.slane %v1913_v9, 1  ;;  %v1238_v49 = vsel %vm1208_vm7, %v44_v56, inf  ;;  %v1239_v18 = vsel %vm1209_vm8, %v45_v43, inf }
  0xc2   :  { %v1240_v6 = vsel %vm1208_vm7, %v46_v45, inf  ;;  %v1241_v50 = vsel %vm1209_vm8, %v47_v57, inf  ;;  %v1242_v19 = vsel %vm1208_vm7, %v48_v38, inf  ;;  %v1243_v62 = vsel %vm1209_vm8, %v49_v13, inf }
  0xc3   :  { %v1915_v3 = vmax.f32 %v1913_v9, %v1914_v48  ;;  %v2309_v51 = vsel %vm2150_vm5, %v1906_v12, %v2308_v54  ;;  %v1348_v17 = vsel %vm221_vm14, %v1228_v1, inf  ;;  %v1349_v24 = vsel %vm221_vm14, %v1229_v11, inf }
  0xc4   :  { %v1350_v7 = vmin.f32 %v1348_v17, %v1349_v24  ;;  %v1357_v33 = vsel %vm221_vm14, %v1230_v55, inf  ;;  %v1358_v53 = vsel %vm221_vm14, %v1231_v22, inf  ;;  %v1366_v25 = vsel %vm221_vm14, %v1232_v42, inf  ;;  %v3235_v24 = vld [vmem:[%s5114_s0] sm:$0xff] }
  0xc5   :  { %v2310_v63 = vsel %vm2152_vm6, %v1915_v3, %v2309_v51  ;;  %v1359_v39 = vmin.f32 %v1357_v33, %v1358_v53  ;;  %v1367_v0 = vsel %vm221_vm14, %v1233_v58, inf  ;;  %v1375_v4 = vsel %vm221_vm14, %v1234_v32, inf }
  0xc6   :  { %2317 = vrot.lane.b32.xlu1 %v2310_v63, %s2603_s7  ;;  %v1351_v52 = vrot.slane %v1350_v7, 4  ;;  %v1368_v1 = vmin.f32 %v1366_v25, %v1367_v0  ;;  %v1376_v23 = vsel %vm221_vm14, %v1235_v60, inf  ;;  %v1384_v30 = vsel %vm221_vm14, %v1236_v47, inf }
  0xc7   :  { %v1360_v10 = vrot.slane %v1359_v39, 4  ;;  %v1377_v15 = vmin.f32 %v1375_v4, %v1376_v23  ;;  %v1385_v35 = vsel %vm221_vm14, %v1237_v14, inf  ;;  %v1393_v20 = vsel %vm221_vm14, %v1238_v49, inf  ;;  %v3244_v4 = vld [vmem:[%s5114_s0 + $0x8] sm:$0xff] }
  0xc8   :  { %v1352_v11 = vmin.f32 %v1350_v7, %v1351_v52  ;;  %v1369_v2 = vrot.slane %v1368_v1, 4  ;;  %v1386_v61 = vmin.f32 %v1384_v30, %v1385_v35  ;;  %v1394_v16 = vsel %vm221_vm14, %v1239_v18, inf  ;;  %v3250_v30 = vld [vmem:[%s5114_s0 + $0x10] sm:$0xff] }
  0xc9   :  { %v1361_v34 = vmin.f32 %v1359_v39, %v1360_v10  ;;  %v1378_v36 = vrot.slane %v1377_v15, 4  ;;  %v1395_v55 = vmin.f32 %v1393_v20, %v1394_v16  ;;  %v1402_v41 = vsel %vm221_vm14, %v1240_v6, inf }
  0xca   :  { %v1353_v26 = vrot.slane %v1352_v11, 2  ;;  %v1370_v5 = vmin.f32 %v1368_v1, %v1369_v2  ;;  %v1387_v40 = vrot.slane %v1386_v61, 4  ;;  %v1403_v22 = vsel %vm221_vm14, %v1241_v50, inf  ;;  %v3264_v2 = vld [vmem:[%s5114_s0 + $0x20] sm:$0xff] }
  0xcb   :  { %v1362_v42 = vrot.slane %v1361_v34, 2  ;;  %v1379_v37 = vmin.f32 %v1377_v15, %v1378_v36  ;;  %v1396_v9 = vrot.slane %v1395_v55, 4  ;;  %v1404_v8 = vmin.f32 %v1402_v41, %v1403_v22  ;;  %v3273_v36 = vld [vmem:[%s5114_s0 + $0x28] sm:$0xff]  ;;  %v3290_v22 = vld [vmem:[%s5114_s0 + $0x38] sm:$0xff] }
  0xcc   :  { %v1354_v44 = vmin.f32 %v1352_v11, %v1353_v26  ;;  %v1371_v46 = vrot.slane %v1370_v5, 2  ;;  %v1388_v58 = vmin.f32 %v1386_v61, %v1387_v40  ;;  %v1411_v32 = vsel %vm221_vm14, %v1242_v19, inf  ;;  %v3259_v11 = vld [vmem:[%s5114_s0 + $0x18] sm:$0xff] }
  0xcd   :  { %v1363_v54 = vmin.f32 %v1361_v34, %v1362_v42  ;;  %v1380_v56 = vrot.slane %v1379_v37, 2  ;;  %v1397_v43 = vmin.f32 %v1395_v55, %v1396_v9  ;;  %v1405_v45 = vrot.slane %v1404_v8, 4  ;;  %v3278_v55 = vld [vmem:[%s5114_s0 + $0x30] sm:$0xff]  ;;  %v3295_v42 = vld [vmem:[%s5114_s0 + $0x40] sm:$0xff] }
  0xce   :  { %v1355_v60 = vrot.slane %v1354_v44, 1  ;;  %v1372_v47 = vmin.f32 %v1370_v5, %v1371_v46  ;;  %v1389_v14 = vrot.slane %v1388_v58, 2  ;;  %v1412_v12 = vsel %vm221_vm14, %v1243_v62, inf  ;;  %v3311_v46 = vld [vmem:[%s5114_s0 + $0x50] sm:$0xff] }
  0xcf   :  { %v1364_v48 = vrot.slane %v1363_v54, 1  ;;  %v1381_v57 = vmin.f32 %v1379_v37, %v1380_v56  ;;  %v1398_v38 = vrot.slane %v1397_v43, 2  ;;  %v1406_v13 = vmin.f32 %v1404_v8, %v1405_v45  ;;  %v3300_v37 = vld [vmem:[%s5114_s0 + $0x48] sm:$0xff] }
  0xd0   :  { %v1356_v49 = vmin.f32 %v1354_v44, %v1355_v60  ;;  %v1373_v18 = vrot.slane %v1372_v47, 1  ;;  %v1390_v6 = vmin.f32 %v1388_v58, %v1389_v14  ;;  %v1413_v50 = vmin.f32 %v1411_v32, %v1412_v12  ;;  %v3316_v58 = vld [vmem:[%s5114_s0 + $0x58] sm:$0xff]  ;;  %v3321_v32 = vld [vmem:[%s5114_s0 + $0x60] sm:$0xff]  ;;  %v3336_v60 = vld [vmem:[%s5114_s0 + $0x68] sm:$0xff] }
  0xd1   :  { %v1365_v3 = vmin.f32 %v1363_v54, %v1364_v48  ;;  %v1382_v51 = vrot.slane %v1381_v57, 1  ;;  %v1399_v19 = vmin.f32 %v1397_v43, %v1398_v38  ;;  %v1407_v17 = vrot.slane %v1406_v13, 2  ;;  %v3346_v14 = vld [vmem:[%s5114_s0 + $0x78] sm:$0xff] }
  0xd2   :  { %v1374_v7 = vmin.f32 %v1372_v47, %v1373_v18  ;;  %v1391_v33 = vrot.slane %v1390_v6, 1  ;;  %v1414_v62 = vrot.slane %v1413_v50, 4  ;;  %v1564_v53 = vsel %vm1208_vm7, %v3235_v24, -inf  ;;  %v3341_v47 = vld [vmem:[%s5114_s0 + $0x70] sm:$0xff] }
  0xd3   :  { %v1383_v25 = vmin.f32 %v1381_v57, %v1382_v51  ;;  %v1400_v63 = vrot.slane %v1399_v19, 1  ;;  %v1408_v39 = vmin.f32 %v1406_v13, %v1407_v17  ;;  %v2218_v0 = vsel %vm2140_vm0, %v1365_v3, %v1356_v49 }
  0xd4   :  { %v1392_v52 = vmin.f32 %v1390_v6, %v1391_v33  ;;  %v1415_v1 = vmin.f32 %v1413_v50, %v1414_v62  ;;  %v2219_v23 = vsel %vm2142_vm1, %v1374_v7, %v2218_v0  ;;  %v1565_v10 = vsel %vm1209_vm8, %v3244_v4, -inf }
  0xd5   :  { %v1401_v15 = vmin.f32 %v1399_v19, %v1400_v63  ;;  %v1409_v35 = vrot.slane %v1408_v39, 1  ;;  %v2220_v20 = vsel %vm2144_vm2, %v1383_v25, %v2219_v23  ;;  %v1566_v61 = vsel %vm1208_vm7, %v3250_v30, -inf }
  0xd6   :  { %v1416_v16 = vrot.slane %v1415_v1, 2  ;;  %v2221_v34 = vsel %vm2146_vm3, %v1392_v52, %v2220_v20  ;;  %v1567_v41 = vsel %vm1209_vm8, %v3259_v11, -inf  ;;  %v1568_v26 = vsel %vm1208_vm7, %v3264_v2, -inf }
  0xd7   :  { %v1410_v5 = vmin.f32 %v1408_v39, %v1409_v35  ;;  %v2222_v40 = vsel %vm2148_vm4, %v1401_v15, %v2221_v34  ;;  %v1569_v9 = vsel %vm1209_vm8, %v3273_v36, -inf  ;;  %v1570_v8 = vsel %vm1208_vm7, %v3278_v55, -inf }
  0xd8   :  { %v1417_v44 = vmin.f32 %v1415_v1, %v1416_v16  ;;  %v1571_v54 = vsel %vm1209_vm8, %v3290_v22, -inf  ;;  %v1572_v56 = vsel %vm1208_vm7, %v3295_v42, -inf  ;;  %v1573_v43 = vsel %vm1209_vm8, %v3300_v37, -inf }
  0xd9   :  { %v2223_v45 = vsel %vm2150_vm5, %v1410_v5, %v2222_v40  ;;  %v1574_v12 = vsel %vm1208_vm7, %v3311_v46, -inf  ;;  %v1575_v48 = vsel %vm1209_vm8, %v3316_v58, -inf  ;;  %v1576_v57 = vsel %vm1208_vm7, %v3321_v32, -inf }
  0xda   :  { %v1418_v38 = vrot.slane %v1417_v44, 1  ;;  %v1577_v13 = vsel %vm1209_vm8, %v3336_v60, -inf  ;;  %v1578_v49 = vsel %vm1208_vm7, %v3341_v47, -inf  ;;  %v1579_v18 = vsel %vm1209_vm8, %v3346_v14, -inf }
  0xdb   :  { %v1628_v6 = vsel %vm221_vm14, %v1564_v53, -inf  ;;  %v1629_v50 = vsel %vm221_vm14, %v1565_v10, -inf  ;;  %v1637_v3 = vsel %vm221_vm14, %v1566_v61, -inf  ;;  %v1638_v51 = vsel %vm221_vm14, %v1567_v41, -inf }
  0xdc   :  { %v1419_v19 = vmin.f32 %v1417_v44, %v1418_v38  ;;  %v1630_v17 = vmax.f32 %v1628_v6, %v1629_v50  ;;  %v1639_v7 = vmax.f32 %v1637_v3, %v1638_v51  ;;  %v1646_v33 = vsel %vm221_vm14, %v1568_v26, -inf }
  0xdd   :  { %v1647_v62 = vsel %vm221_vm14, %v1569_v9, -inf  ;;  %v1655_v25 = vsel %vm221_vm14, %v1570_v8, -inf  ;;  %v1656_v63 = vsel %vm221_vm14, %v1571_v54, -inf  ;;  %v1664_v39 = vsel %vm221_vm14, %v1572_v56, -inf }
  0xde   :  { %v2224_v53 = vsel %vm2152_vm6, %v1419_v19, %v2223_v45  ;;  %v1631_v0 = vrot.slane %v1630_v17, 4  ;;  %v1640_v52 = vrot.slane %v1639_v7, 4  ;;  %v1648_v1 = vmax.f32 %v1646_v33, %v1647_v62 }
  0xdf   :  { %2241 = vrot.lane.b32.xlu2 %v2224_v53, %s2602_s6  ;;  %v1657_v23 = vmax.f32 %v1655_v25, %v1656_v63  ;;  %v1665_v10 = vsel %vm221_vm14, %v1573_v43, -inf  ;;  %v1673_v15 = vsel %vm221_vm14, %v1574_v12, -inf  ;;  %v1674_v35 = vsel %vm221_vm14, %v1575_v48, -inf }
  0xe0   :  { %v1632_v20 = vmax.f32 %v1630_v17, %v1631_v0  ;;  %v1641_v61 = vmax.f32 %v1639_v7, %v1640_v52  ;;  %v1649_v16 = vrot.slane %v1648_v1, 4  ;;  %v1666_v34 = vmax.f32 %v1664_v39, %v1665_v10 }
  0xe1   :  { %v1658_v41 = vrot.slane %v1657_v23, 4  ;;  %v1675_v26 = vmax.f32 %v1673_v15, %v1674_v35  ;;  %v1682_v5 = vsel %vm221_vm14, %v1576_v57, -inf  ;;  %v1683_v40 = vsel %vm221_vm14, %v1577_v13, -inf }
  0xe2   :  { %v1633_v9 = vrot.slane %v1632_v20, 2  ;;  %v1642_v8 = vrot.slane %v1641_v61, 2  ;;  %v1650_v44 = vmax.f32 %v1648_v1, %v1649_v16  ;;  %v1667_v54 = vrot.slane %v1666_v34, 4 }
  0xe3   :  { %v1659_v56 = vmax.f32 %v1657_v23, %v1658_v41  ;;  %v1676_v43 = vrot.slane %v1675_v26, 4  ;;  %v1684_v45 = vmax.f32 %v1682_v5, %v1683_v40  ;;  %v1691_v12 = vsel %vm221_vm14, %v1578_v49, -inf }
  0xe4   :  { %v1634_v48 = vmax.f32 %v1632_v20, %v1633_v9  ;;  %v1643_v38 = vmax.f32 %v1641_v61, %v1642_v8  ;;  %v1651_v6 = vrot.slane %v1650_v44, 2  ;;  %v1668_v50 = vmax.f32 %v1666_v34, %v1667_v54 }
  0xe5   :  { %v1660_v3 = vrot.slane %v1659_v56, 2  ;;  %v1677_v51 = vmax.f32 %v1675_v26, %v1676_v43  ;;  %v1685_v19 = vrot.slane %v1684_v45, 4  ;;  %v1692_v57 = vsel %vm221_vm14, %v1579_v18, -inf }
  0xe6   :  { %v1635_v17 = vrot.slane %v1634_v48, 1  ;;  %v1644_v13 = vrot.slane %v1643_v38, 1  ;;  %v1652_v7 = vmax.f32 %v1650_v44, %v1651_v6  ;;  %v1669_v33 = vrot.slane %v1668_v50, 2 }
  0xe7   :  { %v1661_v62 = vmax.f32 %v1659_v56, %v1660_v3  ;;  %v1678_v25 = vrot.slane %v1677_v51, 2  ;;  %v1686_v63 = vmax.f32 %v1684_v45, %v1685_v19  ;;  %v1693_v39 = vmax.f32 %v1691_v12, %v1692_v57 }
  0xe8   :  { %v1636_v53 = vmax.f32 %v1634_v48, %v1635_v17  ;;  %v1645_v0 = vmax.f32 %v1643_v38, %v1644_v13  ;;  %v1653_v49 = vrot.slane %v1652_v7, 1  ;;  %v1670_v52 = vmax.f32 %v1668_v50, %v1669_v33 }
  0xe9   :  { %v1662_v1 = vrot.slane %v1661_v62, 1  ;;  %v1679_v23 = vmax.f32 %v1677_v51, %v1678_v25  ;;  %v1687_v10 = vrot.slane %v1686_v63, 2  ;;  %v1694_v15 = vrot.slane %v1693_v39, 4 }
  0xea   :  { %v1654_v35 = vmax.f32 %v1652_v7, %v1653_v49  ;;  %v1671_v20 = vrot.slane %v1670_v52, 1  ;;  %v2283_v18 = vsel %vm2140_vm0, %v1645_v0, %v1636_v53  ;;  %v1212_v61 = vsel %vm1208_vm7, %v3235_v24, inf }
  0xeb   :  { %v1663_v16 = vmax.f32 %v1661_v62, %v1662_v1  ;;  %v1680_v34 = vrot.slane %v1679_v23, 1  ;;  %v1688_v41 = vmax.f32 %v1686_v63, %v1687_v10  ;;  %v1695_v26 = vmax.f32 %v1693_v39, %v1694_v15 }
  0xec   :  { %v1672_v5 = vmax.f32 %v1670_v52, %v1671_v20  ;;  %v2284_v40 = vsel %vm2142_vm1, %v1654_v35, %v2283_v18  ;;  %v1213_v9 = vsel %vm1209_vm8, %v3244_v4, inf  ;;  %v1214_v8 = vsel %vm1208_vm7, %v3250_v30, inf }
  0xed   :  { %v1681_v44 = vmax.f32 %v1679_v23, %v1680_v34  ;;  %v1689_v54 = vrot.slane %v1688_v41, 1  ;;  %v1696_v56 = vrot.slane %v1695_v26, 2  ;;  %v2285_v24 = vsel %vm2144_vm2, %v1663_v16, %v2284_v40 }
  0xee   :  { %v2286_v43 = vsel %vm2146_vm3, %v1672_v5, %v2285_v24  ;;  %v1215_v45 = vsel %vm1209_vm8, %v3259_v11, inf  ;;  %v1216_v12 = vsel %vm1208_vm7, %v3264_v2, inf  ;;  %v1217_v4 = vsel %vm1209_vm8, %v3273_v36, inf }
  0xef   :  { %v1690_v30 = vmax.f32 %v1688_v41, %v1689_v54  ;;  %v1697_v48 = vmax.f32 %v1695_v26, %v1696_v56  ;;  %v2287_v38 = vsel %vm2148_vm4, %v1681_v44, %v2286_v43  ;;  %v1218_v6 = vsel %vm1208_vm7, %v3278_v55, inf }
  0xf0   :  { %v1219_v11 = vsel %vm1209_vm8, %v3290_v22, inf  ;;  %v1220_v2 = vsel %vm1208_vm7, %v3295_v42, inf  ;;  %v1221_v36 = vsel %vm1209_vm8, %v3300_v37, inf  ;;  %v1222_v50 = vsel %vm1208_vm7, %v3311_v46, inf }
  0xf1   :  { %v1698_v3 = vrot.slane %v1697_v48, 1  ;;  %v2288_v51 = vsel %vm2150_vm5, %v1690_v30, %v2287_v38  ;;  %v1223_v55 = vsel %vm1209_vm8, %v3316_v58, inf  ;;  %v1224_v22 = vsel %vm1208_vm7, %v3321_v32, inf }
  0xf2   :  { %v1225_v42 = vsel %vm1209_vm8, %v3336_v60, inf  ;;  %v1226_v37 = vsel %vm1208_vm7, %v3341_v47, inf  ;;  %v1227_v46 = vsel %vm1209_vm8, %v3346_v14, inf  ;;  %v1276_v19 = vsel %vm221_vm14, %v1212_v61, inf }
  0xf3   :  { %v1699_v57 = vmax.f32 %v1697_v48, %v1698_v3  ;;  %v1277_v58 = vsel %vm221_vm14, %v1213_v9, inf  ;;  %v1285_v17 = vsel %vm221_vm14, %v1214_v8, inf  ;;  %v1286_v32 = vsel %vm221_vm14, %v1215_v45, inf }
  0xf4   :  { %v1278_v13 = vmin.f32 %v1276_v19, %v1277_v58  ;;  %v1287_v7 = vmin.f32 %v1285_v17, %v1286_v32  ;;  %v1294_v60 = vsel %vm221_vm14, %v1216_v12, inf  ;;  %v1295_v33 = vsel %vm221_vm14, %v1217_v4, inf }
  0xf5   :  { %v2289_v47 = vsel %vm2152_vm6, %v1699_v57, %v2288_v51  ;;  %v1296_v62 = vmin.f32 %v1294_v60, %v1295_v33  ;;  %v1303_v14 = vsel %vm221_vm14, %v1218_v6, inf  ;;  %v1304_v25 = vsel %vm221_vm14, %v1219_v11, inf }
  0xf6   :  { %2311 = vrot.lane.b32.xlu0 %v2289_v47, %s2603_s7  ;;  %v1279_v63 = vrot.slane %v1278_v13, 4  ;;  %v1288_v39 = vrot.slane %v1287_v7, 4  ;;  %v1305_v53 = vmin.f32 %v1303_v14, %v1304_v25  ;;  %v1312_v0 = vsel %vm221_vm14, %v1220_v2, inf }
  0xf7   :  { %v1297_v49 = vrot.slane %v1296_v62, 4  ;;  %v1313_v52 = vsel %vm221_vm14, %v1221_v36, inf  ;;  %v1321_v1 = vsel %vm221_vm14, %v1222_v50, inf  ;;  %v1322_v23 = vsel %vm221_vm14, %v1223_v55, inf }
  0xf8   :  { %v1280_v10 = vmin.f32 %v1278_v13, %v1279_v63  ;;  %v1289_v15 = vmin.f32 %v1287_v7, %v1288_v39  ;;  %v1306_v35 = vrot.slane %v1305_v53, 4  ;;  %v1314_v20 = vmin.f32 %v1312_v0, %v1313_v52  ;;  %v3460_v7 = vld [vmem:[%s5114_s0 + $0x100] sm:$0xff]  ;;  %v3471_v39 = vld [vmem:[%s5114_s0 + $0x108] sm:$0xff]  ;;  %v3480_v0 = vld [vmem:[%s5114_s0 + $0x110] sm:$0xff] }
  0xf9   :  { %v1298_v18 = vmin.f32 %v1296_v62, %v1297_v49  ;;  %v1323_v61 = vmin.f32 %v1321_v1, %v1322_v23  ;;  %v1330_v16 = vsel %vm221_vm14, %v1224_v22, inf  ;;  %v1331_v34 = vsel %vm221_vm14, %v1225_v42, inf }
  0xfa   :  { %v1281_v41 = vrot.slane %v1280_v10, 2  ;;  %v1290_v26 = vrot.slane %v1289_v15, 2  ;;  %v1307_v5 = vmin.f32 %v1305_v53, %v1306_v35  ;;  %v1315_v40 = vrot.slane %v1314_v20, 4 }
  0xfb   :  { %v1299_v9 = vrot.slane %v1298_v18, 2  ;;  %v1324_v8 = vrot.slane %v1323_v61, 4  ;;  %v1332_v44 = vmin.f32 %v1330_v16, %v1331_v34  ;;  %v1339_v54 = vsel %vm221_vm14, %v1226_v37, inf  ;;  %v3517_v34 = vld [vmem:[%s5114_s0 + $0x130] sm:$0xff] }
  0xfc   :  { %v1282_v56 = vmin.f32 %v1280_v10, %v1281_v41  ;;  %v1291_v24 = vmin.f32 %v1289_v15, %v1290_v26  ;;  %v1308_v43 = vrot.slane %v1307_v5, 2  ;;  %v1316_v45 = vmin.f32 %v1314_v20, %v1315_v40  ;;  %v3489_v10 = vld [vmem:[%s5114_s0 + $0x118] sm:$0xff]  ;;  %v3499_v20 = vld [vmem:[%s5114_s0 + $0x120] sm:$0xff] }
  0xfd   :  { %v1300_v12 = vmin.f32 %v1298_v18, %v1299_v9  ;;  %v1325_v4 = vmin.f32 %v1323_v61, %v1324_v8  ;;  %v1333_v30 = vrot.slane %v1332_v44, 4  ;;  %v1340_v48 = vsel %vm221_vm14, %v1227_v46, inf  ;;  %v3508_v61 = vld [vmem:[%s5114_s0 + $0x128] sm:$0xff]  ;;  %v3527_v9 = vld [vmem:[%s5114_s0 + $0x138] sm:$0xff] }
  0xfe   :  { %v1283_v38 = vrot.slane %v1282_v56, 1  ;;  %v1292_v6 = vrot.slane %v1291_v24, 1  ;;  %v1309_v11 = vmin.f32 %v1307_v5, %v1308_v43  ;;  %v1317_v2 = vrot.slane %v1316_v45, 2  ;;  %v3554_v43 = vld [vmem:[%s5114_s0 + $0x150] sm:$0xff] }
  0xff   :  { %v1301_v36 = vrot.slane %v1300_v12, 1  ;;  %v1326_v50 = vrot.slane %v1325_v4, 2  ;;  %v1334_v3 = vmin.f32 %v1332_v44, %v1333_v30  ;;  %v1341_v51 = vmin.f32 %v1339_v54, %v1340_v48  ;;  %v3536_v44 = vld [vmem:[%s5114_s0 + $0x140] sm:$0xff] }
 0x100   :  { %v1284_v55 = vmin.f32 %v1282_v56, %v1283_v38  ;;  %v1293_v22 = vmin.f32 %v1291_v24, %v1292_v6  ;;  %v1310_v42 = vrot.slane %v1309_v11, 1  ;;  %v1318_v37 = vmin.f32 %v1316_v45, %v1317_v2  ;;  %v3545_v56 = vld [vmem:[%s5114_s0 + $0x148] sm:$0xff]  ;;  %v3573_v38 = vld [vmem:[%s5114_s0 + $0x160] sm:$0xff] }
 0x101   :  { %v1302_v19 = vmin.f32 %v1300_v12, %v1301_v36  ;;  %v1327_v57 = vmin.f32 %v1325_v4, %v1326_v50  ;;  %v1335_v58 = vrot.slane %v1334_v3, 2  ;;  %v1342_v17 = vrot.slane %v1341_v51, 4  ;;  %v3563_v12 = vld [vmem:[%s5114_s0 + $0x158] sm:$0xff]  ;;  %v3591_v36 = vld [vmem:[%s5114_s0 + $0x170] sm:$0xff] }
 0x102   :  { %v1311_v32 = vmin.f32 %v1309_v11, %v1310_v42  ;;  %v1319_v13 = vrot.slane %v1318_v37, 1  ;;  %v2211_v46 = vsel %vm2140_vm0, %v1293_v22, %v1284_v55  ;;  %v3464_v60 = vmul.f32 %v3460_v7, %v3037_v31  ;;  %v3582_v11 = vld [vmem:[%s5114_s0 + $0x168] sm:$0xff] }
 0x103   :  { %v1328_v33 = vrot.slane %v1327_v57, 1  ;;  %v1336_v47 = vmin.f32 %v1334_v3, %v1335_v58  ;;  %v1343_v62 = vmin.f32 %v1341_v51, %v1342_v17  ;;  %v2212_v14 = vsel %vm2142_vm1, %v1302_v19, %v2211_v46  ;;  %v3600_v3 = vld [vmem:[%s5114_s0 + $0x178] sm:$0xff] }
 0x104   :  { %v1320_v25 = vmin.f32 %v1318_v37, %v1319_v13  ;;  %v2213_v63 = vsel %vm2144_vm2, %v1311_v32, %v2212_v14  ;;  %v3475_v53 = vmul.f32 %v3471_v39, %v3046_v21  ;;  %v3484_v49 = vmul.f32 %v3480_v0, %v3037_v31 }
 0x105   :  { %v1329_v52 = vmin.f32 %v1327_v57, %v1328_v33  ;;  %v1337_v1 = vrot.slane %v1336_v47, 1  ;;  %v1344_v23 = vrot.slane %v1343_v62, 2  ;;  %v3493_v15 = vmul.f32 %v3489_v10, %v3046_v21 }
 0x106   :  { %v2214_v35 = vsel %vm2146_vm3, %v1320_v25, %v2213_v63  ;;  %v3503_v18 = vmul.f32 %v3499_v20, %v3037_v31  ;;  %v3512_v16 = vmul.f32 %v3508_v61, %v3046_v21  ;;  %v3521_v41 = vmul.f32 %v3517_v34, %v3037_v31 }
 0x107   :  { %v1338_v26 = vmin.f32 %v1336_v47, %v1337_v1  ;;  %v1345_v5 = vmin.f32 %v1343_v62, %v1344_v23  ;;  %v2215_v40 = vsel %vm2148_vm4, %v1329_v52, %v2214_v35  ;;  %v3531_v8 = vmul.f32 %v3527_v9, %v3046_v21 }
 0x108   :  { %v3540_v54 = vmul.f32 %v3536_v44, %v3037_v31  ;;  %v3549_v24 = vmul.f32 %v3545_v56, %v3046_v21  ;;  %v3558_v45 = vmul.f32 %v3554_v43, %v3037_v31  ;;  %v3567_v4 = vmul.f32 %v3563_v12, %v3046_v21 }
 0x109   :  { %v1346_v30 = vrot.slane %v1345_v5, 1  ;;  %v2216_v48 = vsel %vm2150_vm5, %v1338_v26, %v2215_v40  ;;  %v3577_v6 = vmul.f32 %v3573_v38, %v3037_v31  ;;  %v3586_v2 = vmul.f32 %v3582_v11, %v3046_v21 }
 0x10a   :  { %v3595_v50 = vmul.f32 %v3591_v36, %v3037_v31  ;;  %v3604_v51 = vmul.f32 %v3600_v3, %v3046_v21  ;;  %v366_v55 = vsel %vm221_vm14, %v3460_v7, 0.0  ;;  %v367_v22 = vsel %vm221_vm14, %v3471_v39, 0.0 }
 0x10b   :  { %v1347_v42 = vmin.f32 %v1345_v5, %v1346_v30  ;;  %v368_v37 = vadd.f32 %v367_v22, %v366_v55  ;;  %v375_v19 = vsel %vm221_vm14, %v3480_v0, 0.0  ;;  %v376_v57 = vsel %vm221_vm14, %v3489_v10, 0.0 }
 0x10c   :  { %v377_v58 = vadd.f32 %v376_v57, %v375_v19  ;;  %v384_v17 = vsel %vm221_vm14, %v3499_v20, 0.0  ;;  %v385_v32 = vsel %vm221_vm14, %v3508_v61, 0.0  ;;  %v393_v13 = vsel %vm221_vm14, %v3517_v34, 0.0 }
 0x10d   :  { %v2217_v46 = vsel %vm2152_vm6, %v1347_v42, %v2216_v48  ;;  %v369_v33 = vrot.slane %v368_v37, 4  ;;  %v386_v47 = vadd.f32 %v385_v32, %v384_v17  ;;  %v394_v62 = vsel %vm221_vm14, %v3527_v9, 0.0 }
 0x10e   :  { %2239 = vrot.lane.b32.xlu1 %v2217_v46, %s2602_s6  ;;  %v378_v14 = vrot.slane %v377_v58, 4  ;;  %v395_v25 = vadd.f32 %v394_v62, %v393_v13  ;;  %v402_v63 = vsel %vm221_vm14, %v3536_v44, 0.0  ;;  %v403_v52 = vsel %vm221_vm14, %v3545_v56, 0.0 }
 0x10f   :  { %v370_v1 = vadd.f32 %v369_v33, %v368_v37  ;;  %v387_v23 = vrot.slane %v386_v47, 4  ;;  %v404_v35 = vadd.f32 %v403_v52, %v402_v63  ;;  %v411_v26 = vsel %vm221_vm14, %v3554_v43, 0.0 }
 0x110   :  { %v379_v5 = vadd.f32 %v378_v14, %v377_v58  ;;  %v396_v40 = vrot.slane %v395_v25, 4  ;;  %v412_v30 = vsel %vm221_vm14, %v3563_v12, 0.0  ;;  %v420_v48 = vsel %vm221_vm14, %v3573_v38, 0.0 }
 0x111   :  { %v371_v55 = vrot.slane %v370_v1, 2  ;;  %v388_v22 = vadd.f32 %v387_v23, %v386_v47  ;;  %v405_v42 = vrot.slane %v404_v35, 4  ;;  %v413_v19 = vadd.f32 %v412_v30, %v411_v26 }
 0x112   :  { %v380_v57 = vrot.slane %v379_v5, 2  ;;  %v397_v17 = vadd.f32 %v396_v40, %v395_v25  ;;  %v421_v37 = vsel %vm221_vm14, %v3582_v11, 0.0  ;;  %v429_v32 = vsel %vm221_vm14, %v3591_v36, 0.0 }
 0x113   :  { %v372_v58 = vadd.f32 %v371_v55, %v370_v1  ;;  %v389_v13 = vrot.slane %v388_v22, 2  ;;  %v406_v46 = vadd.f32 %v405_v42, %v404_v35  ;;  %v414_v33 = vrot.slane %v413_v19, 4 }
 0x114   :  { %v381_v62 = vadd.f32 %v380_v57, %v379_v5  ;;  %v398_v14 = vrot.slane %v397_v17, 2  ;;  %v422_v63 = vadd.f32 %v421_v37, %v420_v48  ;;  %v430_v47 = vsel %vm221_vm14, %v3600_v3, 0.0 }
 0x115   :  { %v373_v52 = vrot.slane %v372_v58, 1  ;;  %v390_v23 = vadd.f32 %v389_v13, %v388_v22  ;;  %v407_v26 = vrot.slane %v406_v46, 2  ;;  %v415_v25 = vadd.f32 %v414_v33, %v413_v19 }
 0x116   :  { %v382_v40 = vrot.slane %v381_v62, 1  ;;  %v399_v30 = vadd.f32 %v398_v14, %v397_v17  ;;  %v423_v27 = vrot.slane %v422_v63, 4  ;;  %v431_v28 = vadd.f32 %v430_v47, %v429_v32 }
 0x117   :  { %v3640_v29 = vadd.f32 %v373_v52, %v372_v58  ;;  %v391_v1 = vrot.slane %v390_v23, 1  ;;  %v408_v55 = vadd.f32 %v407_v26, %v406_v46  ;;  %v416_v35 = vrot.slane %v415_v25, 2 }
 0x118   :  { %v3642_v42 = vadd.f32 %v382_v40, %v381_v62  ;;  %v400_v5 = vrot.slane %v399_v30, 1  ;;  %v424_v48 = vadd.f32 %v423_v27, %v422_v63  ;;  %v432_v57 = vrot.slane %v431_v28, 4 }
 0x119   :  { %v3644_v37 = vadd.f32 %v391_v1, %v390_v23  ;;  %v409_v59 = vrot.slane %v408_v55, 1  ;;  %v417_v22 = vadd.f32 %v416_v35, %v415_v25  ;;  %v654_v19 = vsel %vm221_vm14, %v3464_v60, 0.0 }
 0x11a   :  { %v3648_v17 = vadd.f32 %v400_v5, %v399_v30  ;;  %v425_v32 = vrot.slane %v424_v48, 2  ;;  %v433_v58 = vadd.f32 %v432_v57, %v431_v28  ;;  %v655_v13 = vsel %vm221_vm14, %v3475_v53, 0.0 }
 0x11b   :  { %v3652_v46 = vadd.f32 %v409_v59, %v408_v55  ;;  %v418_v33 = vrot.slane %v417_v22, 1  ;;  %v656_v62 = vadd.f32 %v655_v13, %v654_v19  ;;  %v663_v27 = vsel %vm221_vm14, %v3484_v49, 0.0 }
 0x11c   :  { %v426_v14 = vadd.f32 %v425_v32, %v424_v48  ;;  %v434_v63 = vrot.slane %v433_v58, 2  ;;  %v664_v47 = vsel %vm221_vm14, %v3493_v15, 0.0  ;;  %v672_v52 = vsel %vm221_vm14, %v3503_v18, 0.0 }
 0x11d   :  { %v3660_v23 = vadd.f32 %v418_v33, %v417_v22  ;;  %v657_v28 = vrot.slane %v656_v62, 4  ;;  %v665_v26 = vadd.f32 %v664_v47, %v663_v27  ;;  %v673_v59 = vsel %vm221_vm14, %v3512_v16, 0.0 }
 0x11e   :  { %v427_v25 = vrot.slane %v426_v14, 1  ;;  %v435_v40 = vadd.f32 %v434_v63, %v433_v58  ;;  %v674_v30 = vadd.f32 %v673_v59, %v672_v52  ;;  %v681_v1 = vsel %vm221_vm14, %v3521_v41, 0.0 }
 0x11f   :  { %5173 = vst [vmem:[#allocation6_spill] sm:$0xff] %v3660_v23  ;;  %v658_v55 = vadd.f32 %v657_v28, %v656_v62  ;;  %v666_v35 = vrot.slane %v665_v26, 4  ;;  %v682_v5 = vsel %vm221_vm14, %v3531_v8, 0.0  ;;  %v690_v48 = vsel %vm221_vm14, %v3540_v54, 0.0 }
 0x120   :  { %v3670_v57 = vadd.f32 %v427_v25, %v426_v14  ;;  %v436_v22 = vrot.slane %v435_v40, 1  ;;  %v675_v19 = vrot.slane %v674_v30, 4  ;;  %v683_v32 = vadd.f32 %v682_v5, %v681_v1 }
 0x121   :  { %v659_v13 = vrot.slane %v658_v55, 2  ;;  %v667_v33 = vadd.f32 %v666_v35, %v665_v26  ;;  %v691_v58 = vsel %vm221_vm14, %v3549_v24, 0.0  ;;  %v699_v62 = vsel %vm221_vm14, %v3558_v45, 0.0 }
 0x122   :  { %5174 = vst [vmem:[#allocation8_spill] sm:$0xff] %v3670_v57  ;;  %v3676_v27 = vadd.f32 %v436_v22, %v435_v40  ;;  %v676_v63 = vadd.f32 %v675_v19, %v674_v30  ;;  %v684_v47 = vrot.slane %v683_v32, 4  ;;  %v692_v52 = vadd.f32 %v691_v58, %v690_v48 }
 0x123   :  { %v660_v28 = vadd.f32 %v659_v13, %v658_v55  ;;  %v668_v59 = vrot.slane %v667_v33, 2  ;;  %v700_v14 = vsel %vm221_vm14, %v3567_v4, 0.0  ;;  %v708_v25 = vsel %vm221_vm14, %v3577_v6, 0.0 }
 0x124   :  { %5175 = vst [vmem:[#allocation13_spill] sm:$0xff] %v3676_v27  ;;  %v677_v26 = vrot.slane %v676_v63, 2  ;;  %v685_v1 = vadd.f32 %v684_v47, %v683_v32  ;;  %v693_v35 = vrot.slane %v692_v52, 4  ;;  %v701_v5 = vadd.f32 %v700_v14, %v699_v62 }
 0x125   :  { %v661_v21 = vrot.slane %v660_v28, 1  ;;  %v669_v31 = vadd.f32 %v668_v59, %v667_v33  ;;  %v709_v40 = vsel %vm221_vm14, %v3586_v2, 0.0  ;;  %v717_v30 = vsel %vm221_vm14, %v3595_v50, 0.0 }
 0x126   :  { %v678_v55 = vadd.f32 %v677_v26, %v676_v63  ;;  %v686_v48 = vrot.slane %v685_v1, 2  ;;  %v694_v22 = vadd.f32 %v693_v35, %v692_v52  ;;  %v702_v19 = vrot.slane %v701_v5, 4 }
 0x127   :  { %v3686_v13 = vadd.f32 %v661_v21, %v660_v28  ;;  %v670_v58 = vrot.slane %v669_v31, 1  ;;  %v710_v27 = vadd.f32 %v709_v40, %v708_v25  ;;  %v718_v32 = vsel %vm221_vm14, %v3604_v51, 0.0 }
 0x128   :  { %v679_v62 = vrot.slane %v678_v55, 1  ;;  %v687_v47 = vadd.f32 %v686_v48, %v685_v1  ;;  %v695_v33 = vrot.slane %v694_v22, 2  ;;  %v703_v59 = vadd.f32 %v702_v19, %v701_v5 }
 0x129   :  { %v3690_v14 = vadd.f32 %v670_v58, %v669_v31  ;;  %v711_v57 = vrot.slane %v710_v27, 4  ;;  %v719_v23 = vadd.f32 %v718_v32, %v717_v30  ;;  %v830_v63 = vmul.f32 %v3460_v7, %v3464_v60 }
 0x12a   :  { %v3694_v52 = vadd.f32 %v679_v62, %v678_v55  ;;  %v688_v21 = vrot.slane %v687_v47, 1  ;;  %v696_v28 = vadd.f32 %v695_v33, %v694_v22  ;;  %v704_v26 = vrot.slane %v703_v59, 2 }
 0x12b   :  { %v712_v25 = vadd.f32 %v711_v57, %v710_v27  ;;  %v720_v35 = vrot.slane %v719_v23, 4  ;;  %v831_v40 = vmul.f32 %v3471_v39, %v3475_v53  ;;  %v832_v1 = vmul.f32 %v3480_v0, %v3484_v49 }
 0x12c   :  { %v3700_v31 = vadd.f32 %v688_v21, %v687_v47  ;;  %v697_v5 = vrot.slane %v696_v28, 1  ;;  %v705_v30 = vadd.f32 %v704_v26, %v703_v59  ;;  %v833_v7 = vmul.f32 %v3489_v10, %v3493_v15 }
 0x12d   :  { %v713_v60 = vrot.slane %v712_v25, 2  ;;  %v721_v55 = vadd.f32 %v720_v35, %v719_v23  ;;  %v834_v48 = vmul.f32 %v3499_v20, %v3503_v18  ;;  %v835_v57 = vmul.f32 %v3508_v61, %v3512_v16 }
 0x12e   :  { %v3708_v27 = vadd.f32 %v697_v5, %v696_v28  ;;  %v706_v39 = vrot.slane %v705_v30, 1  ;;  %v836_v53 = vmul.f32 %v3517_v34, %v3521_v41  ;;  %v837_v0 = vmul.f32 %v3527_v9, %v3531_v8 }
 0x12f   :  { %v714_v49 = vadd.f32 %v713_v60, %v712_v25  ;;  %v722_v22 = vrot.slane %v721_v55, 2  ;;  %v838_v10 = vmul.f32 %v3536_v44, %v3540_v54  ;;  %v839_v15 = vmul.f32 %v3545_v56, %v3549_v24 }
 0x130   :  { %v3718_v20 = vadd.f32 %v706_v39, %v705_v30  ;;  %v840_v18 = vmul.f32 %v3554_v43, %v3558_v45  ;;  %v841_v61 = vmul.f32 %v3563_v12, %v3567_v4  ;;  %v842_v16 = vmul.f32 %v3573_v38, %v3577_v6 }
 0x131   :  { %v715_v34 = vrot.slane %v714_v49, 1  ;;  %v723_v41 = vadd.f32 %v722_v22, %v721_v55  ;;  %v843_v9 = vmul.f32 %v3582_v11, %v3586_v2  ;;  %v844_v8 = vmul.f32 %v3591_v36, %v3595_v50 }
 0x132   :  { %v845_v44 = vmul.f32 %v3600_v3, %v3604_v51  ;;  %v1006_v54 = vsel %vm221_vm14, %v830_v63, 0.0  ;;  %v1007_v56 = vsel %vm221_vm14, %v831_v40, 0.0  ;;  %v1015_v24 = vsel %vm221_vm14, %v832_v1, 0.0 }
 0x133   :  { %v3735_v43 = vadd.f32 %v715_v34, %v714_v49  ;;  %v724_v45 = vrot.slane %v723_v41, 1  ;;  %v1008_v12 = vadd.f32 %v1007_v56, %v1006_v54  ;;  %v1016_v4 = vsel %vm221_vm14, %v833_v7, 0.0 }
 0x134   :  { %v1017_v38 = vadd.f32 %v1016_v4, %v1015_v24  ;;  %v1024_v6 = vsel %vm221_vm14, %v834_v48, 0.0  ;;  %v1025_v11 = vsel %vm221_vm14, %v835_v57, 0.0  ;;  %v1033_v2 = vsel %vm221_vm14, %v836_v53, 0.0 }
 0x135   :  { %v3741_v36 = vadd.f32 %v724_v45, %v723_v41  ;;  %v1009_v50 = vrot.slane %v1008_v12, 4  ;;  %v1026_v3 = vadd.f32 %v1025_v11, %v1024_v6  ;;  %v1034_v51 = vsel %vm221_vm14, %v837_v0, 0.0 }
 0x136   :  { %v1018_v23 = vrot.slane %v1017_v38, 4  ;;  %v1035_v19 = vadd.f32 %v1034_v51, %v1033_v2  ;;  %v1042_v58 = vsel %vm221_vm14, %v838_v10, 0.0  ;;  %v1043_v32 = vsel %vm221_vm14, %v839_v15, 0.0 }
 0x137   :  { %v1010_v62 = vadd.f32 %v1009_v50, %v1008_v12  ;;  %v1027_v47 = vrot.slane %v1026_v3, 4  ;;  %v1044_v33 = vadd.f32 %v1043_v32, %v1042_v58  ;;  %v1051_v59 = vsel %vm221_vm14, %v840_v18, 0.0 }
 0x138   :  { %v1019_v63 = vadd.f32 %v1018_v23, %v1017_v38  ;;  %v1036_v21 = vrot.slane %v1035_v19, 4  ;;  %v1052_v28 = vsel %vm221_vm14, %v841_v61, 0.0  ;;  %v1060_v26 = vsel %vm221_vm14, %v842_v16, 0.0  ;;  %v3752_v16 = vpop.permute.xlu2 %1157 }
 0x139   :  { %v1011_v25 = vrot.slane %v1010_v62, 2  ;;  %v1028_v35 = vadd.f32 %v1027_v47, %v1026_v3  ;;  %v1045_v40 = vrot.slane %v1044_v33, 4  ;;  %v1053_v1 = vadd.f32 %v1052_v28, %v1051_v59  ;;  %v5183_v28 = vld [vmem:[#allocation8_spill] sm:$0xff] }
 0x13a   :  { %v1020_v5 = vrot.slane %v1019_v63, 2  ;;  %v1037_v30 = vadd.f32 %v1036_v21, %v1035_v19  ;;  %v1061_v7 = vsel %vm221_vm14, %v843_v9, 0.0  ;;  %v1069_v60 = vsel %vm221_vm14, %v844_v8, 0.0 }
 0x13b   :  { %v1012_v55 = vadd.f32 %v1011_v25, %v1010_v62  ;;  %v1029_v48 = vrot.slane %v1028_v35, 2  ;;  %v1046_v57 = vadd.f32 %v1045_v40, %v1044_v33  ;;  %v1054_v39 = vrot.slane %v1053_v1, 4 }
 0x13c   :  { %v1021_v53 = vadd.f32 %v1020_v5, %v1019_v63  ;;  %v1038_v0 = vrot.slane %v1037_v30, 2  ;;  %v1062_v49 = vadd.f32 %v1061_v7, %v1060_v26  ;;  %v1070_v22 = vsel %vm221_vm14, %v845_v44, 0.0  ;;  %v5181_v63 = vld [vmem:[#allocation6_spill] sm:$0xff] }
 0x13d   :  { %v1013_v10 = vrot.slane %v1012_v55, 1  ;;  %v1030_v15 = vadd.f32 %v1029_v48, %v1028_v35  ;;  %v1047_v18 = vrot.slane %v1046_v57, 2  ;;  %v1055_v61 = vadd.f32 %v1054_v39, %v1053_v1 }
 0x13e   :  { %v1022_v34 = vrot.slane %v1021_v53, 1  ;;  %v1039_v41 = vadd.f32 %v1038_v0, %v1037_v30  ;;  %v1063_v9 = vrot.slane %v1062_v49, 4  ;;  %v1071_v54 = vadd.f32 %v1070_v22, %v1069_v60 }
 0x13f   :  { %v1014_v8 = vadd.f32 %v1013_v10, %v1012_v55  ;;  %v1031_v56 = vrot.slane %v1030_v15, 1  ;;  %v1048_v24 = vadd.f32 %v1047_v18, %v1046_v57  ;;  %v1056_v45 = vrot.slane %v1055_v61, 2 }
 0x140   :  { %v1023_v12 = vadd.f32 %v1022_v34, %v1021_v53  ;;  %v1040_v4 = vrot.slane %v1039_v41, 1  ;;  %v1064_v38 = vadd.f32 %v1063_v9, %v1062_v49  ;;  %v1072_v6 = vrot.slane %v1071_v54, 4 }
 0x141   :  { %v1032_v11 = vadd.f32 %v1031_v56, %v1030_v15  ;;  %v1049_v44 = vrot.slane %v1048_v24, 1  ;;  %v1057_v2 = vadd.f32 %v1056_v45, %v1055_v61  ;;  %v3756_v50 = vmul.f32 %v3752_v16, %v3640_v29 }
 0x142   :  { %v1041_v3 = vadd.f32 %v1040_v4, %v1039_v41  ;;  %v1065_v51 = vrot.slane %v1064_v38, 2  ;;  %v1073_v23 = vadd.f32 %v1072_v6, %v1071_v54  ;;  %v3760_v19 = vmul.f32 %v3752_v16, %v3642_v42 }
 0x143   :  { %5176 = vst [vmem:[#allocation14_spill] sm:$0xff] %v3756_v50  ;;  %v1050_v58 = vadd.f32 %v1049_v44, %v1048_v24  ;;  %v1058_v32 = vrot.slane %v1057_v2, 1  ;;  %v3764_v62 = vmul.f32 %v3752_v16, %v3644_v37  ;;  %v3768_v47 = vmul.f32 %v3752_v16, %v3648_v17  ;;  %v5185_v37 = vld [vmem:[#allocation13_spill] sm:$0xff] }
 0x144   :  { %5177 = vst [vmem:[#allocation15_spill] sm:$0xff] %v3760_v19  ;;  %v1066_v33 = vadd.f32 %v1065_v51, %v1064_v38  ;;  %v1074_v29 = vrot.slane %v1073_v23, 2  ;;  %v3772_v59 = vmul.f32 %v3752_v16, %v3652_v46  ;;  %v3776_v42 = vmul.f32 %v3752_v16, %v5181_v63 }
 0x145   :  { %5178 = vst [vmem:[#allocation16_spill] sm:$0xff] %v3764_v62  ;;  %v1059_v21 = vadd.f32 %v1058_v32, %v1057_v2  ;;  %v3780_v26 = vmul.f32 %v3752_v16, %v5183_v28  ;;  %v3784_v25 = vmul.f32 %v3752_v16, %v5185_v37  ;;  %v1932_v17 = vmul.f32 2.0, %v3756_v50  ;;  %v3830_v37 = vld [vmem:[%s5114_s0 + $0x180] sm:$0xff] }
 0x146   :  { %5179 = vst [vmem:[#allocation17_spill] sm:$0xff] %v3768_v47  ;;  %v1067_v35 = vrot.slane %v1066_v33, 1  ;;  %v1075_v40 = vadd.f32 %v1074_v29, %v1073_v23  ;;  %v1933_v46 = vmul.f32 2.0, %v3760_v19  ;;  %v1934_v1 = vmul.f32 2.0, %v3764_v62 }
 0x147   :  { %5180 = vst [vmem:[#allocation18_spill] sm:$0xff] %v3772_v59  ;;  %v1935_v5 = vmul.f32 2.0, %v3768_v47  ;;  %v1936_v30 = vmul.f32 2.0, %v3772_v59  ;;  %v1937_v7 = vmul.f32 2.0, %v3776_v42  ;;  %v1938_v60 = vmul.f32 2.0, %v3780_v26 }
 0x148   :  { %5182 = vst [vmem:[#allocation6_spill] sm:$0xff] %v3776_v42  ;;  %v1068_v55 = vadd.f32 %v1067_v35, %v1066_v33  ;;  %v1076_v48 = vrot.slane %v1075_v40, 1  ;;  %v1939_v57 = vmul.f32 2.0, %v3784_v25  ;;  %v1964_v39 = vmul.f32 %v1932_v17, %v3686_v13  ;;  %v5187_v17 = vld [vmem:[#allocation9_spill] sm:$0xff] }
 0x149   :  { %5184 = vst [vmem:[#allocation8_spill] sm:$0xff] %v3780_v26  ;;  %v1965_v53 = vmul.f32 %v1933_v46, %v3690_v14  ;;  %v1966_v0 = vmul.f32 %v1934_v1, %v3694_v52  ;;  %v1967_v49 = vmul.f32 %v1935_v5, %v3700_v31  ;;  %v1968_v22 = vmul.f32 %v1936_v30, %v3708_v27  ;;  %v5188_v46 = vld [vmem:[#allocation11_spill] sm:$0xff] }
 0x14a   :  { %5186 = vst [vmem:[#allocation13_spill] sm:$0xff] %v3784_v25  ;;  %v1077_v10 = vadd.f32 %v1076_v48, %v1075_v40  ;;  %v1969_v15 = vmul.f32 %v1937_v7, %v3718_v20  ;;  %v1970_v18 = vmul.f32 %v1938_v60, %v3735_v43  ;;  %v1971_v61 = vmul.f32 %v1939_v57, %v3741_v36  ;;  %v3839_v40 = vld [vmem:[%s5114_s0 + $0x188] sm:$0xff]  ;;  %v3848_v5 = vld [vmem:[%s5114_s0 + $0x190] sm:$0xff]  ;;  %v3858_v60 = vld [vmem:[%s5114_s0 + $0x198] sm:$0xff] }
 0x14b   :  { %v1996_v34 = vsub.f32 %v1014_v8, %v1964_v39  ;;  %v1997_v41 = vsub.f32 %v1023_v12, %v1965_v53  ;;  %v1998_v9 = vsub.f32 %v1032_v11, %v1966_v0  ;;  %v1999_v54 = vsub.f32 %v1041_v3, %v1967_v49  ;;  %v3867_v48 = vld [vmem:[%s5114_s0 + $0x1a0] sm:$0xff]  ;;  %v3876_v39 = vld [vmem:[%s5114_s0 + $0x1a8] sm:$0xff]  ;;  %v3886_v49 = vld [vmem:[%s5114_s0 + $0x1b0] sm:$0xff] }
 0x14c   :  { %v2000_v13 = vsub.f32 %v1050_v58, %v1968_v22  ;;  %v2001_v56 = vsub.f32 %v1059_v21, %v1969_v15  ;;  %v2002_v14 = vsub.f32 %v1068_v55, %v1970_v18  ;;  %v2003_v24 = vsub.f32 %v1077_v10, %v1971_v61  ;;  %v3895_v10 = vld [vmem:[%s5114_s0 + $0x1b8] sm:$0xff]  ;;  %v3904_v18 = vld [vmem:[%s5114_s0 + $0x1c0] sm:$0xff] }
 0x14d   :  { %v2028_v52 = vmul.f32 %v1996_v34, %v3752_v16  ;;  %v2029_v31 = vmul.f32 %v1997_v41, %v3752_v16  ;;  %v2030_v27 = vmul.f32 %v1998_v9, %v3752_v16  ;;  %v2031_v20 = vmul.f32 %v1999_v54, %v3752_v16  ;;  %v3914_v41 = vld [vmem:[%s5114_s0 + $0x1c8] sm:$0xff]  ;;  %v3923_v54 = vld [vmem:[%s5114_s0 + $0x1d0] sm:$0xff] }
 0x14e   :  { %v2032_v43 = vmul.f32 %v2000_v13, %v3752_v16  ;;  %v2033_v36 = vmul.f32 %v2001_v56, %v3752_v16  ;;  %v2034_v8 = vmul.f32 %v2002_v14, %v3752_v16  ;;  %v2035_v45 = vmul.f32 %v2003_v24, %v3752_v16  ;;  %v3932_v56 = vld [vmem:[%s5114_s0 + $0x1d8] sm:$0xff] }
 0x14f   :  { %v2060_v12 = vmul.f32 %v3756_v50, %v3756_v50  ;;  %v2061_v4 = vmul.f32 %v3760_v19, %v3760_v19  ;;  %v2062_v38 = vmul.f32 %v3764_v62, %v3764_v62  ;;  %v2063_v6 = vmul.f32 %v3768_v47, %v3768_v47 }
 0x150   :  { %v2064_v11 = vmul.f32 %v3772_v59, %v3772_v59  ;;  %v2065_v44 = vmul.f32 %v3776_v42, %v3776_v42  ;;  %v2066_v2 = vmul.f32 %v3780_v26, %v3780_v26  ;;  %v2067_v3 = vmul.f32 %v3784_v25, %v3784_v25 }
 0x151   :  { %v2092_v51 = vadd.f32 %v2060_v12, %v2028_v52  ;;  %v2093_v23 = vadd.f32 %v2061_v4, %v2029_v31  ;;  %v2094_v58 = vadd.f32 %v2062_v38, %v2030_v27  ;;  %v2095_v32 = vadd.f32 %v2063_v6, %v2031_v20  ;;  %v3942_v52 = vld [vmem:[%s5114_s0 + $0x1e0] sm:$0xff]  ;;  %v3951_v27 = vld [vmem:[%s5114_s0 + $0x1e8] sm:$0xff] }
 0x152   :  { %v2096_v33 = vadd.f32 %v2064_v11, %v2032_v43  ;;  %v2097_v29 = vadd.f32 %v2065_v44, %v2033_v36  ;;  %v2098_v63 = vadd.f32 %v2066_v2, %v2034_v8  ;;  %v2099_v21 = vadd.f32 %v2067_v3, %v2035_v45  ;;  %v3960_v43 = vld [vmem:[%s5114_s0 + $0x1f0] sm:$0xff]  ;;  %v3970_v45 = vld [vmem:[%s5114_s0 + $0x1f8] sm:$0xff] }
 0x153   :  { %v2369_v28 = vsel %vm2140_vm0, %v2093_v23, %v2092_v51  ;;  %v3834_v35 = vmul.f32 %v3830_v37, %v5187_v17  ;;  %v3843_v1 = vmul.f32 %v3839_v40, %v5188_v46  ;;  %v3852_v30 = vmul.f32 %v3848_v5, %v5187_v17 }
 0x154   :  { %v2370_v7 = vsel %vm2142_vm1, %v2094_v58, %v2369_v28  ;;  %v3862_v55 = vmul.f32 %v3858_v60, %v5188_v46  ;;  %v3871_v57 = vmul.f32 %v3867_v48, %v5187_v17  ;;  %v3880_v53 = vmul.f32 %v3876_v39, %v5188_v46 }
 0x155   :  { %v2371_v0 = vsel %vm2144_vm2, %v2095_v32, %v2370_v7  ;;  %v3890_v22 = vmul.f32 %v3886_v49, %v5187_v17  ;;  %v3899_v15 = vmul.f32 %v3895_v10, %v5188_v46  ;;  %v3908_v61 = vmul.f32 %v3904_v18, %v5187_v17 }
 0x156   :  { %v2372_v34 = vsel %vm2146_vm3, %v2096_v33, %v2371_v0  ;;  %v3918_v9 = vmul.f32 %v3914_v41, %v5188_v46  ;;  %v3927_v13 = vmul.f32 %v3923_v54, %v5187_v17  ;;  %v3936_v14 = vmul.f32 %v3932_v56, %v5188_v46 }
 0x157   :  { %v2373_v24 = vsel %vm2148_vm4, %v2097_v29, %v2372_v34  ;;  %v3946_v31 = vmul.f32 %v3942_v52, %v5187_v17  ;;  %v3955_v20 = vmul.f32 %v3951_v27, %v5188_v46  ;;  %v3964_v36 = vmul.f32 %v3960_v43, %v5187_v17 }
 0x158   :  { %v2374_v8 = vsel %vm2150_vm5, %v2098_v63, %v2373_v24  ;;  %v3974_v12 = vmul.f32 %v3970_v45, %v5188_v46  ;;  %v438_v4 = vsel %vm221_vm14, %v3830_v37, 0.0  ;;  %v439_v38 = vsel %vm221_vm14, %v3839_v40, 0.0 }
 0x159   :  { %v2375_v6 = vsel %vm2152_vm6, %v2099_v21, %v2374_v8  ;;  %v440_v11 = vadd.f32 %v439_v38, %v438_v4  ;;  %v447_v44 = vsel %vm221_vm14, %v3848_v5, 0.0  ;;  %v448_v2 = vsel %vm221_vm14, %v3858_v60, 0.0 }
 0x15a   :  { %2387 = vrot.lane.b32.xlu2 %v2375_v6, %s2604_s11  ;;  %v449_v3 = vadd.f32 %v448_v2, %v447_v44  ;;  %v456_v51 = vsel %vm221_vm14, %v3867_v48, 0.0  ;;  %v457_v23 = vsel %vm221_vm14, %v3876_v39, 0.0  ;;  %v465_v58 = vsel %vm221_vm14, %v3886_v49, 0.0 }
 0x15b   :  { %v441_v32 = vrot.slane %v440_v11, 4  ;;  %v458_v33 = vadd.f32 %v457_v23, %v456_v51  ;;  %v466_v29 = vsel %vm221_vm14, %v3895_v10, 0.0  ;;  %v474_v63 = vsel %vm221_vm14, %v3904_v18, 0.0 }
 0x15c   :  { %v450_v21 = vrot.slane %v449_v3, 4  ;;  %v467_v28 = vadd.f32 %v466_v29, %v465_v58  ;;  %v475_v17 = vsel %vm221_vm14, %v3914_v41, 0.0  ;;  %v483_v46 = vsel %vm221_vm14, %v3923_v54, 0.0 }
 0x15d   :  { %v442_v7 = vadd.f32 %v441_v32, %v440_v11  ;;  %v459_v0 = vrot.slane %v458_v33, 4  ;;  %v476_v34 = vadd.f32 %v475_v17, %v474_v63  ;;  %v484_v24 = vsel %vm221_vm14, %v3932_v56, 0.0 }
 0x15e   :  { %v451_v8 = vadd.f32 %v450_v21, %v449_v3  ;;  %v468_v4 = vrot.slane %v467_v28, 4  ;;  %v485_v38 = vadd.f32 %v484_v24, %v483_v46  ;;  %v492_v6 = vsel %vm221_vm14, %v3942_v52, 0.0 }
 0x15f   :  { %v443_v44 = vrot.slane %v442_v7, 2  ;;  %v460_v2 = vadd.f32 %v459_v0, %v458_v33  ;;  %v477_v51 = vrot.slane %v476_v34, 4  ;;  %v493_v23 = vsel %vm221_vm14, %v3951_v27, 0.0 }
 0x160   :  { %v452_v58 = vrot.slane %v451_v8, 2  ;;  %v469_v29 = vadd.f32 %v468_v4, %v467_v28  ;;  %v486_v11 = vrot.slane %v485_v38, 4  ;;  %v494_v32 = vadd.f32 %v493_v23, %v492_v6 }
 0x161   :  { %v444_v63 = vadd.f32 %v443_v44, %v442_v7  ;;  %v461_v17 = vrot.slane %v460_v2, 2  ;;  %v478_v25 = vadd.f32 %v477_v51, %v476_v34  ;;  %v501_v3 = vsel %vm221_vm14, %v3960_v43, 0.0 }
 0x162   :  { %v453_v21 = vadd.f32 %v452_v58, %v451_v8  ;;  %v470_v46 = vrot.slane %v469_v29, 2  ;;  %v487_v24 = vadd.f32 %v486_v11, %v485_v38  ;;  %v495_v26 = vrot.slane %v494_v32, 4 }
 0x163   :  { %v445_v42 = vrot.slane %v444_v63, 1  ;;  %v462_v33 = vadd.f32 %v461_v17, %v460_v2  ;;  %v479_v0 = vrot.slane %v478_v25, 2  ;;  %v502_v59 = vsel %vm221_vm14, %v3970_v45, 0.0 }
 0x164   :  { %v454_v47 = vrot.slane %v453_v21, 1  ;;  %v471_v28 = vadd.f32 %v470_v46, %v469_v29  ;;  %v488_v4 = vrot.slane %v487_v24, 2  ;;  %v496_v6 = vadd.f32 %v495_v26, %v494_v32 }
 0x165   :  { %v4010_v7 = vadd.f32 %v445_v42, %v444_v63  ;;  %v463_v34 = vrot.slane %v462_v33, 1  ;;  %v480_v44 = vadd.f32 %v479_v0, %v478_v25  ;;  %v503_v51 = vadd.f32 %v502_v59, %v501_v3 }
 0x166   :  { %v4012_v23 = vadd.f32 %v454_v47, %v453_v21  ;;  %v472_v8 = vrot.slane %v471_v28, 1  ;;  %v489_v38 = vadd.f32 %v488_v4, %v487_v24  ;;  %v497_v58 = vrot.slane %v496_v6, 2 }
 0x167   :  { %v4014_v11 = vadd.f32 %v463_v34, %v462_v33  ;;  %v481_v2 = vrot.slane %v480_v44, 1  ;;  %v504_v17 = vrot.slane %v503_v51, 4  ;;  %v726_v62 = vsel %vm221_vm14, %v3834_v35, 0.0 }
 0x168   :  { %v4018_v29 = vadd.f32 %v472_v8, %v471_v28  ;;  %v490_v26 = vrot.slane %v489_v38, 1  ;;  %v498_v42 = vadd.f32 %v497_v58, %v496_v6  ;;  %v727_v25 = vsel %vm221_vm14, %v3843_v1, 0.0 }
 0x169   :  { %v4022_v59 = vadd.f32 %v481_v2, %v480_v44  ;;  %v505_v47 = vadd.f32 %v504_v17, %v503_v51  ;;  %v728_v32 = vadd.f32 %v727_v25, %v726_v62  ;;  %v735_v63 = vsel %vm221_vm14, %v3852_v30, 0.0 }
 0x16a   :  { %v4026_v3 = vadd.f32 %v490_v26, %v489_v38  ;;  %v499_v21 = vrot.slane %v498_v42, 1  ;;  %v736_v46 = vsel %vm221_vm14, %v3862_v55, 0.0  ;;  %v744_v24 = vsel %vm221_vm14, %v3871_v57, 0.0 }
 0x16b   :  { %5189 = vst [vmem:[#allocation9_spill] sm:$0xff] %v4022_v59  ;;  %v506_v33 = vrot.slane %v505_v47, 2  ;;  %v729_v0 = vrot.slane %v728_v32, 4  ;;  %v737_v28 = vadd.f32 %v736_v46, %v735_v63  ;;  %v745_v4 = vsel %vm221_vm14, %v3880_v53, 0.0 }
 0x16c   :  { %5190 = vst [vmem:[#allocation11_spill] sm:$0xff] %v4026_v3  ;;  %v4034_v6 = vadd.f32 %v499_v21, %v498_v42  ;;  %v746_v62 = vadd.f32 %v745_v4, %v744_v24  ;;  %v753_v34 = vsel %vm221_vm14, %v3890_v22, 0.0  ;;  %v754_v44 = vsel %vm221_vm14, %v3899_v15, 0.0 }
 0x16d   :  { %v507_v51 = vadd.f32 %v506_v33, %v505_v47  ;;  %v730_v8 = vadd.f32 %v729_v0, %v728_v32  ;;  %v738_v38 = vrot.slane %v737_v28, 4  ;;  %v755_v58 = vadd.f32 %v754_v44, %v753_v34 }
 0x16e   :  { %5191 = vst [vmem:[#allocation19_spill] sm:$0xff] %v4034_v6  ;;  %v747_v2 = vrot.slane %v746_v62, 4  ;;  %v762_v17 = vsel %vm221_vm14, %v3908_v61, 0.0  ;;  %v763_v26 = vsel %vm221_vm14, %v3918_v9, 0.0  ;;  %v771_v42 = vsel %vm221_vm14, %v3927_v13, 0.0 }
 0x16f   :  { %v508_v25 = vrot.slane %v507_v51, 1  ;;  %v731_v63 = vrot.slane %v730_v8, 2  ;;  %v739_v21 = vadd.f32 %v738_v38, %v737_v28  ;;  %v756_v46 = vrot.slane %v755_v58, 4 }
 0x170   :  { %v748_v24 = vadd.f32 %v747_v2, %v746_v62  ;;  %v764_v4 = vadd.f32 %v763_v26, %v762_v17  ;;  %v772_v47 = vsel %vm221_vm14, %v3936_v14, 0.0  ;;  %v780_v32 = vsel %vm221_vm14, %v3946_v31, 0.0 }
 0x171   :  { %v4050_v33 = vadd.f32 %v508_v25, %v507_v51  ;;  %v732_v0 = vadd.f32 %v731_v63, %v730_v8  ;;  %v740_v34 = vrot.slane %v739_v21, 2  ;;  %v757_v44 = vadd.f32 %v756_v46, %v755_v58 }
 0x172   :  { %v749_v19 = vrot.slane %v748_v24, 2  ;;  %v765_v50 = vrot.slane %v764_v4, 4  ;;  %v773_v6 = vadd.f32 %v772_v47, %v771_v42  ;;  %v781_v28 = vsel %vm221_vm14, %v3955_v20, 0.0 }
 0x173   :  { %5192 = vst [vmem:[#allocation20_spill] sm:$0xff] %v4050_v33  ;;  %v733_v38 = vrot.slane %v732_v0, 1  ;;  %v741_v62 = vadd.f32 %v740_v34, %v739_v21  ;;  %v758_v2 = vrot.slane %v757_v44, 2  ;;  %v782_v17 = vadd.f32 %v781_v28, %v780_v32 }
 0x174   :  { %v750_v26 = vadd.f32 %v749_v19, %v748_v24  ;;  %v766_v3 = vadd.f32 %v765_v50, %v764_v4  ;;  %v774_v59 = vrot.slane %v773_v6, 4  ;;  %v789_v51 = vsel %vm221_vm14, %v3964_v36, 0.0 }
 0x175   :  { %v4056_v25 = vadd.f32 %v733_v38, %v732_v0  ;;  %v742_v8 = vrot.slane %v741_v62, 1  ;;  %v759_v58 = vadd.f32 %v758_v2, %v757_v44  ;;  %v783_v63 = vrot.slane %v782_v17, 4 }
 0x176   :  { %v751_v46 = vrot.slane %v750_v26, 1  ;;  %v767_v42 = vrot.slane %v766_v3, 2  ;;  %v775_v47 = vadd.f32 %v774_v59, %v773_v6  ;;  %v790_v33 = vsel %vm221_vm14, %v3974_v12, 0.0 }
 0x177   :  { %v4060_v21 = vadd.f32 %v742_v8, %v741_v62  ;;  %v760_v32 = vrot.slane %v759_v58, 1  ;;  %v784_v19 = vadd.f32 %v783_v63, %v782_v17  ;;  %v791_v50 = vadd.f32 %v790_v33, %v789_v51 }
 0x178   :  { %v4062_v24 = vadd.f32 %v751_v46, %v750_v26  ;;  %v768_v4 = vadd.f32 %v767_v42, %v766_v3  ;;  %v776_v34 = vrot.slane %v775_v47, 2  ;;  %v846_v0 = vmul.f32 %v3830_v37, %v3834_v35 }
 0x179   :  { %v4066_v44 = vadd.f32 %v760_v32, %v759_v58  ;;  %v785_v28 = vrot.slane %v784_v19, 2  ;;  %v792_v38 = vrot.slane %v791_v50, 4  ;;  %v847_v59 = vmul.f32 %v3839_v40, %v3843_v1 }
 0x17a   :  { %v769_v6 = vrot.slane %v768_v4, 1  ;;  %v777_v62 = vadd.f32 %v776_v34, %v775_v47  ;;  %v848_v2 = vmul.f32 %v3848_v5, %v3852_v30  ;;  %v849_v33 = vmul.f32 %v3858_v60, %v3862_v55 }
 0x17b   :  { %v786_v3 = vadd.f32 %v785_v28, %v784_v19  ;;  %v793_v17 = vadd.f32 %v792_v38, %v791_v50  ;;  %v850_v37 = vmul.f32 %v3867_v48, %v3871_v57  ;;  %v851_v35 = vmul.f32 %v3876_v39, %v3880_v53 }
 0x17c   :  { %v4078_v26 = vadd.f32 %v769_v6, %v768_v4  ;;  %v778_v51 = vrot.slane %v777_v62, 1  ;;  %v852_v40 = vmul.f32 %v3886_v49, %v3890_v22  ;;  %v853_v1 = vmul.f32 %v3895_v10, %v3899_v15 }
 0x17d   :  { %v787_v5 = vrot.slane %v786_v3, 1  ;;  %v794_v30 = vrot.slane %v793_v17, 2  ;;  %v854_v60 = vmul.f32 %v3904_v18, %v3908_v61  ;;  %v855_v55 = vmul.f32 %v3914_v41, %v3918_v9 }
 0x17e   :  { %v4088_v48 = vadd.f32 %v778_v51, %v777_v62  ;;  %v856_v57 = vmul.f32 %v3923_v54, %v3927_v13  ;;  %v857_v39 = vmul.f32 %v3932_v56, %v3936_v14  ;;  %v858_v53 = vmul.f32 %v3942_v52, %v3946_v31 }
 0x17f   :  { %v4096_v49 = vadd.f32 %v787_v5, %v786_v3  ;;  %v795_v22 = vadd.f32 %v794_v30, %v793_v17  ;;  %v859_v10 = vmul.f32 %v3951_v27, %v3955_v20  ;;  %v860_v15 = vmul.f32 %v3960_v43, %v3964_v36 }
 0x180   :  { %v861_v18 = vmul.f32 %v3970_v45, %v3974_v12  ;;  %v1078_v61 = vsel %vm221_vm14, %v846_v0, 0.0  ;;  %v1079_v41 = vsel %vm221_vm14, %v847_v59, 0.0  ;;  %v1087_v9 = vsel %vm221_vm14, %v848_v2, 0.0 }
 0x181   :  { %v796_v54 = vrot.slane %v795_v22, 1  ;;  %v1080_v13 = vadd.f32 %v1079_v41, %v1078_v61  ;;  %v1088_v56 = vsel %vm221_vm14, %v849_v33, 0.0  ;;  %v1096_v14 = vsel %vm221_vm14, %v850_v37, 0.0 }
 0x182   :  { %v1089_v52 = vadd.f32 %v1088_v56, %v1087_v9  ;;  %v1097_v31 = vsel %vm221_vm14, %v851_v35, 0.0  ;;  %v1105_v27 = vsel %vm221_vm14, %v852_v40, 0.0  ;;  %v1106_v20 = vsel %vm221_vm14, %v853_v1, 0.0 }
 0x183   :  { %v4112_v43 = vadd.f32 %v796_v54, %v795_v22  ;;  %v1081_v36 = vrot.slane %v1080_v13, 4  ;;  %v1098_v45 = vadd.f32 %v1097_v31, %v1096_v14  ;;  %v1107_v12 = vadd.f32 %v1106_v20, %v1105_v27 }
 0x184   :  { %v1090_v8 = vrot.slane %v1089_v52, 4  ;;  %v1114_v58 = vsel %vm221_vm14, %v854_v60, 0.0  ;;  %v1115_v63 = vsel %vm221_vm14, %v855_v55, 0.0  ;;  %v1123_v46 = vsel %vm221_vm14, %v856_v57, 0.0 }
 0x185   :  { %v1082_v42 = vadd.f32 %v1081_v36, %v1080_v13  ;;  %v1099_v47 = vrot.slane %v1098_v45, 4  ;;  %v1108_v32 = vrot.slane %v1107_v12, 4  ;;  %v1116_v19 = vadd.f32 %v1115_v63, %v1114_v58 }
 0x186   :  { %v1091_v50 = vadd.f32 %v1090_v8, %v1089_v52  ;;  %v1124_v4 = vsel %vm221_vm14, %v857_v39, 0.0  ;;  %v1132_v34 = vsel %vm221_vm14, %v858_v53, 0.0  ;;  %v1133_v0 = vsel %vm221_vm14, %v859_v10, 0.0 }
 0x187   :  { %v1083_v28 = vrot.slane %v1082_v42, 2  ;;  %v1100_v38 = vadd.f32 %v1099_v47, %v1098_v45  ;;  %v1109_v59 = vadd.f32 %v1108_v32, %v1107_v12  ;;  %v1117_v6 = vrot.slane %v1116_v19, 4 }
 0x188   :  { %v1092_v62 = vrot.slane %v1091_v50, 2  ;;  %v1125_v2 = vadd.f32 %v1124_v4, %v1123_v46  ;;  %v1134_v33 = vadd.f32 %v1133_v0, %v1132_v34  ;;  %v1141_v3 = vsel %vm221_vm14, %v860_v15, 0.0  ;;  %v5201_v4 = vld [vmem:[#allocation19_spill] sm:$0xff] }
 0x189   :  { %v1084_v17 = vadd.f32 %v1083_v28, %v1082_v42  ;;  %v1101_v37 = vrot.slane %v1100_v38, 2  ;;  %v1110_v35 = vrot.slane %v1109_v59, 2  ;;  %v1118_v51 = vadd.f32 %v1117_v6, %v1116_v19  ;;  %v5197_v42 = vld [vmem:[#allocation9_spill] sm:$0xff] }
 0x18a   :  { %v1093_v40 = vadd.f32 %v1092_v62, %v1091_v50  ;;  %v1126_v1 = vrot.slane %v1125_v2, 4  ;;  %v1135_v5 = vrot.slane %v1134_v33, 4  ;;  %v1142_v30 = vsel %vm221_vm14, %v861_v18, 0.0  ;;  %v5199_v50 = vld [vmem:[#allocation11_spill] sm:$0xff] }
 0x18b   :  { %v1085_v60 = vrot.slane %v1084_v17, 1  ;;  %v1102_v55 = vadd.f32 %v1101_v37, %v1100_v38  ;;  %v1111_v57 = vadd.f32 %v1110_v35, %v1109_v59  ;;  %v1119_v39 = vrot.slane %v1118_v51, 2 }
 0x18c   :  { %v1094_v53 = vrot.slane %v1093_v40, 1  ;;  %v1127_v22 = vadd.f32 %v1126_v1, %v1125_v2  ;;  %v1136_v10 = vadd.f32 %v1135_v5, %v1134_v33  ;;  %v1143_v61 = vadd.f32 %v1142_v30, %v1141_v3 }
 0x18d   :  { %v1086_v41 = vadd.f32 %v1085_v60, %v1084_v17  ;;  %v1103_v9 = vrot.slane %v1102_v55, 1  ;;  %v1112_v15 = vrot.slane %v1111_v57, 1  ;;  %v1120_v54 = vadd.f32 %v1119_v39, %v1118_v51 }
 0x18e   :  { %v1095_v13 = vadd.f32 %v1094_v53, %v1093_v40  ;;  %v1128_v56 = vrot.slane %v1127_v22, 2  ;;  %v1137_v14 = vrot.slane %v1136_v10, 2  ;;  %v1144_v52 = vrot.slane %v1143_v61, 4 }
 0x18f   :  { %v1104_v31 = vadd.f32 %v1103_v9, %v1102_v55  ;;  %v1113_v27 = vadd.f32 %v1112_v15, %v1111_v57  ;;  %v1121_v20 = vrot.slane %v1120_v54, 1  ;;  %v4124_v18 = vmul.f32 %v3752_v16, %v4010_v7 }
 0x190   :  { %v1129_v36 = vadd.f32 %v1128_v56, %v1127_v22  ;;  %v1138_v45 = vadd.f32 %v1137_v14, %v1136_v10  ;;  %v1145_v12 = vadd.f32 %v1144_v52, %v1143_v61  ;;  %v4128_v8 = vmul.f32 %v3752_v16, %v4012_v23 }
 0x191   :  { %5193 = vst [vmem:[#allocation21_spill] sm:$0xff] %v4124_v18  ;;  %v1122_v58 = vadd.f32 %v1121_v20, %v1120_v54  ;;  %v4132_v63 = vmul.f32 %v3752_v16, %v4014_v11  ;;  %v4136_v46 = vmul.f32 %v3752_v16, %v4018_v29  ;;  %v4140_v7 = vmul.f32 %v3752_v16, %v5197_v42  ;;  %v5203_v11 = vld [vmem:[#allocation20_spill] sm:$0xff] }
 0x192   :  { %5194 = vst [vmem:[#allocation22_spill] sm:$0xff] %v4128_v8  ;;  %v1130_v47 = vrot.slane %v1129_v36, 1  ;;  %v1139_v32 = vrot.slane %v1138_v45, 1  ;;  %v1146_v19 = vrot.slane %v1145_v12, 2  ;;  %v4144_v23 = vmul.f32 %v3752_v16, %v5199_v50  ;;  %v4197_v50 = vld [vmem:[%s5114_s0 + $0x80] sm:$0xff] }
 0x193   :  { %5195 = vst [vmem:[#allocation23_spill] sm:$0xff] %v4132_v63  ;;  %v4148_v34 = vmul.f32 %v3752_v16, %v5201_v4  ;;  %v4152_v0 = vmul.f32 %v3752_v16, %v5203_v11  ;;  %v1940_v29 = vmul.f32 2.0, %v4124_v18  ;;  %v1941_v28 = vmul.f32 2.0, %v4128_v8 }
 0x194   :  { %5196 = vst [vmem:[#allocation24_spill] sm:$0xff] %v4136_v46  ;;  %v1131_v38 = vadd.f32 %v1130_v47, %v1129_v36  ;;  %v1140_v59 = vadd.f32 %v1139_v32, %v1138_v45  ;;  %v1147_v6 = vadd.f32 %v1146_v19, %v1145_v12  ;;  %v1942_v62 = vmul.f32 2.0, %v4132_v63 }
 0x195   :  { %5198 = vst [vmem:[#allocation9_spill] sm:$0xff] %v4140_v7  ;;  %v1943_v2 = vmul.f32 2.0, %v4136_v46  ;;  %v1944_v33 = vmul.f32 2.0, %v4140_v7  ;;  %v1945_v3 = vmul.f32 2.0, %v4144_v23  ;;  %v1946_v17 = vmul.f32 2.0, %v4148_v34 }
 0x196   :  { %5200 = vst [vmem:[#allocation11_spill] sm:$0xff] %v4144_v23  ;;  %v1148_v37 = vrot.slane %v1147_v6, 1  ;;  %v1947_v35 = vmul.f32 2.0, %v4152_v0  ;;  %v1972_v51 = vmul.f32 %v1940_v29, %v4056_v25  ;;  %v1973_v40 = vmul.f32 %v1941_v28, %v4060_v21  ;;  %v4206_v28 = vld [vmem:[%s5114_s0 + $0x88] sm:$0xff] }
 0x197   :  { %5202 = vst [vmem:[#allocation19_spill] sm:$0xff] %v4148_v34  ;;  %v1974_v1 = vmul.f32 %v1942_v62, %v4062_v24  ;;  %v1975_v5 = vmul.f32 %v1943_v2, %v4066_v44  ;;  %v1976_v30 = vmul.f32 %v1944_v33, %v4078_v26  ;;  %v1977_v60 = vmul.f32 %v1945_v3, %v4088_v48  ;;  %v4222_v2 = vld [vmem:[%s5114_s0 + $0x98] sm:$0xff] }
 0x198   :  { %5204 = vst [vmem:[#allocation20_spill] sm:$0xff] %v4152_v0  ;;  %v1149_v55 = vadd.f32 %v1148_v37, %v1147_v6  ;;  %v1978_v57 = vmul.f32 %v1946_v17, %v4096_v49  ;;  %v1979_v39 = vmul.f32 %v1947_v35, %v4112_v43  ;;  %v2004_v53 = vsub.f32 %v1086_v41, %v1972_v51  ;;  %v4214_v6 = vld [vmem:[%s5114_s0 + $0x90] sm:$0xff]  ;;  %v4231_v17 = vld [vmem:[%s5114_s0 + $0xa0] sm:$0xff]  ;;  %v4239_v35 = vld [vmem:[%s5114_s0 + $0xa8] sm:$0xff] }
 0x199   :  { %v2005_v22 = vsub.f32 %v1095_v13, %v1973_v40  ;;  %v2006_v10 = vsub.f32 %v1104_v31, %v1974_v1  ;;  %v2007_v61 = vsub.f32 %v1113_v27, %v1975_v5  ;;  %v2008_v25 = vsub.f32 %v1122_v58, %v1976_v30  ;;  %v4247_v40 = vld [vmem:[%s5114_s0 + $0xb0] sm:$0xff]  ;;  %v4256_v30 = vld [vmem:[%s5114_s0 + $0xb8] sm:$0xff] }
 0x19a   :  { %v2009_v9 = vsub.f32 %v1131_v38, %v1977_v60  ;;  %v2010_v21 = vsub.f32 %v1140_v59, %v1978_v57  ;;  %v2011_v15 = vsub.f32 %v1149_v55, %v1979_v39  ;;  %v2036_v24 = vmul.f32 %v2004_v53, %v3752_v16  ;;  %v4264_v55 = vld [vmem:[%s5114_s0 + $0xc0] sm:$0xff]  ;;  %v4272_v39 = vld [vmem:[%s5114_s0 + $0xc8] sm:$0xff] }
 0x19b   :  { %v2037_v44 = vmul.f32 %v2005_v22, %v3752_v16  ;;  %v2038_v26 = vmul.f32 %v2006_v10, %v3752_v16  ;;  %v2039_v48 = vmul.f32 %v2007_v61, %v3752_v16  ;;  %v2040_v49 = vmul.f32 %v2008_v25, %v3752_v16  ;;  %v4281_v10 = vld [vmem:[%s5114_s0 + $0xd0] sm:$0xff]  ;;  %v4289_v25 = vld [vmem:[%s5114_s0 + $0xd8] sm:$0xff] }
 0x19c   :  { %v2041_v43 = vmul.f32 %v2009_v9, %v3752_v16  ;;  %v2042_v41 = vmul.f32 %v2010_v21, %v3752_v16  ;;  %v2043_v54 = vmul.f32 %v2011_v15, %v3752_v16  ;;  %v2068_v13 = vmul.f32 %v4124_v18, %v4124_v18  ;;  %v4297_v21 = vld [vmem:[%s5114_s0 + $0xe0] sm:$0xff] }
 0x19d   :  { %v2069_v56 = vmul.f32 %v4128_v8, %v4128_v8  ;;  %v2070_v14 = vmul.f32 %v4132_v63, %v4132_v63  ;;  %v2071_v52 = vmul.f32 %v4136_v46, %v4136_v46  ;;  %v2072_v31 = vmul.f32 %v4140_v7, %v4140_v7 }
 0x19e   :  { %v2073_v27 = vmul.f32 %v4144_v23, %v4144_v23  ;;  %v2074_v16 = vmul.f32 %v4148_v34, %v4148_v34  ;;  %v2075_v20 = vmul.f32 %v4152_v0, %v4152_v0  ;;  %v2100_v36 = vadd.f32 %v2068_v13, %v2036_v24 }
 0x19f   :  { %v2101_v45 = vadd.f32 %v2069_v56, %v2037_v44  ;;  %v2102_v12 = vadd.f32 %v2070_v14, %v2038_v26  ;;  %v2103_v58 = vadd.f32 %v2071_v52, %v2039_v48  ;;  %v2104_v42 = vadd.f32 %v2072_v31, %v2040_v49  ;;  %v4306_v44 = vld [vmem:[%s5114_s0 + $0xe8] sm:$0xff]  ;;  %v4314_v48 = vld [vmem:[%s5114_s0 + $0xf0] sm:$0xff] }
 0x1a0   :  { %v2105_v47 = vadd.f32 %v2073_v27, %v2041_v43  ;;  %v2106_v32 = vadd.f32 %v2074_v16, %v2042_v41  ;;  %v2107_v19 = vadd.f32 %v2075_v20, %v2043_v54  ;;  %v1580_v11 = vsel %vm1208_vm7, %v4197_v50, -inf  ;;  %v4322_v43 = vld [vmem:[%s5114_s0 + $0xf8] sm:$0xff] }
 0x1a1   :  { %v2376_v29 = vsel %vm2140_vm0, %v2101_v45, %v2100_v36  ;;  %v1581_v59 = vsel %vm1209_vm8, %v4206_v28, -inf  ;;  %v1582_v62 = vsel %vm1208_vm7, %v4214_v6, -inf  ;;  %v1583_v33 = vsel %vm1209_vm8, %v4222_v2, -inf }
 0x1a2   :  { %v2377_v3 = vsel %vm2142_vm1, %v2102_v12, %v2376_v29  ;;  %v1584_v37 = vsel %vm1208_vm7, %v4231_v17, -inf  ;;  %v1585_v51 = vsel %vm1209_vm8, %v4239_v35, -inf  ;;  %v1586_v1 = vsel %vm1208_vm7, %v4247_v40, -inf }
 0x1a3   :  { %v2378_v5 = vsel %vm2144_vm2, %v2103_v58, %v2377_v3  ;;  %v1587_v60 = vsel %vm1209_vm8, %v4256_v30, -inf  ;;  %v1588_v57 = vsel %vm1208_vm7, %v4264_v55, -inf  ;;  %v1589_v53 = vsel %vm1209_vm8, %v4272_v39, -inf }
 0x1a4   :  { %v2379_v22 = vsel %vm2146_vm3, %v2104_v42, %v2378_v5  ;;  %v1590_v61 = vsel %vm1208_vm7, %v4281_v10, -inf  ;;  %v1591_v9 = vsel %vm1209_vm8, %v4289_v25, -inf  ;;  %v1592_v15 = vsel %vm1208_vm7, %v4297_v21, -inf }
 0x1a5   :  { %v2380_v24 = vsel %vm2148_vm4, %v2105_v47, %v2379_v22  ;;  %v1593_v26 = vsel %vm1209_vm8, %v4306_v44, -inf  ;;  %v1594_v49 = vsel %vm1208_vm7, %v4314_v48, -inf  ;;  %v1595_v41 = vsel %vm1209_vm8, %v4322_v43, -inf }
 0x1a6   :  { %v2381_v54 = vsel %vm2150_vm5, %v2106_v32, %v2380_v24  ;;  %v1700_v13 = vsel %vm221_vm14, %v1580_v11, -inf  ;;  %v1701_v56 = vsel %vm221_vm14, %v1581_v59, -inf  ;;  %v1709_v14 = vsel %vm221_vm14, %v1582_v62, -inf }
 0x1a7   :  { %v2382_v52 = vsel %vm2152_vm6, %v2107_v19, %v2381_v54  ;;  %v1702_v31 = vmax.f32 %v1700_v13, %v1701_v56  ;;  %v1710_v27 = vsel %vm221_vm14, %v1583_v33, -inf  ;;  %v1718_v16 = vsel %vm221_vm14, %v1584_v37, -inf }
 0x1a8   :  { %2389 = vrot.lane.b32.xlu0 %v2382_v52, %s2604_s11  ;;  %v1711_v20 = vmax.f32 %v1709_v14, %v1710_v27  ;;  %v1719_v36 = vsel %vm221_vm14, %v1585_v51, -inf  ;;  %v1727_v45 = vsel %vm221_vm14, %v1586_v1, -inf  ;;  %v1728_v12 = vsel %vm221_vm14, %v1587_v60, -inf }
 0x1a9   :  { %v1703_v58 = vrot.slane %v1702_v31, 4  ;;  %v1720_v42 = vmax.f32 %v1718_v16, %v1719_v36  ;;  %v1729_v47 = vmax.f32 %v1727_v45, %v1728_v12  ;;  %v1736_v32 = vsel %vm221_vm14, %v1588_v57, -inf }
 0x1aa   :  { %v1712_v19 = vrot.slane %v1711_v20, 4  ;;  %v1737_v4 = vsel %vm221_vm14, %v1589_v53, -inf  ;;  %v1745_v11 = vsel %vm221_vm14, %v1590_v61, -inf  ;;  %v1746_v29 = vsel %vm221_vm14, %v1591_v9, -inf }
 0x1ab   :  { %v1704_v38 = vmax.f32 %v1702_v31, %v1703_v58  ;;  %v1721_v59 = vrot.slane %v1720_v42, 4  ;;  %v1730_v62 = vrot.slane %v1729_v47, 4  ;;  %v1738_v33 = vmax.f32 %v1736_v32, %v1737_v4 }
 0x1ac   :  { %v1713_v3 = vmax.f32 %v1711_v20, %v1712_v19  ;;  %v1747_v37 = vmax.f32 %v1745_v11, %v1746_v29  ;;  %v1754_v51 = vsel %vm221_vm14, %v1592_v15, -inf  ;;  %v1755_v1 = vsel %vm221_vm14, %v1593_v26, -inf }
 0x1ad   :  { %v1705_v5 = vrot.slane %v1704_v38, 2  ;;  %v1722_v60 = vmax.f32 %v1720_v42, %v1721_v59  ;;  %v1731_v57 = vmax.f32 %v1729_v47, %v1730_v62  ;;  %v1739_v22 = vrot.slane %v1738_v33, 4 }
 0x1ae   :  { %v1714_v24 = vrot.slane %v1713_v3, 2  ;;  %v1748_v53 = vrot.slane %v1747_v37, 4  ;;  %v1756_v54 = vmax.f32 %v1754_v51, %v1755_v1  ;;  %v1763_v61 = vsel %vm221_vm14, %v1594_v49, -inf }
 0x1af   :  { %v1706_v9 = vmax.f32 %v1704_v38, %v1705_v5  ;;  %v1723_v13 = vrot.slane %v1722_v60, 2  ;;  %v1732_v56 = vrot.slane %v1731_v57, 2  ;;  %v1740_v14 = vmax.f32 %v1738_v33, %v1739_v22  ;;  %v5208_v22 = vld [vmem:[#allocation12_spill] sm:$0xff] }
 0x1b0   :  { %v1715_v52 = vmax.f32 %v1713_v3, %v1714_v24  ;;  %v1749_v31 = vmax.f32 %v1747_v37, %v1748_v53  ;;  %v1757_v27 = vrot.slane %v1756_v54, 4  ;;  %v1764_v15 = vsel %vm221_vm14, %v1595_v41, -inf  ;;  %v5207_v41 = vld [vmem:[#allocation10_spill] sm:$0xff] }
 0x1b1   :  { %v1707_v16 = vrot.slane %v1706_v9, 1  ;;  %v1724_v26 = vmax.f32 %v1722_v60, %v1723_v13  ;;  %v1733_v20 = vmax.f32 %v1731_v57, %v1732_v56  ;;  %v1741_v36 = vrot.slane %v1740_v14, 2 }
 0x1b2   :  { %v1716_v45 = vrot.slane %v1715_v52, 1  ;;  %v1750_v12 = vrot.slane %v1749_v31, 2  ;;  %v1758_v58 = vmax.f32 %v1756_v54, %v1757_v27  ;;  %v1765_v42 = vmax.f32 %v1763_v61, %v1764_v15 }
 0x1b3   :  { %v1708_v47 = vmax.f32 %v1706_v9, %v1707_v16  ;;  %v1725_v32 = vrot.slane %v1724_v26, 1  ;;  %v1734_v49 = vrot.slane %v1733_v20, 1  ;;  %v1742_v19 = vmax.f32 %v1740_v14, %v1741_v36 }
 0x1b4   :  { %v1717_v4 = vmax.f32 %v1715_v52, %v1716_v45  ;;  %v1751_v11 = vmax.f32 %v1749_v31, %v1750_v12  ;;  %v1759_v29 = vrot.slane %v1758_v58, 2  ;;  %v1766_v38 = vrot.slane %v1765_v42, 4 }
 0x1b5   :  { %v1726_v59 = vmax.f32 %v1724_v26, %v1725_v32  ;;  %v1735_v62 = vmax.f32 %v1733_v20, %v1734_v49  ;;  %v1743_v33 = vrot.slane %v1742_v19, 1  ;;  %v4348_v3 = vmul.f32 %v4197_v50, %v5207_v41 }
 0x1b6   :  { %v1752_v37 = vrot.slane %v1751_v11, 1  ;;  %v1760_v51 = vmax.f32 %v1758_v58, %v1759_v29  ;;  %v1767_v1 = vmax.f32 %v1765_v42, %v1766_v38  ;;  %v2290_v5 = vsel %vm2140_vm0, %v1717_v4, %v1708_v47 }
 0x1b7   :  { %v1744_v60 = vmax.f32 %v1742_v19, %v1743_v33  ;;  %v2291_v57 = vsel %vm2142_vm1, %v1726_v59, %v2290_v5  ;;  %v4354_v24 = vmul.f32 %v4206_v28, %v5208_v22  ;;  %v4358_v53 = vmul.f32 %v4214_v6, %v5207_v41 }
 0x1b8   :  { %v1753_v54 = vmax.f32 %v1751_v11, %v1752_v37  ;;  %v1761_v61 = vrot.slane %v1760_v51, 1  ;;  %v1768_v9 = vrot.slane %v1767_v1, 2  ;;  %v2292_v13 = vsel %vm2144_vm2, %v1735_v62, %v2291_v57 }
 0x1b9   :  { %v2293_v56 = vsel %vm2146_vm3, %v1744_v60, %v2292_v13  ;;  %v4364_v14 = vmul.f32 %v4222_v2, %v5208_v22  ;;  %v4368_v52 = vmul.f32 %v4231_v17, %v5207_v41  ;;  %v4372_v31 = vmul.f32 %v4239_v35, %v5208_v22 }
 0x1ba   :  { %v1762_v27 = vmax.f32 %v1760_v51, %v1761_v61  ;;  %v1769_v15 = vmax.f32 %v1767_v1, %v1768_v9  ;;  %v2294_v16 = vsel %vm2148_vm4, %v1753_v54, %v2293_v56  ;;  %v4377_v26 = vmul.f32 %v4247_v40, %v5207_v41 }
 0x1bb   :  { %v4381_v20 = vmul.f32 %v4256_v30, %v5208_v22  ;;  %v4385_v36 = vmul.f32 %v4264_v55, %v5207_v41  ;;  %v4389_v45 = vmul.f32 %v4272_v39, %v5208_v22  ;;  %v4393_v12 = vmul.f32 %v4281_v10, %v5207_v41 }
 0x1bc   :  { %v1770_v58 = vrot.slane %v1769_v15, 1  ;;  %v2295_v42 = vsel %vm2150_vm5, %v1762_v27, %v2294_v16  ;;  %v4398_v47 = vmul.f32 %v4289_v25, %v5208_v22  ;;  %v4402_v32 = vmul.f32 %v4297_v21, %v5207_v41 }
 0x1bd   :  { %v4406_v49 = vmul.f32 %v4306_v44, %v5208_v22  ;;  %v4410_v19 = vmul.f32 %v4314_v48, %v5207_v41  ;;  %v4414_v4 = vmul.f32 %v4322_v43, %v5208_v22  ;;  %v294_v11 = vsel %vm221_vm14, %v4197_v50, 0.0 }
 0x1be   :  { %v1771_v29 = vmax.f32 %v1769_v15, %v1770_v58  ;;  %v295_v38 = vsel %vm221_vm14, %v4206_v28, 0.0  ;;  %v303_v59 = vsel %vm221_vm14, %v4214_v6, 0.0  ;;  %v304_v62 = vsel %vm221_vm14, %v4222_v2, 0.0 }
 0x1bf   :  { %v296_v33 = vadd.f32 %v295_v38, %v294_v11  ;;  %v305_v37 = vadd.f32 %v304_v62, %v303_v59  ;;  %v312_v51 = vsel %vm221_vm14, %v4231_v17, 0.0  ;;  %v313_v1 = vsel %vm221_vm14, %v4239_v35, 0.0 }
 0x1c0   :  { %v2296_v5 = vsel %vm2152_vm6, %v1771_v29, %v2295_v42  ;;  %v314_v60 = vadd.f32 %v313_v1, %v312_v51  ;;  %v321_v57 = vsel %vm221_vm14, %v4247_v40, 0.0  ;;  %v322_v54 = vsel %vm221_vm14, %v4256_v30, 0.0 }
 0x1c1   :  { %2313 = vrot.lane.b32.xlu1 %v2296_v5, %s2603_s7  ;;  %v297_v61 = vrot.slane %v296_v33, 4  ;;  %v306_v9 = vrot.slane %v305_v37, 4  ;;  %v323_v13 = vadd.f32 %v322_v54, %v321_v57  ;;  %v330_v56 = vsel %vm221_vm14, %v4264_v55, 0.0 }
 0x1c2   :  { %v315_v27 = vrot.slane %v314_v60, 4  ;;  %v331_v15 = vsel %vm221_vm14, %v4272_v39, 0.0  ;;  %v339_v16 = vsel %vm221_vm14, %v4281_v10, 0.0  ;;  %v340_v58 = vsel %vm221_vm14, %v4289_v25, 0.0 }
 0x1c3   :  { %v298_v42 = vadd.f32 %v297_v61, %v296_v33  ;;  %v307_v11 = vadd.f32 %v306_v9, %v305_v37  ;;  %v324_v29 = vrot.slane %v323_v13, 4  ;;  %v332_v38 = vadd.f32 %v331_v15, %v330_v56 }
 0x1c4   :  { %v316_v59 = vadd.f32 %v315_v27, %v314_v60  ;;  %v341_v62 = vadd.f32 %v340_v58, %v339_v16  ;;  %v348_v51 = vsel %vm221_vm14, %v4297_v21, 0.0  ;;  %v349_v1 = vsel %vm221_vm14, %v4306_v44, 0.0 }
 0x1c5   :  { %v299_v5 = vrot.slane %v298_v42, 2  ;;  %v308_v57 = vrot.slane %v307_v11, 2  ;;  %v325_v54 = vadd.f32 %v324_v29, %v323_v13  ;;  %v333_v0 = vrot.slane %v332_v38, 4 }
 0x1c6   :  { %v317_v34 = vrot.slane %v316_v59, 2  ;;  %v342_v23 = vrot.slane %v341_v62, 4  ;;  %v350_v7 = vadd.f32 %v349_v1, %v348_v51  ;;  %v357_v33 = vsel %vm221_vm14, %v4314_v48, 0.0 }
 0x1c7   :  { %v300_v37 = vadd.f32 %v299_v5, %v298_v42  ;;  %v309_v61 = vadd.f32 %v308_v57, %v307_v11  ;;  %v326_v60 = vrot.slane %v325_v54, 2  ;;  %v334_v9 = vadd.f32 %v333_v0, %v332_v38 }
 0x1c8   :  { %v318_v56 = vadd.f32 %v317_v34, %v316_v59  ;;  %v343_v27 = vadd.f32 %v342_v23, %v341_v62  ;;  %v351_v15 = vrot.slane %v350_v7, 4  ;;  %v358_v16 = vsel %vm221_vm14, %v4322_v43, 0.0 }
 0x1c9   :  { %v301_v58 = vrot.slane %v300_v37, 1  ;;  %v310_v46 = vrot.slane %v309_v61, 1  ;;  %v327_v13 = vadd.f32 %v326_v60, %v325_v54  ;;  %v335_v29 = vrot.slane %v334_v9, 2 }
 0x1ca   :  { %v319_v63 = vrot.slane %v318_v56, 1  ;;  %v344_v8 = vrot.slane %v343_v27, 2  ;;  %v352_v51 = vadd.f32 %v351_v15, %v350_v7  ;;  %v359_v1 = vadd.f32 %v358_v16, %v357_v33 }
 0x1cb   :  { %v4450_v18 = vadd.f32 %v301_v58, %v300_v37  ;;  %v4452_v42 = vadd.f32 %v310_v46, %v309_v61  ;;  %v328_v11 = vrot.slane %v327_v13, 1  ;;  %v336_v0 = vadd.f32 %v335_v29, %v334_v9 }
 0x1cc   :  { %v4454_v34 = vadd.f32 %v319_v63, %v318_v56  ;;  %v345_v23 = vadd.f32 %v344_v8, %v343_v27  ;;  %v353_v38 = vrot.slane %v352_v51, 2  ;;  %v360_v59 = vrot.slane %v359_v1, 4 }
 0x1cd   :  { %v4456_v62 = vadd.f32 %v328_v11, %v327_v13  ;;  %v337_v5 = vrot.slane %v336_v0, 1  ;;  %v582_v57 = vsel %vm221_vm14, %v4348_v3, 0.0  ;;  %v583_v7 = vsel %vm221_vm14, %v4354_v24, 0.0 }
 0x1ce   :  { %v346_v54 = vrot.slane %v345_v23, 1  ;;  %v354_v33 = vadd.f32 %v353_v38, %v352_v51  ;;  %v361_v46 = vadd.f32 %v360_v59, %v359_v1  ;;  %v584_v37 = vadd.f32 %v583_v7, %v582_v57 }
 0x1cf   :  { %v4462_v61 = vadd.f32 %v337_v5, %v336_v0  ;;  %v591_v8 = vsel %vm221_vm14, %v4358_v53, 0.0  ;;  %v592_v63 = vsel %vm221_vm14, %v4364_v14, 0.0  ;;  %v600_v60 = vsel %vm221_vm14, %v4368_v52, 0.0 }
 0x1d0   :  { %v4470_v9 = vadd.f32 %v346_v54, %v345_v23  ;;  %v355_v56 = vrot.slane %v354_v33, 1  ;;  %v362_v27 = vrot.slane %v361_v46, 2  ;;  %v585_v15 = vrot.slane %v584_v37, 4 }
 0x1d1   :  { %v593_v16 = vadd.f32 %v592_v63, %v591_v8  ;;  %v601_v58 = vsel %vm221_vm14, %v4372_v31, 0.0  ;;  %v609_v13 = vsel %vm221_vm14, %v4377_v26, 0.0  ;;  %v610_v29 = vsel %vm221_vm14, %v4381_v20, 0.0 }
 0x1d2   :  { %5209 = vst [vmem:[#allocation5_spill] sm:$0xff] %v4470_v9  ;;  %v4478_v51 = vadd.f32 %v355_v56, %v354_v33  ;;  %v363_v1 = vadd.f32 %v362_v27, %v361_v46  ;;  %v586_v11 = vadd.f32 %v585_v15, %v584_v37  ;;  %v602_v0 = vadd.f32 %v601_v58, %v600_v60 }
 0x1d3   :  { %v594_v23 = vrot.slane %v593_v16, 4  ;;  %v611_v38 = vadd.f32 %v610_v29, %v609_v13  ;;  %v618_v59 = vsel %vm221_vm14, %v4385_v36, 0.0  ;;  %v619_v5 = vsel %vm221_vm14, %v4389_v45, 0.0 }
 0x1d4   :  { %5210 = vst [vmem:[#allocation7_spill] sm:$0xff] %v4478_v51  ;;  %v364_v57 = vrot.slane %v363_v1, 1  ;;  %v587_v7 = vrot.slane %v586_v11, 2  ;;  %v603_v54 = vrot.slane %v602_v0, 4  ;;  %v620_v8 = vadd.f32 %v619_v5, %v618_v59 }
 0x1d5   :  { %v595_v63 = vadd.f32 %v594_v23, %v593_v16  ;;  %v612_v22 = vrot.slane %v611_v38, 4  ;;  %v627_v33 = vsel %vm221_vm14, %v4393_v12, 0.0  ;;  %v628_v46 = vsel %vm221_vm14, %v4398_v47, 0.0 }
 0x1d6   :  { %v4488_v37 = vadd.f32 %v364_v57, %v363_v1  ;;  %v588_v60 = vadd.f32 %v587_v7, %v586_v11  ;;  %v604_v56 = vadd.f32 %v603_v54, %v602_v0  ;;  %v621_v27 = vrot.slane %v620_v8, 4 }
 0x1d7   :  { %v596_v15 = vrot.slane %v595_v63, 2  ;;  %v613_v58 = vadd.f32 %v612_v22, %v611_v38  ;;  %v629_v13 = vadd.f32 %v628_v46, %v627_v33  ;;  %v636_v29 = vsel %vm221_vm14, %v4402_v32, 0.0 }
 0x1d8   :  { %v589_v59 = vrot.slane %v588_v60, 1  ;;  %v605_v16 = vrot.slane %v604_v56, 2  ;;  %v622_v23 = vadd.f32 %v621_v27, %v620_v8  ;;  %v637_v5 = vsel %vm221_vm14, %v4406_v49, 0.0 }
 0x1d9   :  { %v597_v41 = vadd.f32 %v596_v15, %v595_v63  ;;  %v614_v51 = vrot.slane %v613_v58, 2  ;;  %v630_v9 = vrot.slane %v629_v13, 4  ;;  %v638_v1 = vadd.f32 %v637_v5, %v636_v29 }
 0x1da   :  { %v4494_v57 = vadd.f32 %v589_v59, %v588_v60  ;;  %v606_v11 = vadd.f32 %v605_v16, %v604_v56  ;;  %v623_v0 = vrot.slane %v622_v23, 2  ;;  %v645_v22 = vsel %vm221_vm14, %v4410_v19, 0.0 }
 0x1db   :  { %v598_v38 = vrot.slane %v597_v41, 1  ;;  %v615_v7 = vadd.f32 %v614_v51, %v613_v58  ;;  %v631_v54 = vadd.f32 %v630_v9, %v629_v13  ;;  %v639_v33 = vrot.slane %v638_v1, 4 }
 0x1dc   :  { %v607_v46 = vrot.slane %v606_v11, 1  ;;  %v624_v8 = vadd.f32 %v623_v0, %v622_v23  ;;  %v646_v27 = vsel %vm221_vm14, %v4414_v4, 0.0  ;;  %v814_v63 = vmul.f32 %v4197_v50, %v4348_v3 }
 0x1dd   :  { %v4502_v15 = vadd.f32 %v598_v38, %v597_v41  ;;  %v616_v60 = vrot.slane %v615_v7, 1  ;;  %v632_v56 = vrot.slane %v631_v54, 2  ;;  %v640_v29 = vadd.f32 %v639_v33, %v638_v1 }
 0x1de   :  { %v4504_v59 = vadd.f32 %v607_v46, %v606_v11  ;;  %v625_v16 = vrot.slane %v624_v8, 1  ;;  %v647_v5 = vadd.f32 %v646_v27, %v645_v22  ;;  %v815_v9 = vmul.f32 %v4206_v28, %v4354_v24 }
 0x1df   :  { %v4508_v51 = vadd.f32 %v616_v60, %v615_v7  ;;  %v633_v58 = vadd.f32 %v632_v56, %v631_v54  ;;  %v641_v13 = vrot.slane %v640_v29, 2  ;;  %v816_v23 = vmul.f32 %v4214_v6, %v4358_v53 }
 0x1e0   :  { %v4512_v50 = vadd.f32 %v625_v16, %v624_v8  ;;  %v648_v41 = vrot.slane %v647_v5, 4  ;;  %v817_v3 = vmul.f32 %v4222_v2, %v4364_v14  ;;  %v818_v1 = vmul.f32 %v4231_v17, %v4368_v52 }
 0x1e1   :  { %v634_v11 = vrot.slane %v633_v58, 1  ;;  %v642_v0 = vadd.f32 %v641_v13, %v640_v29  ;;  %v819_v28 = vmul.f32 %v4239_v35, %v4372_v31  ;;  %v820_v24 = vmul.f32 %v4247_v40, %v4377_v26 }
 0x1e2   :  { %v649_v22 = vadd.f32 %v648_v41, %v647_v5  ;;  %v821_v6 = vmul.f32 %v4256_v30, %v4381_v20  ;;  %v822_v53 = vmul.f32 %v4264_v55, %v4385_v36  ;;  %v823_v2 = vmul.f32 %v4272_v39, %v4389_v45 }
 0x1e3   :  { %v4528_v14 = vadd.f32 %v634_v11, %v633_v58  ;;  %v643_v17 = vrot.slane %v642_v0, 1  ;;  %v824_v52 = vmul.f32 %v4281_v10, %v4393_v12  ;;  %v825_v35 = vmul.f32 %v4289_v25, %v4398_v47 }
 0x1e4   :  { %v650_v40 = vrot.slane %v649_v22, 2  ;;  %v826_v31 = vmul.f32 %v4297_v21, %v4402_v32  ;;  %v827_v30 = vmul.f32 %v4306_v44, %v4406_v49  ;;  %v828_v55 = vmul.f32 %v4314_v48, %v4410_v19 }
 0x1e5   :  { %v4540_v39 = vadd.f32 %v643_v17, %v642_v0  ;;  %v829_v26 = vmul.f32 %v4322_v43, %v4414_v4  ;;  %v934_v10 = vsel %vm221_vm14, %v814_v63, 0.0  ;;  %v935_v20 = vsel %vm221_vm14, %v815_v9, 0.0 }
 0x1e6   :  { %v651_v25 = vadd.f32 %v650_v40, %v649_v22  ;;  %v936_v36 = vadd.f32 %v935_v20, %v934_v10  ;;  %v943_v45 = vsel %vm221_vm14, %v816_v23, 0.0  ;;  %v944_v21 = vsel %vm221_vm14, %v817_v3, 0.0  ;;  %v4561_v40 = vpop.permute.xlu0 %1152 }
 0x1e7   :  { %v945_v12 = vadd.f32 %v944_v21, %v943_v45  ;;  %v952_v44 = vsel %vm221_vm14, %v818_v1, 0.0  ;;  %v953_v48 = vsel %vm221_vm14, %v819_v28, 0.0  ;;  %v961_v47 = vsel %vm221_vm14, %v820_v24, 0.0 }
 0x1e8   :  { %v652_v32 = vrot.slane %v651_v25, 1  ;;  %v937_v49 = vrot.slane %v936_v36, 4  ;;  %v954_v43 = vadd.f32 %v953_v48, %v952_v44  ;;  %v962_v19 = vsel %vm221_vm14, %v821_v6, 0.0 }
 0x1e9   :  { %v946_v4 = vrot.slane %v945_v12, 4  ;;  %v963_v38 = vadd.f32 %v962_v19, %v961_v47  ;;  %v970_v7 = vsel %vm221_vm14, %v822_v53, 0.0  ;;  %v971_v54 = vsel %vm221_vm14, %v823_v2, 0.0 }
 0x1ea   :  { %v4554_v33 = vadd.f32 %v652_v32, %v651_v25  ;;  %v938_v46 = vadd.f32 %v937_v49, %v936_v36  ;;  %v955_v8 = vrot.slane %v954_v43, 4  ;;  %v972_v27 = vadd.f32 %v971_v54, %v970_v7 }
 0x1eb   :  { %v947_v63 = vadd.f32 %v946_v4, %v945_v12  ;;  %v964_v60 = vrot.slane %v963_v38, 4  ;;  %v979_v56 = vsel %vm221_vm14, %v824_v52, 0.0  ;;  %v980_v29 = vsel %vm221_vm14, %v825_v35, 0.0 }
 0x1ec   :  { %v939_v16 = vrot.slane %v938_v46, 2  ;;  %v956_v5 = vadd.f32 %v955_v8, %v954_v43  ;;  %v973_v9 = vrot.slane %v972_v27, 4  ;;  %v981_v58 = vadd.f32 %v980_v29, %v979_v56  ;;  %v5218_v29 = vld [vmem:[#allocation7_spill] sm:$0xff] }
 0x1ed   :  { %v948_v13 = vrot.slane %v947_v63, 2  ;;  %v965_v23 = vadd.f32 %v964_v60, %v963_v38  ;;  %v988_v41 = vsel %vm221_vm14, %v826_v31, 0.0  ;;  %v989_v3 = vsel %vm221_vm14, %v827_v30, 0.0  ;;  %v5216_v60 = vld [vmem:[#allocation5_spill] sm:$0xff] }
 0x1ee   :  { %v940_v1 = vadd.f32 %v939_v16, %v938_v46  ;;  %v957_v11 = vrot.slane %v956_v5, 2  ;;  %v974_v0 = vadd.f32 %v973_v9, %v972_v27  ;;  %v982_v28 = vrot.slane %v981_v58, 4 }
 0x1ef   :  { %v949_v24 = vadd.f32 %v948_v13, %v947_v63  ;;  %v966_v22 = vrot.slane %v965_v23, 2  ;;  %v990_v6 = vadd.f32 %v989_v3, %v988_v41  ;;  %v997_v53 = vsel %vm221_vm14, %v828_v55, 0.0 }
 0x1f0   :  { %v941_v2 = vrot.slane %v940_v1, 1  ;;  %v958_v17 = vadd.f32 %v957_v11, %v956_v5  ;;  %v975_v52 = vrot.slane %v974_v0, 2  ;;  %v983_v35 = vadd.f32 %v982_v28, %v981_v58 }
 0x1f1   :  { %v950_v10 = vrot.slane %v949_v24, 1  ;;  %v967_v20 = vadd.f32 %v966_v22, %v965_v23  ;;  %v991_v31 = vrot.slane %v990_v6, 4  ;;  %v998_v30 = vsel %vm221_vm14, %v829_v26, 0.0 }
 0x1f2   :  { %v942_v25 = vadd.f32 %v941_v2, %v940_v1  ;;  %v959_v36 = vrot.slane %v958_v17, 1  ;;  %v976_v45 = vadd.f32 %v975_v52, %v974_v0  ;;  %v984_v21 = vrot.slane %v983_v35, 2 }
 0x1f3   :  { %v951_v12 = vadd.f32 %v950_v10, %v949_v24  ;;  %v968_v44 = vrot.slane %v967_v20, 1  ;;  %v992_v48 = vadd.f32 %v991_v31, %v990_v6  ;;  %v999_v47 = vadd.f32 %v998_v30, %v997_v53 }
 0x1f4   :  { %v960_v55 = vadd.f32 %v959_v36, %v958_v17  ;;  %v977_v32 = vrot.slane %v976_v45, 1  ;;  %v985_v49 = vadd.f32 %v984_v21, %v983_v35  ;;  %v4566_v43 = vmul.f32 %v4561_v40, %v4450_v18 }
 0x1f5   :  { %v969_v19 = vadd.f32 %v968_v44, %v967_v20  ;;  %v993_v4 = vrot.slane %v992_v48, 2  ;;  %v1000_v38 = vrot.slane %v999_v47, 4  ;;  %v4570_v26 = vmul.f32 %v4561_v40, %v4452_v42 }
 0x1f6   :  { %5211 = vst [vmem:[#allocation25_spill] sm:$0xff] %v4566_v43  ;;  %v978_v7 = vadd.f32 %v977_v32, %v976_v45  ;;  %v986_v54 = vrot.slane %v985_v49, 1  ;;  %v4574_v46 = vmul.f32 %v4561_v40, %v4454_v34  ;;  %v4578_v8 = vmul.f32 %v4561_v40, %v4456_v62 }
 0x1f7   :  { %5212 = vst [vmem:[#allocation26_spill] sm:$0xff] %v4570_v26  ;;  %v994_v27 = vadd.f32 %v993_v4, %v992_v48  ;;  %v1001_v18 = vadd.f32 %v1000_v38, %v999_v47  ;;  %v4582_v63 = vmul.f32 %v4561_v40, %v4462_v61  ;;  %v4586_v42 = vmul.f32 %v4561_v40, %v5216_v60 }
 0x1f8   :  { %5213 = vst [vmem:[#allocation27_spill] sm:$0xff] %v4574_v46  ;;  %v987_v56 = vadd.f32 %v986_v54, %v985_v49  ;;  %v4590_v16 = vmul.f32 %v4561_v40, %v5218_v29  ;;  %v4594_v34 = vmul.f32 %v4561_v40, %v4488_v37  ;;  %v1924_v62 = vmul.f32 2.0, %v4566_v43 }
 0x1f9   :  { %5214 = vst [vmem:[#allocation28_spill] sm:$0xff] %v4578_v8  ;;  %v995_v5 = vrot.slane %v994_v27, 1  ;;  %v1002_v9 = vrot.slane %v1001_v18, 2  ;;  %v1925_v61 = vmul.f32 2.0, %v4570_v26  ;;  %v1926_v58 = vmul.f32 2.0, %v4574_v46 }
 0x1fa   :  { %5215 = vst [vmem:[#allocation29_spill] sm:$0xff] %v4582_v63  ;;  %v1927_v13 = vmul.f32 2.0, %v4578_v8  ;;  %v1928_v23 = vmul.f32 2.0, %v4582_v63  ;;  %v1929_v41 = vmul.f32 2.0, %v4586_v42  ;;  %v1930_v3 = vmul.f32 2.0, %v4590_v16 }
 0x1fb   :  { %5217 = vst [vmem:[#allocation5_spill] sm:$0xff] %v4586_v42  ;;  %v996_v1 = vadd.f32 %v995_v5, %v994_v27  ;;  %v1003_v11 = vadd.f32 %v1002_v9, %v1001_v18  ;;  %v1931_v37 = vmul.f32 2.0, %v4594_v34  ;;  %v1956_v0 = vmul.f32 %v1924_v62, %v4494_v57  ;;  %v4640_v62 = vld [vmem:[%s5114_s0] sm:$0xff]  ;;  %v5221_v5 = vld [vmem:[#allocation10_spill] sm:$0xff] }
 0x1fc   :  { %5219 = vst [vmem:[#allocation7_spill] sm:$0xff] %v4590_v16  ;;  %v1957_v28 = vmul.f32 %v1925_v61, %v4502_v15  ;;  %v1958_v24 = vmul.f32 %v1926_v58, %v4504_v59  ;;  %v1959_v22 = vmul.f32 %v1927_v13, %v4508_v51  ;;  %v1960_v6 = vmul.f32 %v1928_v23, %v4512_v50  ;;  %v4650_v58 = vld [vmem:[%s5114_s0 + $0x8] sm:$0xff]  ;;  %v5222_v13 = vld [vmem:[#allocation12_spill] sm:$0xff] }
 0x1fd   :  { %5220 = vst [vmem:[#allocation30_spill] sm:$0xff] %v4594_v34  ;;  %v1004_v53 = vrot.slane %v1003_v11, 1  ;;  %v1961_v2 = vmul.f32 %v1929_v41, %v4528_v14  ;;  %v1962_v17 = vmul.f32 %v1930_v3, %v4540_v39  ;;  %v1963_v52 = vmul.f32 %v1931_v37, %v4554_v33  ;;  %v4659_v41 = vld [vmem:[%s5114_s0 + $0x10] sm:$0xff] }
 0x1fe   :  { %v1988_v35 = vsub.f32 %v942_v25, %v1956_v0  ;;  %v1989_v10 = vsub.f32 %v951_v12, %v1957_v28  ;;  %v1990_v20 = vsub.f32 %v960_v55, %v1958_v24  ;;  %v1991_v31 = vsub.f32 %v969_v19, %v1959_v22  ;;  %v4678_v0 = vld [vmem:[%s5114_s0 + $0x20] sm:$0xff]  ;;  %v4687_v24 = vld [vmem:[%s5114_s0 + $0x28] sm:$0xff] }
 0x1ff   :  { %v1005_v57 = vadd.f32 %v1004_v53, %v1003_v11  ;;  %v1992_v30 = vsub.f32 %v978_v7, %v1960_v6  ;;  %v1993_v15 = vsub.f32 %v987_v56, %v1961_v2  ;;  %v1994_v36 = vsub.f32 %v996_v1, %v1962_v17  ;;  %v4668_v1 = vld [vmem:[%s5114_s0 + $0x18] sm:$0xff]  ;;  %v4696_v6 = vld [vmem:[%s5114_s0 + $0x30] sm:$0xff] }
 0x200   :  { %v2020_v59 = vmul.f32 %v1988_v35, %v4561_v40  ;;  %v2021_v51 = vmul.f32 %v1989_v10, %v4561_v40  ;;  %v2022_v50 = vmul.f32 %v1990_v20, %v4561_v40  ;;  %v2023_v14 = vmul.f32 %v1991_v31, %v4561_v40  ;;  %v4706_v17 = vld [vmem:[%s5114_s0 + $0x38] sm:$0xff]  ;;  %v4715_v35 = vld [vmem:[%s5114_s0 + $0x40] sm:$0xff]  ;;  %v4724_v20 = vld [vmem:[%s5114_s0 + $0x48] sm:$0xff] }
 0x201   :  { %v1995_v45 = vsub.f32 %v1005_v57, %v1963_v52  ;;  %v2024_v39 = vmul.f32 %v1992_v30, %v4561_v40  ;;  %v2025_v33 = vmul.f32 %v1993_v15, %v4561_v40  ;;  %v2026_v25 = vmul.f32 %v1994_v36, %v4561_v40  ;;  %v4734_v30 = vld [vmem:[%s5114_s0 + $0x50] sm:$0xff]  ;;  %v4743_v36 = vld [vmem:[%s5114_s0 + $0x58] sm:$0xff] }
 0x202   :  { %v2052_v21 = vmul.f32 %v4566_v43, %v4566_v43  ;;  %v2053_v12 = vmul.f32 %v4570_v26, %v4570_v26  ;;  %v2054_v44 = vmul.f32 %v4574_v46, %v4574_v46  ;;  %v2055_v48 = vmul.f32 %v4578_v8, %v4578_v8 }
 0x203   :  { %v2027_v47 = vmul.f32 %v1995_v45, %v4561_v40  ;;  %v2056_v55 = vmul.f32 %v4582_v63, %v4582_v63  ;;  %v2057_v32 = vmul.f32 %v4586_v42, %v4586_v42  ;;  %v2058_v49 = vmul.f32 %v4590_v16, %v4590_v16  ;;  %v4762_v45 = vld [vmem:[%s5114_s0 + $0x68] sm:$0xff]  ;;  %v4812_v16 = vld [vmem:[%s5114_s0 + $0x78] sm:$0xff] }
 0x204   :  { %v2059_v19 = vmul.f32 %v4594_v34, %v4594_v34  ;;  %v2084_v4 = vadd.f32 %v2052_v21, %v2020_v59  ;;  %v2085_v38 = vadd.f32 %v2053_v12, %v2021_v51  ;;  %v2086_v7 = vadd.f32 %v2054_v44, %v2022_v50  ;;  %v4752_v51 = vld [vmem:[%s5114_s0 + $0x60] sm:$0xff] }
 0x205   :  { %v2087_v54 = vadd.f32 %v2055_v48, %v2023_v14  ;;  %v2088_v27 = vadd.f32 %v2056_v55, %v2024_v39  ;;  %v2089_v18 = vadd.f32 %v2057_v32, %v2025_v33  ;;  %v2090_v60 = vadd.f32 %v2058_v49, %v2026_v25  ;;  %v4771_v33 = vld [vmem:[%s5114_s0 + $0x70] sm:$0xff] }
 0x206   :  { %v2091_v56 = vadd.f32 %v2059_v19, %v2027_v47  ;;  %v2362_v29 = vsel %vm2140_vm0, %v2085_v38, %v2084_v4  ;;  %v4644_v9 = vmul.f32 %v4640_v62, %v5221_v5  ;;  %v4654_v23 = vmul.f32 %v4650_v58, %v5222_v13 }
 0x207   :  { %v2363_v61 = vsel %vm2142_vm1, %v2086_v7, %v2362_v29  ;;  %v4663_v3 = vmul.f32 %v4659_v41, %v5221_v5  ;;  %v4672_v11 = vmul.f32 %v4668_v1, %v5222_v13  ;;  %v4682_v28 = vmul.f32 %v4678_v0, %v5221_v5 }
 0x208   :  { %v2364_v37 = vsel %vm2144_vm2, %v2087_v54, %v2363_v61  ;;  %v4691_v22 = vmul.f32 %v4687_v24, %v5222_v13  ;;  %v4700_v53 = vmul.f32 %v4696_v6, %v5221_v5  ;;  %v4710_v52 = vmul.f32 %v4706_v17, %v5222_v13 }
 0x209   :  { %v2365_v2 = vsel %vm2146_vm3, %v2088_v27, %v2364_v37  ;;  %v4719_v10 = vmul.f32 %v4715_v35, %v5221_v5  ;;  %v4728_v31 = vmul.f32 %v4724_v20, %v5222_v13  ;;  %v4738_v15 = vmul.f32 %v4734_v30, %v5221_v5 }
 0x20a   :  { %v2366_v57 = vsel %vm2148_vm4, %v2089_v18, %v2365_v2  ;;  %v4747_v59 = vmul.f32 %v4743_v36, %v5222_v13  ;;  %v4756_v50 = vmul.f32 %v4752_v51, %v5221_v5  ;;  %v4766_v39 = vmul.f32 %v4762_v45, %v5222_v13 }
 0x20b   :  { %v2367_v14 = vsel %vm2150_vm5, %v2090_v60, %v2366_v57  ;;  %v4775_v25 = vmul.f32 %v4771_v33, %v5221_v5  ;;  %v222_v21 = vsel %vm221_vm14, %v4640_v62, 0.0  ;;  %v223_v44 = vsel %vm221_vm14, %v4650_v58, 0.0 }
 0x20c   :  { %v2368_v12 = vsel %vm2152_vm6, %v2091_v56, %v2367_v14  ;;  %v231_v48 = vsel %vm221_vm14, %v4659_v41, 0.0  ;;  %v232_v47 = vsel %vm221_vm14, %v4668_v1, 0.0  ;;  %v224_v55 = vadd.f32 %v223_v44, %v222_v21 }
 0x20d   :  { %2385 = vrot.lane.b32.xlu0 %v2368_v12, %s2604_s11  ;;  %v233_v32 = vadd.f32 %v232_v47, %v231_v48  ;;  %v240_v49 = vsel %vm221_vm14, %v4678_v0, 0.0  ;;  %v241_v19 = vsel %vm221_vm14, %v4687_v24, 0.0  ;;  %v249_v38 = vsel %vm221_vm14, %v4696_v6, 0.0 }
 0x20e   :  { %v242_v4 = vadd.f32 %v241_v19, %v240_v49  ;;  %v250_v7 = vsel %vm221_vm14, %v4706_v17, 0.0  ;;  %v258_v54 = vsel %vm221_vm14, %v4715_v35, 0.0  ;;  %v225_v27 = vrot.slane %v224_v55, 4 }
 0x20f   :  { %v234_v18 = vrot.slane %v233_v32, 4  ;;  %v251_v60 = vadd.f32 %v250_v7, %v249_v38  ;;  %v259_v56 = vsel %vm221_vm14, %v4724_v20, 0.0  ;;  %v267_v61 = vsel %vm221_vm14, %v4734_v30, 0.0 }
 0x210   :  { %v243_v29 = vrot.slane %v242_v4, 4  ;;  %v260_v5 = vadd.f32 %v259_v56, %v258_v54  ;;  %v268_v37 = vsel %vm221_vm14, %v4743_v36, 0.0  ;;  %v226_v2 = vadd.f32 %v225_v27, %v224_v55 }
 0x211   :  { %v235_v57 = vadd.f32 %v234_v18, %v233_v32  ;;  %v252_v14 = vrot.slane %v251_v60, 4  ;;  %v269_v21 = vadd.f32 %v268_v37, %v267_v61  ;;  %v276_v48 = vsel %vm221_vm14, %v4752_v51, 0.0 }
 0x212   :  { %v244_v12 = vadd.f32 %v243_v29, %v242_v4  ;;  %v261_v44 = vrot.slane %v260_v5, 4  ;;  %v277_v47 = vsel %vm221_vm14, %v4762_v45, 0.0  ;;  %v227_v49 = vrot.slane %v226_v2, 2 }
 0x213   :  { %v236_v19 = vrot.slane %v235_v57, 2  ;;  %v253_v38 = vadd.f32 %v252_v14, %v251_v60  ;;  %v270_v7 = vrot.slane %v269_v21, 4  ;;  %v278_v34 = vadd.f32 %v277_v47, %v276_v48 }
 0x214   :  { %v245_v54 = vrot.slane %v244_v12, 2  ;;  %v262_v56 = vadd.f32 %v261_v44, %v260_v5  ;;  %v285_v55 = vsel %vm221_vm14, %v4771_v33, 0.0  ;;  %v228_v32 = vadd.f32 %v227_v49, %v226_v2 }
 0x215   :  { %v237_v27 = vadd.f32 %v236_v19, %v235_v57  ;;  %v254_v4 = vrot.slane %v253_v38, 2  ;;  %v271_v18 = vadd.f32 %v270_v7, %v269_v21  ;;  %v279_v37 = vrot.slane %v278_v34, 4 }
 0x216   :  { %v246_v29 = vadd.f32 %v245_v54, %v244_v12  ;;  %v263_v61 = vrot.slane %v262_v56, 2  ;;  %v286_v60 = vsel %vm221_vm14, %v4812_v16, 0.0  ;;  %v229_v5 = vrot.slane %v228_v32, 1 }
 0x217   :  { %v238_v14 = vrot.slane %v237_v27, 1  ;;  %v255_v44 = vadd.f32 %v254_v4, %v253_v38  ;;  %v272_v48 = vrot.slane %v271_v18, 2  ;;  %v280_v57 = vadd.f32 %v279_v37, %v278_v34 }
 0x218   :  { %v247_v47 = vrot.slane %v246_v29, 1  ;;  %v264_v2 = vadd.f32 %v263_v61, %v262_v56  ;;  %v287_v49 = vadd.f32 %v286_v60, %v285_v55  ;;  %v4818_v21 = vmul.f32 %v4812_v16, %v5222_v13 }
 0x219   :  { %v4820_v12 = vadd.f32 %v229_v5, %v228_v32  ;;  %v256_v19 = vrot.slane %v255_v44, 1  ;;  %v273_v7 = vadd.f32 %v272_v48, %v271_v18  ;;  %v4822_v54 = vadd.f32 %v238_v14, %v237_v27 }
 0x21a   :  { %v265_v42 = vrot.slane %v264_v2, 1  ;;  %v281_v63 = vrot.slane %v280_v57, 2  ;;  %v288_v8 = vrot.slane %v287_v49, 4  ;;  %v4824_v46 = vadd.f32 %v247_v47, %v246_v29 }
 0x21b   :  { %5223 = vst [vmem:[#allocation10_spill] sm:$0xff] %v4822_v54  ;;  %v274_v38 = vrot.slane %v273_v7, 1  ;;  %v510_v34 = vsel %vm221_vm14, %v4644_v9, 0.0  ;;  %v511_v56 = vsel %vm221_vm14, %v4654_v23, 0.0  ;;  %v4830_v13 = vadd.f32 %v256_v19, %v255_v44 }
 0x21c   :  { %5224 = vst [vmem:[#allocation12_spill] sm:$0xff] %v4824_v46  ;;  %v282_v55 = vadd.f32 %v281_v63, %v280_v57  ;;  %v289_v32 = vadd.f32 %v288_v8, %v287_v49  ;;  %v512_v4 = vadd.f32 %v511_v56, %v510_v34  ;;  %v4832_v18 = vadd.f32 %v265_v42, %v264_v2 }
 0x21d   :  { %5225 = vst [vmem:[#allocation31_spill] sm:$0xff] %v4830_v13  ;;  %v4834_v27 = vadd.f32 %v274_v38, %v273_v7  ;;  %v519_v29 = vsel %vm221_vm14, %v4663_v3, 0.0  ;;  %v520_v61 = vsel %vm221_vm14, %v4672_v11, 0.0  ;;  %v528_v44 = vsel %vm221_vm14, %v4682_v28, 0.0 }
 0x21e   :  { %5226 = vst [vmem:[#allocation32_spill] sm:$0xff] %v4832_v18  ;;  %v283_v37 = vrot.slane %v282_v55, 1  ;;  %v290_v60 = vrot.slane %v289_v32, 2  ;;  %v513_v5 = vrot.slane %v512_v4, 4  ;;  %v521_v14 = vadd.f32 %v520_v61, %v519_v29 }
 0x21f   :  { %5227 = vst [vmem:[#allocation33_spill] sm:$0xff] %v4834_v27  ;;  %v529_v8 = vsel %vm221_vm14, %v4691_v22, 0.0  ;;  %v537_v63 = vsel %vm221_vm14, %v4700_v53, 0.0  ;;  %v538_v42 = vsel %vm221_vm14, %v4710_v52, 0.0  ;;  %v546_v57 = vsel %vm221_vm14, %v4719_v10, 0.0 }
 0x220   :  { %v291_v48 = vadd.f32 %v290_v60, %v289_v32  ;;  %v514_v47 = vadd.f32 %v513_v5, %v512_v4  ;;  %v522_v2 = vrot.slane %v521_v14, 4  ;;  %v4850_v49 = vadd.f32 %v283_v37, %v282_v55 }
 0x221   :  { %v530_v19 = vadd.f32 %v529_v8, %v528_v44  ;;  %v539_v7 = vadd.f32 %v538_v42, %v537_v63  ;;  %v547_v38 = vsel %vm221_vm14, %v4728_v31, 0.0  ;;  %v555_v61 = vsel %vm221_vm14, %v4738_v15, 0.0 }
 0x222   :  { %5228 = vst [vmem:[#allocation34_spill] sm:$0xff] %v4850_v49  ;;  %v515_v34 = vrot.slane %v514_v47, 2  ;;  %v523_v56 = vadd.f32 %v522_v2, %v521_v14  ;;  %v548_v29 = vadd.f32 %v547_v38, %v546_v57  ;;  %v292_v26 = vrot.slane %v291_v48, 1 }
 0x223   :  { %v531_v32 = vrot.slane %v530_v19, 4  ;;  %v540_v4 = vrot.slane %v539_v7, 4  ;;  %v556_v60 = vsel %vm221_vm14, %v4747_v59, 0.0  ;;  %v564_v44 = vsel %vm221_vm14, %v4756_v50, 0.0 }
 0x224   :  { %v516_v5 = vadd.f32 %v515_v34, %v514_v47  ;;  %v524_v55 = vrot.slane %v523_v56, 2  ;;  %v549_v37 = vrot.slane %v548_v29, 4  ;;  %v557_v42 = vadd.f32 %v556_v60, %v555_v61 }
 0x225   :  { %v532_v8 = vadd.f32 %v531_v32, %v530_v19  ;;  %v541_v63 = vadd.f32 %v540_v4, %v539_v7  ;;  %v565_v14 = vsel %vm221_vm14, %v4766_v39, 0.0  ;;  %v4862_v49 = vadd.f32 %v292_v26, %v291_v48 }
 0x226   :  { %v517_v2 = vrot.slane %v516_v5, 1  ;;  %v525_v57 = vadd.f32 %v524_v55, %v523_v56  ;;  %v550_v38 = vadd.f32 %v549_v37, %v548_v29  ;;  %v566_v43 = vadd.f32 %v565_v14, %v564_v44 }
 0x227   :  { %5229 = vst [vmem:[#allocation35_spill] sm:$0xff] %v4862_v49  ;;  %v533_v27 = vrot.slane %v532_v8, 2  ;;  %v542_v18 = vrot.slane %v541_v63, 2  ;;  %v558_v47 = vrot.slane %v557_v42, 4  ;;  %v573_v19 = vsel %vm221_vm14, %v4775_v25, 0.0 }
 0x228   :  { %v526_v34 = vrot.slane %v525_v57, 1  ;;  %v551_v13 = vrot.slane %v550_v38, 2  ;;  %v567_v46 = vrot.slane %v566_v43, 4  ;;  %v574_v4 = vsel %vm221_vm14, %v4818_v21, 0.0 }
 0x229   :  { %v534_v7 = vadd.f32 %v533_v27, %v532_v8  ;;  %v543_v61 = vadd.f32 %v542_v18, %v541_v63  ;;  %v559_v32 = vadd.f32 %v558_v47, %v557_v42  ;;  %v4868_v56 = vadd.f32 %v517_v2, %v516_v5 }
 0x22a   :  { %v552_v29 = vadd.f32 %v551_v13, %v550_v38  ;;  %v568_v26 = vadd.f32 %v567_v46, %v566_v43  ;;  %v575_v48 = vadd.f32 %v574_v4, %v573_v19  ;;  %v4870_v60 = vadd.f32 %v526_v34, %v525_v57 }
 0x22b   :  { %v535_v55 = vrot.slane %v534_v7, 1  ;;  %v544_v37 = vrot.slane %v543_v61, 1  ;;  %v560_v44 = vrot.slane %v559_v32, 2  ;;  %v798_v18 = vmul.f32 %v4640_v62, %v4644_v9 }
 0x22c   :  { %v553_v14 = vrot.slane %v552_v29, 1  ;;  %v569_v49 = vrot.slane %v568_v26, 2  ;;  %v576_v54 = vrot.slane %v575_v48, 4  ;;  %v799_v43 = vmul.f32 %v4650_v58, %v4654_v23 }
 0x22d   :  { %v4874_v27 = vadd.f32 %v535_v55, %v534_v7  ;;  %v4876_v8 = vadd.f32 %v544_v37, %v543_v61  ;;  %v561_v5 = vadd.f32 %v560_v44, %v559_v32  ;;  %v800_v42 = vmul.f32 %v4659_v41, %v4663_v3 }
 0x22e   :  { %v4880_v46 = vadd.f32 %v553_v14, %v552_v29  ;;  %v570_v13 = vadd.f32 %v569_v49, %v568_v26  ;;  %v577_v63 = vadd.f32 %v576_v54, %v575_v48  ;;  %v801_v57 = vmul.f32 %v4668_v1, %v4672_v11 }
 0x22f   :  { %v562_v2 = vrot.slane %v561_v5, 1  ;;  %v802_v62 = vmul.f32 %v4678_v0, %v4682_v28  ;;  %v803_v9 = vmul.f32 %v4687_v24, %v4691_v22  ;;  %v804_v58 = vmul.f32 %v4696_v6, %v4700_v53 }
 0x230   :  { %v571_v38 = vrot.slane %v570_v13, 1  ;;  %v578_v47 = vrot.slane %v577_v63, 2  ;;  %v805_v23 = vmul.f32 %v4706_v17, %v4710_v52  ;;  %v806_v41 = vmul.f32 %v4715_v35, %v4719_v10 }
 0x231   :  { %v4894_v54 = vadd.f32 %v562_v2, %v561_v5  ;;  %v807_v3 = vmul.f32 %v4724_v20, %v4728_v31  ;;  %v808_v1 = vmul.f32 %v4734_v30, %v4738_v15  ;;  %v809_v28 = vmul.f32 %v4743_v36, %v4747_v59  ;;  %v2411_v2 = vld [vmem:[%s5116_s2 + $0x10] sm:$0xff] }
 0x232   :  { %v4902_v11 = vadd.f32 %v571_v38, %v570_v13  ;;  %v4904_v0 = vadd.f32 %v578_v47, %v577_v63  ;;  %v810_v24 = vmul.f32 %v4752_v51, %v4756_v50  ;;  %v811_v22 = vmul.f32 %v4762_v45, %v4766_v39 }
 0x233   :  { %v812_v6 = vmul.f32 %v4771_v33, %v4775_v25  ;;  %v862_v53 = vsel %vm221_vm14, %v798_v18, 0.0  ;;  %v863_v17 = vsel %vm221_vm14, %v799_v43, 0.0  ;;  %v813_v52 = vmul.f32 %v4812_v16, %v4818_v21 }
 0x234   :  { %v864_v35 = vadd.f32 %v863_v17, %v862_v53  ;;  %v871_v10 = vsel %vm221_vm14, %v800_v42, 0.0  ;;  %v872_v20 = vsel %vm221_vm14, %v801_v57, 0.0  ;;  %v580_v31 = vrot.slane %v4904_v0, 1  ;;  %v2412_v42 = vld [vmem:[%s5116_s2 + $0x18] sm:$0xff] }
 0x235   :  { %v873_v30 = vadd.f32 %v872_v20, %v871_v10  ;;  %v880_v15 = vsel %vm221_vm14, %v802_v62, 0.0  ;;  %v881_v36 = vsel %vm221_vm14, %v803_v9, 0.0  ;;  %v889_v50 = vsel %vm221_vm14, %v804_v58, 0.0  ;;  %2486 = vmatpush.msra.mxu2 %v2412_v42  ;;  %2442 = vmatpush.msra.mxu0 %v2412_v42 }
 0x236   :  { %v865_v59 = vrot.slane %v864_v35, 4  ;;  %v882_v51 = vadd.f32 %v881_v36, %v880_v15  ;;  %v890_v45 = vsel %vm221_vm14, %v805_v23, 0.0  ;;  %v898_v33 = vsel %vm221_vm14, %v806_v41, 0.0  ;;  %2487 = vmatpush.msra.mxu3 %v2412_v42  ;;  %2485 = vmatpush.msra.mxu1 %v2412_v42 }
 0x237   :  { %v874_v39 = vrot.slane %v873_v30, 4  ;;  %v891_v16 = vadd.f32 %v890_v45, %v889_v50  ;;  %v899_v25 = vsel %vm221_vm14, %v807_v3, 0.0  ;;  %v907_v19 = vsel %vm221_vm14, %v808_v1, 0.0  ;;  %v2410_v3 = vld [vmem:[%s5116_s2 + $0x8] sm:$0xff]  ;;  %2489 = vmatpush.msra.mxu2 %v2411_v2  ;;  %2443 = vmatpush.msra.mxu0 %v2411_v2 }
 0x238   :  { %v866_v21 = vadd.f32 %v865_v59, %v864_v35  ;;  %v883_v49 = vrot.slane %v882_v51, 4  ;;  %v900_v34 = vadd.f32 %v899_v25, %v898_v33  ;;  %v908_v32 = vsel %vm221_vm14, %v809_v28, 0.0  ;;  %v2409_v35 = vld [vmem:[%s5116_s2] sm:$0xff]  ;;  %2490 = vmatpush.msra.mxu3 %v2411_v2  ;;  %2488 = vmatpush.msra.mxu1 %v2411_v2  ;;  %v5231_v25 = vld [vmem:[#allocation12_spill] sm:$0xff] }
 0x239   :  { %v875_v7 = vadd.f32 %v874_v39, %v873_v30  ;;  %v892_v61 = vrot.slane %v891_v16, 4  ;;  %v916_v4 = vsel %vm221_vm14, %v810_v24, 0.0  ;;  %v909_v55 = vadd.f32 %v908_v32, %v907_v19  ;;  %2492 = vmatpush.msra.mxu2 %v2410_v3  ;;  %2444 = vmatpush.msra.mxu0 %v2410_v3  ;;  %v5230_v39 = vld [vmem:[#allocation10_spill] sm:$0xff]  ;;  %v5234_v32 = vld [vmem:[#allocation33_spill] sm:$0xff] }
 0x23a   :  { %v867_v29 = vrot.slane %v866_v21, 2  ;;  %v884_v26 = vadd.f32 %v883_v49, %v882_v51  ;;  %v901_v48 = vrot.slane %v900_v34, 4  ;;  %v917_v14 = vsel %vm221_vm14, %v811_v22, 0.0  ;;  %2493 = vmatpush.msra.mxu3 %v2410_v3  ;;  %2491 = vmatpush.msra.mxu1 %v2410_v3  ;;  %v5232_v49 = vld [vmem:[#allocation31_spill] sm:$0xff] }
 0x23b   :  { %v876_v37 = vrot.slane %v875_v7, 2  ;;  %v893_v44 = vadd.f32 %v892_v61, %v891_v16  ;;  %v925_v18 = vsel %vm221_vm14, %v812_v6, 0.0  ;;  %v910_v63 = vrot.slane %v909_v55, 4  ;;  %2495 = vmatpush.msra.mxu2 %v2409_v35  ;;  %2445 = vmatpush.msra.mxu0 %v2409_v35 }
 0x23c   :  { %v868_v5 = vadd.f32 %v867_v29, %v866_v21  ;;  %v885_v43 = vrot.slane %v884_v26, 2  ;;  %v902_v13 = vadd.f32 %v901_v48, %v900_v34  ;;  %v918_v9 = vadd.f32 %v917_v14, %v916_v4  ;;  %2496 = vmatpush.msra.mxu3 %v2409_v35  ;;  %2494 = vmatpush.msra.mxu1 %v2409_v35 }
 0x23d   :  { %v877_v57 = vadd.f32 %v876_v37, %v875_v7  ;;  %v894_v62 = vrot.slane %v893_v44, 2  ;;  %v926_v38 = vsel %vm221_vm14, %v813_v52, 0.0  ;;  %v911_v41 = vadd.f32 %v910_v63, %v909_v55  ;;  %v5233_v7 = vld [vmem:[#allocation32_spill] sm:$0xff]  ;;  %v5236_v55 = vld [vmem:[#allocation35_spill] sm:$0xff] }
 0x23e   :  { %v869_v47 = vrot.slane %v868_v5, 1  ;;  %v886_v58 = vadd.f32 %v885_v43, %v884_v26  ;;  %v903_v23 = vrot.slane %v902_v13, 2  ;;  %v919_v24 = vrot.slane %v918_v9, 4  ;;  %v5235_v26 = vld [vmem:[#allocation34_spill] sm:$0xff] }
 0x23f   :  { %v878_v1 = vrot.slane %v877_v57, 1  ;;  %v895_v28 = vadd.f32 %v894_v62, %v893_v44  ;;  %v927_v22 = vadd.f32 %v926_v38, %v925_v18  ;;  %v581_v6 = vadd.f32 %v580_v31, %v4904_v0 }
 0x240   :  { %v887_v53 = vrot.slane %v886_v58, 1  ;;  %v904_v17 = vadd.f32 %v903_v23, %v902_v13  ;;  %v912_v52 = vrot.slane %v911_v41, 2  ;;  %v870_v10 = vadd.f32 %v869_v47, %v868_v5 }
 0x241   :  { %v896_v20 = vrot.slane %v895_v28, 1  ;;  %v920_v30 = vadd.f32 %v919_v24, %v918_v9  ;;  %v928_v15 = vrot.slane %v927_v22, 4  ;;  %v879_v36 = vadd.f32 %v878_v1, %v877_v57  ;;  %v4985_v57 = vpop.permute.xlu2 %2245 }
 0x242   :  { %v888_v59 = vadd.f32 %v887_v53, %v886_v58  ;;  %v905_v51 = vrot.slane %v904_v17, 1  ;;  %v4948_v0 = vmul.f32 %v4561_v40, %v4820_v12  ;;  %v913_v31 = vadd.f32 %v912_v52, %v911_v41 }
 0x243   :  { %v921_v50 = vrot.slane %v920_v30, 2  ;;  %v929_v45 = vadd.f32 %v928_v15, %v927_v22  ;;  %v4952_v16 = vmul.f32 %v4561_v40, %v5230_v39  ;;  %v897_v33 = vadd.f32 %v896_v20, %v895_v28 }
 0x244   :  { %v4956_v21 = vmul.f32 %v4561_v40, %v5231_v25  ;;  %v4960_v12 = vmul.f32 %v4561_v40, %v5232_v49  ;;  %v4964_v61 = vmul.f32 %v4561_v40, %v5233_v7  ;;  %v4968_v4 = vmul.f32 %v4561_v40, %v5234_v32 }
 0x245   :  { %v922_v34 = vadd.f32 %v921_v50, %v920_v30  ;;  %v930_v19 = vrot.slane %v929_v45, 2  ;;  %v906_v29 = vadd.f32 %v905_v51, %v904_v17  ;;  %v4972_v48 = vmul.f32 %v4561_v40, %v5235_v26  ;;  %v5238_v26 = vld [vmem:[#allocation15_spill] sm:$0xff] }
 0x246   :  { %v4976_v37 = vmul.f32 %v4561_v40, %v5236_v55  ;;  %v1916_v44 = vmul.f32 2.0, %v4948_v0  ;;  %v914_v14 = vrot.slane %v913_v31, 1  ;;  %v1917_v5 = vmul.f32 2.0, %v4952_v16 }
 0x247   :  { %v931_v18 = vadd.f32 %v930_v19, %v929_v45  ;;  %v1918_v43 = vmul.f32 2.0, %v4956_v21  ;;  %v1919_v13 = vmul.f32 2.0, %v4960_v12  ;;  %v1920_v63 = vmul.f32 2.0, %v4964_v61 }
 0x248   :  { %v1921_v42 = vmul.f32 2.0, %v4968_v4  ;;  %v1922_v2 = vmul.f32 2.0, %v4972_v48  ;;  %v923_v62 = vrot.slane %v922_v34, 1  ;;  %v1923_v38 = vmul.f32 2.0, %v4976_v37 }
 0x249   :  { %v932_v9 = vrot.slane %v931_v18, 1  ;;  %v1948_v47 = vmul.f32 %v1916_v44, %v4868_v56  ;;  %v1949_v58 = vmul.f32 %v1917_v5, %v4870_v60  ;;  %v1950_v23 = vmul.f32 %v1918_v43, %v4874_v27 }
 0x24a   :  { %v1951_v41 = vmul.f32 %v1919_v13, %v4876_v8  ;;  %v1952_v3 = vmul.f32 %v1920_v63, %v4880_v46  ;;  %v915_v1 = vadd.f32 %v914_v14, %v913_v31  ;;  %v1953_v28 = vmul.f32 %v1921_v42, %v4894_v54  ;;  %v5240_v42 = vld [vmem:[#allocation17_spill] sm:$0xff] }
 0x24b   :  { %v1954_v24 = vmul.f32 %v1922_v2, %v4902_v11  ;;  %v1955_v22 = vmul.f32 %v1923_v38, %v581_v6  ;;  %v1980_v53 = vsub.f32 %v870_v10, %v1948_v47  ;;  %v1981_v17 = vsub.f32 %v879_v36, %v1949_v58  ;;  %v5005_v36 = vpop.permute.xlu2 %2241  ;;  %v5241_v38 = vld [vmem:[#allocation18_spill] sm:$0xff] }
 0x24c   :  { %v1982_v52 = vsub.f32 %v888_v59, %v1950_v23  ;;  %v1983_v35 = vsub.f32 %v897_v33, %v1951_v41  ;;  %v924_v20 = vadd.f32 %v923_v62, %v922_v34  ;;  %v933_v56 = vadd.f32 %v932_v9, %v931_v18  ;;  %v2244_v41 = vpop.permute.xlu1 %2243 }
 0x24d   :  { %v1984_v30 = vsub.f32 %v906_v29, %v1952_v3  ;;  %v1985_v60 = vsub.f32 %v915_v1, %v1953_v28  ;;  %v2012_v27 = vmul.f32 %v1980_v53, %v4561_v40  ;;  %v2013_v8 = vmul.f32 %v1981_v17, %v4561_v40  ;;  %v5237_v29 = vld [vmem:[#allocation14_spill] sm:$0xff]  ;;  %v2316_v53 = vpop.permute.xlu0 %2315 }
 0x24e   :  { %v2014_v46 = vmul.f32 %v1982_v52, %v4561_v40  ;;  %v1986_v15 = vsub.f32 %v924_v20, %v1954_v24  ;;  %v1987_v51 = vsub.f32 %v933_v56, %v1955_v22  ;;  %v2015_v54 = vmul.f32 %v1983_v35, %v4561_v40  ;;  %v5242_v3 = vld [vmem:[#allocation6_spill] sm:$0xff]  ;;  %v5243_v24 = vld [vmem:[#allocation8_spill] sm:$0xff]  ;;  %v5244_v52 = vld [vmem:[#allocation13_spill] sm:$0xff] }
 0x24f   :  { %v2044_v11 = vmul.f32 %v4948_v0, %v4948_v0  ;;  %v2045_v6 = vmul.f32 %v4952_v16, %v4952_v16  ;;  %v2046_v10 = vmul.f32 %v4956_v21, %v4956_v21  ;;  %v2016_v59 = vmul.f32 %v1984_v30, %v4561_v40 }
 0x250   :  { %v2017_v31 = vmul.f32 %v1985_v60, %v4561_v40  ;;  %v2047_v50 = vmul.f32 %v4960_v12, %v4960_v12  ;;  %v2018_v25 = vmul.f32 %v1986_v15, %v4561_v40  ;;  %v2019_v49 = vmul.f32 %v1987_v51, %v4561_v40  ;;  %v5239_v40 = vld [vmem:[#allocation16_spill] sm:$0xff] }
 0x251   :  { %v2076_v45 = vadd.f32 %v2044_v11, %v2012_v27  ;;  %v2077_v39 = vadd.f32 %v2045_v6, %v2013_v8  ;;  %v2078_v33 = vadd.f32 %v2046_v10, %v2014_v46  ;;  %v2048_v34 = vmul.f32 %v4964_v61, %v4964_v61  ;;  %v5246_v11 = vld [vmem:[#allocation22_spill] sm:$0xff] }
 0x252   :  { %v2049_v19 = vmul.f32 %v4968_v4, %v4968_v4  ;;  %v2079_v7 = vadd.f32 %v2047_v50, %v2015_v54  ;;  %v2161_v55 = vsel %vm2140_vm0, %v5238_v26, %v5237_v29  ;;  %v2050_v44 = vmul.f32 %v4972_v48, %v4972_v48  ;;  %v5250_v50 = vld [vmem:[#allocation26_spill] sm:$0xff]  ;;  %v5256_v26 = vld [vmem:[#allocation29_spill] sm:$0xff] }
 0x253   :  { %v2355_v32 = vsel %vm2140_vm0, %v2077_v39, %v2076_v45  ;;  %v2080_v14 = vadd.f32 %v2048_v34, %v2016_v59  ;;  %v2162_v5 = vsel %vm2142_vm1, %v5239_v40, %v2161_v55  ;;  %v2051_v43 = vmul.f32 %v4976_v37, %v4976_v37  ;;  %v2388_v20 = vpop.permute.xlu2 %2387  ;;  %v5251_v45 = vld [vmem:[#allocation9_spill] sm:$0xff]  ;;  %v5252_v39 = vld [vmem:[#allocation27_spill] sm:$0xff]  ;;  %v5254_v34 = vld [vmem:[#allocation28_spill] sm:$0xff] }
 0x254   :  { %v2356_v18 = vsel %vm2142_vm1, %v2078_v33, %v2355_v32  ;;  %v2081_v13 = vadd.f32 %v2049_v19, %v2017_v31  ;;  %v2163_v2 = vsel %vm2144_vm2, %v5240_v42, %v2162_v5  ;;  %v2082_v62 = vadd.f32 %v2050_v44, %v2018_v25  ;;  %v5249_v31 = vld [vmem:[#allocation25_spill] sm:$0xff]  ;;  %v5253_v33 = vld [vmem:[#allocation11_spill] sm:$0xff]  ;;  %v5257_v44 = vld [vmem:[#allocation20_spill] sm:$0xff] }
 0x255   :  { %v2357_v63 = vsel %vm2144_vm2, %v2079_v7, %v2356_v18  ;;  %v2164_v47 = vsel %vm2146_vm3, %v5241_v38, %v2163_v2  ;;  %v2083_v58 = vadd.f32 %v2051_v43, %v2019_v49  ;;  %v2141_v27 = vsel %vm2140_vm0, %v4952_v16, %v4948_v0  ;;  %v5245_v16 = vld [vmem:[#allocation21_spill] sm:$0xff]  ;;  %v2312_v49 = vpop.permute.xlu0 %2311  ;;  %v5255_v7 = vld [vmem:[#allocation19_spill] sm:$0xff] }
 0x256   :  { %v2358_v9 = vsel %vm2146_vm3, %v2080_v14, %v2357_v63  ;;  %v2165_v1 = vsel %vm2148_vm4, %v5242_v3, %v2164_v47  ;;  %v2143_v8 = vsel %vm2142_vm1, %v4956_v21, %v2141_v27  ;;  %v2168_v6 = vsel %vm2140_vm0, %v5246_v11, %v5245_v16  ;;  %v5247_v21 = vld [vmem:[#allocation23_spill] sm:$0xff]  ;;  %v5258_v40 = vld [vmem:[#allocation5_spill] sm:$0xff] }
 0x257   :  { %v2359_v23 = vsel %vm2148_vm4, %v2081_v13, %v2358_v9  ;;  %v2166_v22 = vsel %vm2150_vm5, %v5243_v24, %v2165_v1  ;;  %v2145_v46 = vsel %vm2144_vm2, %v4960_v12, %v2143_v8  ;;  %v2169_v10 = vsel %vm2142_vm1, %v5247_v21, %v2168_v6  ;;  %v5248_v12 = vld [vmem:[#allocation24_spill] sm:$0xff]  ;;  %v5259_v42 = vld [vmem:[#allocation7_spill] sm:$0xff]  ;;  %v5260_v9 = vld [vmem:[#allocation30_spill] sm:$0xff] }
 0x258   :  { %v2360_v28 = vsel %vm2150_vm5, %v2082_v62, %v2359_v23  ;;  %v2167_v35 = vsel %vm2152_vm6, %v5244_v52, %v2166_v22  ;;  %v2147_v15 = vsel %vm2146_vm3, %v4964_v61, %v2145_v46  ;;  %v2170_v59 = vsel %vm2144_vm2, %v5248_v12, %v2169_v10  ;;  %v2318_v61 = vpop.permute.xlu1 %2317 }
 0x259   :  { %v2361_v17 = vsel %vm2152_vm6, %v2083_v58, %v2360_v28  ;;  %v2397_v56 = vsel %vm221_vm14, %v2167_v35, %v2244_v41  ;;  %v2149_v51 = vsel %vm2148_vm4, %v4968_v4, %v2147_v15  ;;  %v2154_v4 = vsel %vm2140_vm0, %v5250_v50, %v5249_v31 }
 0x25a   :  { %2383 = vrot.lane.b32.xlu2 %v2361_v17, %s2604_s11  ;;  %v2402_v30 = vsel %vm2399_vm9, %v2397_v56, %v2316_v53  ;;  %v2151_v54 = vsel %vm2150_vm5, %v4972_v48, %v2149_v51  ;;  %v2171_v48 = vsel %vm2146_vm3, %v5251_v45, %v2170_v59 }
 0x25b   :  { %v2407_v60 = vsel %vm2404_vm10, %v2402_v30, %v2388_v20  ;;  %v2153_v0 = vsel %vm2152_vm6, %v4976_v37, %v2151_v54  ;;  %v2155_v37 = vsel %vm2142_vm1, %v5252_v39, %v2154_v4  ;;  %v2172_v25 = vsel %vm2148_vm4, %v5253_v33, %v2171_v48 }
 0x25c   :  { %2483 = vmatmul.msk.f32.vlgmr.msra.gmra.mxu2 %vm2417_vm11, %v2407_v60  ;;  %v2156_v19 = vsel %vm2144_vm2, %v5254_v34, %v2155_v37  ;;  %v2173_v32 = vsel %vm2150_vm5, %v5255_v7, %v2172_v25 }
 0x25d   :  { %v2157_v55 = vsel %vm2146_vm3, %v5256_v26, %v2156_v19  ;;  %v2174_v14 = vsel %vm2152_vm6, %v5257_v44, %v2173_v32  ;;  %v2390_v13 = vpop.permute.xlu0 %2389 }
 0x25e   :  { %v2398_v18 = vsel %vm221_vm14, %v2174_v14, %v4985_v57  ;;  %v2158_v5 = vsel %vm2148_vm4, %v5258_v40, %v2157_v55 }
 0x25f   :  { %v2403_v43 = vsel %vm2399_vm9, %v2398_v18, %v2318_v61  ;;  %v2159_v2 = vsel %vm2150_vm5, %v5259_v42, %v2158_v5 }
 0x260   :  { %v2240_v29 = vpop.permute.xlu1 %2239  ;;  %v2408_v63 = vsel %vm2404_vm10, %v2403_v43, %v2390_v13  ;;  %v2160_v38 = vsel %vm2152_vm6, %v5260_v9, %v2159_v2 }
 0x261   :  { %2484 = vmatmul.msk.f32.vlgmr.msra.gmra.mxu3 %vm2417_vm11, %v2408_v63  ;;  %v2396_v57 = vsel %vm221_vm14, %v2160_v38, %v5005_v36  ;;  %v2395_v41 = vsel %vm221_vm14, %v2153_v0, %v2240_v29  ;;  %v2506_v36 = vld [vmem:[%s5117_s3] ss:$0 sm:$0xff]  ;;  %s2606_s3 = smov 128  }
 0x262   :  { %v2400_v3 = vsel %vm2399_vm9, %v2395_v41, %v2312_v49 }
 0x268   :  { %v2314_v62 = vpop.permute.xlu1 %2313 }
 0x269   :  { %v2401_v47 = vsel %vm2399_vm9, %v2396_v57, %v2314_v62 }
 0x27f   :  { %v2386_v58 = vpop.permute.xlu0 %2385 }
 0x280   :  { %v2406_v23 = vsel %vm2404_vm10, %v2401_v47, %v2386_v58 }
 0x281   :  { %2482 = vmatmul.msk.f32.vlgmr.msra.gmra.mxu1 %vm2417_vm11, %v2406_v23 }
 0x2b4   :  { %v2384_v1 = vpop.permute.xlu2 %2383 }
 0x2b5   :  { %v2405_v28 = vsel %vm2404_vm10, %v2400_v3, %v2384_v1 }
 0x2b6   :  { %2481 = vmatmul.msk.f32.vlgmr.msra.gmra.mxu0 %vm2417_vm11, %v2405_v28 }
 0x2df   :  { %v2453_v24 = vpop.f32.mrf.mxu2 }
 0x2e0   :  { %v2454_v22 = vadd.f32 %v2506_v36, %v2453_v24 }
 0x2e2   :  { %2461 = vst [vmem:[#allocation2 + $0x10] sm:$0xff] %v2454_v22 }
 0x2e4   :  { %v2456_v53 = vpop.f32.mrf.mxu3 }
 0x2e5   :  { %v2457_v17 = vadd.f32 %v2506_v36, %v2456_v53 }
 0x2e7   :  { %2462 = vst [vmem:[#allocation2 + $0x18] sm:$0xff] %v2457_v17 }
 0x2fe   :  { %v2450_v52 = vpop.f32.mrf.mxu1 }
 0x2ff   :  { %v2451_v35 = vadd.f32 %v2506_v36, %v2450_v52 }
 0x301   :  { %2460 = vst [vmem:[#allocation2 + $0x8] sm:$0xff] %v2451_v35 }
 0x333   :  { %v2447_v20 = vpop.f32.mrf.mxu0 }
 0x334   :  { %v2448_v56 = vadd.f32 %v2506_v36, %v2447_v20 }
 0x336   :  { %2459 = vst [vmem:[#allocation2] sm:$0xff] %v2448_v56 }
 0x337   :  { %2475 = dma.vmem_to_hbm [thread:$0]  %s2468_s13, 512, %s2470_s10, [#allocation3], %s2606_s3, %s2606_s3, %s2602_s6  }
 0x338   :  { %2599 = dma.done.wait [#allocation3], 512  }
 0x339   :  { %2600 = vsyncadd [#allocation3], 4294966784 }
 0x33a   :  { %2480 = vsyncpa [#allocation3], 1 }

</bundles_post_ra>
